<compile_context>
chip_gen: v7x
topology: tpu7x:2x2x1
jax: 0.10.0
libtpu: 0.0.40
codegen_flags: <defaults>
</compile_context>

<pallas_src>
import functools

import jax
import jax.numpy as jnp
import numpy as np
from jax import lax
from jax.experimental import pallas as pl
from jax.experimental.pallas import tpu as pltpu

EPS = 1e-5


def _log2(v):
    l = int(v).bit_length() - 1
    assert (1 << l) == v, f"{v} must be a power of two"
    return l


def _round_up8(c):
    return -(-c // 8) * 8


# --------------------------- in-kernel building blocks --------------------- #
def _make_masks(H, W, M, pad):
    """(1, M) boolean validity masks for every tap offset (dh, dw) in
    [-pad, pad]^2 (None for the always-valid (0, 0) tap).  Built ONCE per
    spatial resolution and shared by every conv at that resolution; they also
    mask the mod-M wrap of the lane roll, so there is no cross-row /
    cross-image / zero-padding leakage."""
    lane = lax.broadcasted_iota(jnp.int32, (1, M), 1)
    hh = (lane >> _log2(W)) & (H - 1)          # h of the output position
    ww = lane & (W - 1)                        # w of the output position
    masks = {}
    for dh in range(-pad, pad + 1):
        for dw in range(-pad, pad + 1):
            conds = []
            if dh > 0:
                conds.append(hh < H - dh)
            elif dh < 0:
                conds.append(hh >= -dh)
            if dw > 0:
                conds.append(ww < W - dw)
            elif dw < 0:
                conds.append(ww >= -dw)
            masks[(dh, dw)] = (functools.reduce(jnp.logical_and, conds)
                               if conds else None)
    return masks


def _same_conv(x, w_ref, H, W, masks):
    """Stride-1 'same' conv as ONE MXU matmul.

    x:      (Cin, M) f32 resident activation, lane layout j = n*H*W + h*W + w.
    w_ref:  (Cout, k*k*Cin) bf16 weight, tap-major flattened (kh, kw, cin).
    masks:  dict (dh, dw) -> (1, M) bool validity mask (see _make_masks).

    Each tap view x[., h+dh, w+dw] is a static pltpu.roll of the lane axis
    (XLU) with the boundary mask applied; the k*k masked views are stacked
    into a (k*k*Cin, M) operand (cast to bf16 once) and contracted against the
    pre-flattened weight with a single bf16 MXU matmul, f32 accumulation.
    """
    Cin, M = x.shape
    Cout, KKC = w_ref.shape
    kk = KKC // Cin
    k = int(round(kk ** 0.5))
    assert k * k == kk
    pad = (k - 1) // 2
    taps = []
    for kh in range(k):
        for kw in range(k):
            dh, dw = kh - pad, kw - pad
            d = dh * W + dw                                   # static lane shift
            xs = pltpu.roll(x, shift=(-d) % M, axis=1) if d else x
            m = masks[(dh, dw)]
            if m is not None:
                xs = jnp.where(m, xs, 0.0)
            taps.append(xs)
    stacked = jnp.concatenate(taps, axis=0).astype(jnp.bfloat16)   # (k*k*Cin, M)
    return jnp.dot(w_ref[...], stacked, preferred_element_type=jnp.float32)


def _bn_relu(y, g_ref, b_ref):
    """Train-mode BatchNorm (batch mean / biased var over the lane axis, one
    pass: sum + sum-of-squares) + affine + ReLU.  y:(Cout, M) f32."""
    inv_m = 1.0 / y.shape[1]
    mean = jnp.sum(y, axis=1, keepdims=True) * inv_m
    var = jnp.sum(y * y, axis=1, keepdims=True) * inv_m - mean * mean
    scale = lax.rsqrt(var + EPS) * g_ref[...]               # (Cout, 1)
    return jnp.maximum((y - mean) * scale + b_ref[...], 0.0)


# ------------------------------- fused kernel ------------------------------ #
def _convnet_kernel(x_ref,
                    w1_ref, g1_ref, b1_ref,
                    w2_ref, g2_ref, b2_ref,
                    w3_ref, g3_ref, b3_ref,
                    w4_ref, g4_ref, b4_ref,
                    w5_ref, g5_ref, b5_ref,
                    sel_ref, wfc_ref, selimg_ref, bfc_ref,
                    out_ref,
                    *, N, H, W):
    H2, W2 = H // 2, W // 2
    M, M2 = N * H * W, N * H2 * W2

    # Hoisted boundary masks: one set per resolution, reused by every conv at
    # that resolution (the 5x5 layer needs the full pad-2 set, the 3x3 layers
    # its inner pad-1 subset).
    masks_hi = _make_masks(H, W, M, pad=2)
    masks_lo = _make_masks(H2, W2, M2, pad=1)

    x = x_ref[...]                                                     # (8, M) f32
    a = _bn_relu(_same_conv(x, w1_ref, H, W, masks_hi), g1_ref, b1_ref)   # (8, M)
    a = _bn_relu(_same_conv(a, w2_ref, H, W, masks_hi), g2_ref, b2_ref)   # (8, M)

    # Layer 3 (5x5, stride 2, pad 2): one stacked full-resolution matmul
    # (contraction depth 25*8 = 200), then compact the even (h, w) output
    # positions onto 128 dense lanes with an exact 0/1 bf16 selection matmul,
    # then BN+ReLU on the true stride-2 conv output.
    full = _same_conv(a, w3_ref, H, W, masks_hi)                       # (16, M)
    sub = jnp.dot(full.astype(jnp.bfloat16), sel_ref[...],
                  preferred_element_type=jnp.float32)                  # (16, M2)
    a = _bn_relu(sub, g3_ref, b3_ref)

    a = _bn_relu(_same_conv(a, w4_ref, H2, W2, masks_lo), g4_ref, b4_ref)  # (16, M2)
    a = _bn_relu(_same_conv(a, w5_ref, H2, W2, masks_lo), g5_ref, b5_ref)  # (16, M2)

    # Classifier: the NCHW Flatten permutation is pre-folded into wfc_ref,
    # layout (C5, classes, N*H2*W2) with the FC row replicated per image along
    # lanes.  The channel contraction is C5 lane-dense VPU multiply-adds (the
    # weight varies per lane, so it is not a single MXU matmul); the per-image
    # cross-lane sums are ONE tiny 0/1 matmul (replaces the old per-image
    # where/reduce/scatter loops on the dependent critical path).
    C5, classes, M3 = wfc_ref.shape
    b_acc = jnp.zeros((classes, M3), jnp.float32)
    for c in range(C5):
        b_acc = b_acc + wfc_ref[c] * a[c:c + 1, :]
    scores = jnp.dot(b_acc.astype(jnp.bfloat16), selimg_ref[...],
                     preferred_element_type=jnp.float32)               # (classes, N)
    out_ref[...] = scores + bfc_ref[...]


# ------------------------------- host wrappers ------------------------------ #
def _vmem_spec(arr):
    n = arr.ndim
    return pl.BlockSpec(arr.shape, lambda i, n=n: (0,) * n)


def conv_classifier_forward(x_nchw, kp):
    """x_nchw: (N, Cin, H, W) f32; kp: kernel-ready params from prepare_params()."""
    N, Cin, H, W = x_nchw.shape
    classes = kp["bfc"].shape[0]
    # NCHW -> channels-major with (n, h, w) flat on the lane axis: (Cin, N*H*W),
    # channel dim zero-padded to a multiple of 8 (sublane-aligned tap stacking;
    # the padded weight columns are zero, so the math is exact).
    x0 = jnp.transpose(x_nchw, (1, 0, 2, 3)).reshape(Cin, N * H * W)
    cin_pad = _round_up8(Cin)
    if cin_pad != Cin:
        x0 = jnp.pad(x0, ((0, cin_pad - Cin), (0, 0)))

    operands = (
        x0,
        kp["w1"], kp["g1"], kp["b1"],
        kp["w2"], kp["g2"], kp["b2"],
        kp["w3"], kp["g3"], kp["b3"],
        kp["w4"], kp["g4"], kp["b4"],
        kp["w5"], kp["g5"], kp["b5"],
        kp["sel"], kp["wfc"], kp["selimg"], kp["bfc"],
    )
    kern = functools.partial(_convnet_kernel, N=N, H=H, W=W)
    scores_t = pl.pallas_call(
        kern,
        out_shape=jax.ShapeDtypeStruct((classes, N), jnp.float32),
        grid=(1,),
        in_specs=[_vmem_spec(op) for op in operands],
        out_specs=pl.BlockSpec((classes, N), lambda i: (0, 0)),
        compiler_params=pltpu.CompilerParams(
            dimension_semantics=("arbitrary",)),
    )(*operands)
    return scores_t.T                                   # (N, classes)


def prepare_params(params, N, H, W):
    """One-time (outside the jitted forward) torch-layout -> kernel-layout prep:
    OIHW conv weights -> tap-major flattened (Cout, k*k*Cin_pad) bf16 (matches
    the in-kernel stacked operand -> ONE matmul per layer), BN affine ->
    (Cout, 1) f32, the bf16 stride-2 selection matrix, the FC weight with the
    NCHW Flatten folded in, and the bf16 per-image column-sum matrix.
    Conv biases are dropped: they cancel exactly against the train-mode
    BatchNorm batch mean."""
    def conv_w(w):
        cout, cin, k, _ = w.shape
        cin_pad = _round_up8(cin)
        wt = jnp.transpose(w, (0, 2, 3, 1))               # (cout, kh, kw, cin)
        if cin_pad != cin:
            wt = jnp.pad(wt, ((0, 0), (0, 0), (0, 0), (0, cin_pad - cin)))
        return wt.reshape(cout, k * k * cin_pad).astype(jnp.bfloat16)

    def col(v):
        return v.reshape(-1, 1).astype(jnp.float32)

    H2, W2 = H // 2, W // 2
    kp = {}
    for i in range(1, 6):
        w, _conv_bias, g, b = params[f"c{i}"]             # conv bias discarded
        kp[f"w{i}"] = conv_w(w)
        kp[f"g{i}"] = col(g)
        kp[f"b{i}"] = col(b)

    # Exact 0/1 compaction matrix for the stride-2 layer: (N*H*W, N*H2*W2),
    # stored bf16 (0/1 is exact in bf16; halves its HBM read).
    j = np.arange(N * H2 * W2)
    n, r = j // (H2 * W2), j % (H2 * W2)
    src = n * H * W + (r // W2) * 2 * W + (r % W2) * 2
    sel = np.zeros((N * H * W, N * H2 * W2), np.float32)
    sel[src, j] = 1.0
    kp["sel"] = jnp.asarray(sel, dtype=jnp.bfloat16)

    # FC weight (classes, C5*H2*W2), NCHW flatten order -> (C5, classes, H2*W2),
    # replicated per image along the lane axis (80 KiB f32 -- minor).
    w_fc, b_fc = params["fc"]
    classes = w_fc.shape[0]
    c5 = w_fc.shape[1] // (H2 * W2)
    wfc = jnp.transpose(w_fc.reshape(classes, c5, H2 * W2), (1, 0, 2))
    kp["wfc"] = jnp.tile(wfc, (1, 1, N)).astype(jnp.float32)

    # 0/1 per-image column-sum matrix (N*H2*W2, N) for the classifier epilogue.
    img = np.arange(N * H2 * W2) // (H2 * W2)
    kp["selimg"] = jnp.asarray(
        (img[:, None] == np.arange(N)[None, :]).astype(np.float32),
        dtype=jnp.bfloat16)
    kp["bfc"] = b_fc.reshape(classes, 1).astype(jnp.float32)
    return kp


# ------------------------------ parameter init ------------------------------ #
def init_params(key, in_ch, in_H, in_W, base_filt, dim_reduce, classes):
    out1 = int(base_filt)
    out2 = int(base_filt * dim_reduce)
    out3 = int(out2 * (in_H / dim_reduce) * (in_W / dim_reduce))

    def conv_p(k, cin, cout, ksz):
        kw, kb, kg, kbt = jax.random.split(k, 4)
        w = 0.1 * jax.random.normal(kw, (cout, cin, ksz, ksz), jnp.float32)
        b = 0.1 * jax.random.normal(kb, (cout,), jnp.float32)   # cancelled by BN
        g = 1.0 + 0.1 * jax.random.normal(kg, (cout,), jnp.float32)
        bt = 0.1 * jax.random.normal(kbt, (cout,), jnp.float32)
        return (w, b, g, bt)

    keys = jax.random.split(key, 7)
    params = {
        "c1": conv_p(keys[0], in_ch, out1, 3),
        "c2": conv_p(keys[1], out1, out1, 3),
        "c3": conv_p(keys[2], out1, out2, 5),
        "c4": conv_p(keys[3], out2, out2, 3),
        "c5": conv_p(keys[4], out2, out2, 3),
        "fc": (
            0.02 * jax.random.normal(keys[5], (classes, out3), jnp.float32),
            0.02 * jax.random.normal(keys[6], (classes,), jnp.float32),
        ),
    }
    return params, out3


# --------------------------- pure-JAX f32 reference ------------------------- #
def reference_forward(x, params):
    """Train-mode forward of the torch module in plain JAX (f32)."""
    a = x
    for name, stride in (("c1", 1), ("c2", 1), ("c3", 2), ("c4", 1), ("c5", 1)):
        w, cb, g, beta = params[name]
        pad = (w.shape[-1] - 1) // 2
        a = lax.conv_general_dilated(
            a, w, window_strides=(stride, stride),
            padding=[(pad, pad), (pad, pad)],
            dimension_numbers=("NCHW", "OIHW", "NCHW"),
            precision=lax.Precision.HIGHEST) + cb.reshape(1, -1, 1, 1)
        mean = jnp.mean(a, axis=(0, 2, 3), keepdims=True)
        var = jnp.mean(jnp.square(a - mean), axis=(0, 2, 3), keepdims=True)
        a = ((a - mean) * lax.rsqrt(var + EPS) * g.reshape(1, -1, 1, 1)
             + beta.reshape(1, -1, 1, 1))
        a = jnp.maximum(a, 0.0)
    w_fc, b_fc = params["fc"]
    return a.reshape(a.shape[0], -1) @ w_fc.T + b_fc


if __name__ == "__main__":
    # Small, self-consistent configuration.
    batch, in_ch, in_H, in_W = 2, 3, 16, 16
    base_filt, dim_reduce, classes = 8, 2, 10

    key = jax.random.PRNGKey(0)
    k_params, k_x = jax.random.split(key)
    params, out3 = init_params(k_params, in_ch, in_H, in_W,
                               base_filt, dim_reduce, classes)
    x = jax.random.normal(k_x, (batch, in_ch, in_H, in_W), jnp.float32)

    kp = prepare_params(params, batch, in_H, in_W)      # once, outside jit
    fwd = jax.jit(conv_classifier_forward)
    scores = jax.block_until_ready(fwd(x, kp))

    assert scores.shape == (batch, classes), scores.shape
    assert scores.dtype == jnp.float32
    # Numerical check vs. the pure-JAX f32 reference: bf16 MXU operands give a
    # few-percent drift on O(0.5) logits; a layout/shift bug would produce O(1)
    # garbage, so 0.25 abs separates the two cleanly.
    ref = reference_forward(x, params)
    max_err = float(jnp.max(jnp.abs(scores - ref)))
    assert max_err < 0.25, f"max |kernel - ref| = {max_err}"
    print("KERNEL_OK")
</pallas_src>

<mosaic_0001>
module attributes {stable_mosaic.version = 11 : i64} {
  func.func @_convnet_kernel(%arg0: i32, %arg1: memref<8x512xf32, #tpu.memory_space<vmem>>, %arg2: memref<8x72xbf16, #tpu.memory_space<vmem>>, %arg3: memref<8x1xf32, #tpu.memory_space<vmem>>, %arg4: memref<8x1xf32, #tpu.memory_space<vmem>>, %arg5: memref<8x72xbf16, #tpu.memory_space<vmem>>, %arg6: memref<8x1xf32, #tpu.memory_space<vmem>>, %arg7: memref<8x1xf32, #tpu.memory_space<vmem>>, %arg8: memref<16x200xbf16, #tpu.memory_space<vmem>>, %arg9: memref<16x1xf32, #tpu.memory_space<vmem>>, %arg10: memref<16x1xf32, #tpu.memory_space<vmem>>, %arg11: memref<16x144xbf16, #tpu.memory_space<vmem>>, %arg12: memref<16x1xf32, #tpu.memory_space<vmem>>, %arg13: memref<16x1xf32, #tpu.memory_space<vmem>>, %arg14: memref<16x144xbf16, #tpu.memory_space<vmem>>, %arg15: memref<16x1xf32, #tpu.memory_space<vmem>>, %arg16: memref<16x1xf32, #tpu.memory_space<vmem>>, %arg17: memref<512x128xbf16, #tpu.memory_space<vmem>>, %arg18: memref<16x10x128xf32, #tpu.memory_space<vmem>>, %arg19: memref<128x2xbf16, #tpu.memory_space<vmem>>, %arg20: memref<10x1xf32, #tpu.memory_space<vmem>>, %arg21: memref<10x2xf32, #tpu.memory_space<vmem>>) attributes {dimension_semantics = [#tpu.dimension_semantics<arbitrary>], iteration_bounds = array<i64: 1>, scalar_prefetch = 0 : i64, scratch_operands = 0 : i64, tpu.core_type = #tpu.core_type<tc>, window_params = [{pipeline_mode = #tpu.pipeline_mode<synchronous>, transform_indices = @transform_0, window_bounds = array<i64: 8, 512>}, {pipeline_mode = #tpu.pipeline_mode<synchronous>, transform_indices = @transform_1, window_bounds = array<i64: 8, 72>}, {pipeline_mode = #tpu.pipeline_mode<synchronous>, transform_indices = @transform_2, window_bounds = array<i64: 8, 1>}, {pipeline_mode = #tpu.pipeline_mode<synchronous>, transform_indices = @transform_3, window_bounds = array<i64: 8, 1>}, {pipeline_mode = #tpu.pipeline_mode<synchronous>, transform_indices = @transform_4, window_bounds = array<i64: 8, 72>}, {pipeline_mode = #tpu.pipeline_mode<synchronous>, transform_indices = @transform_5, window_bounds = array<i64: 8, 1>}, {pipeline_mode = #tpu.pipeline_mode<synchronous>, transform_indices = @transform_6, window_bounds = array<i64: 8, 1>}, {pipeline_mode = #tpu.pipeline_mode<synchronous>, transform_indices = @transform_7, window_bounds = array<i64: 16, 200>}, {pipeline_mode = #tpu.pipeline_mode<synchronous>, transform_indices = @transform_8, window_bounds = array<i64: 16, 1>}, {pipeline_mode = #tpu.pipeline_mode<synchronous>, transform_indices = @transform_9, window_bounds = array<i64: 16, 1>}, {pipeline_mode = #tpu.pipeline_mode<synchronous>, transform_indices = @transform_10, window_bounds = array<i64: 16, 144>}, {pipeline_mode = #tpu.pipeline_mode<synchronous>, transform_indices = @transform_11, window_bounds = array<i64: 16, 1>}, {pipeline_mode = #tpu.pipeline_mode<synchronous>, transform_indices = @transform_12, window_bounds = array<i64: 16, 1>}, {pipeline_mode = #tpu.pipeline_mode<synchronous>, transform_indices = @transform_13, window_bounds = array<i64: 16, 144>}, {pipeline_mode = #tpu.pipeline_mode<synchronous>, transform_indices = @transform_14, window_bounds = array<i64: 16, 1>}, {pipeline_mode = #tpu.pipeline_mode<synchronous>, transform_indices = @transform_15, window_bounds = array<i64: 16, 1>}, {pipeline_mode = #tpu.pipeline_mode<synchronous>, transform_indices = @transform_16, window_bounds = array<i64: 512, 128>}, {pipeline_mode = #tpu.pipeline_mode<synchronous>, transform_indices = @transform_17, window_bounds = array<i64: 16, 10, 128>}, {pipeline_mode = #tpu.pipeline_mode<synchronous>, transform_indices = @transform_18, window_bounds = array<i64: 128, 2>}, {pipeline_mode = #tpu.pipeline_mode<synchronous>, transform_indices = @transform_19, window_bounds = array<i64: 10, 1>}, {pipeline_mode = #tpu.pipeline_mode<synchronous>, transform_indices = @transform_20, window_bounds = array<i64: 10, 2>}]} {
    %0 = tpu.iota {dimensions = array<i32: 1>} : vector<1x512xi32>
    %c4_i32 = arith.constant 4 : i32
    %1 = vector.broadcast %c4_i32 : i32 to vector<1x512xi32>
    %2 = arith.shrsi %0, %1 : vector<1x512xi32>
    %c15_i32 = arith.constant 15 : i32
    %3 = vector.broadcast %c15_i32 : i32 to vector<1x512xi32>
    %4 = arith.andi %2, %3 : vector<1x512xi32>
    %c15_i32_0 = arith.constant 15 : i32
    %5 = vector.broadcast %c15_i32_0 : i32 to vector<1x512xi32>
    %6 = arith.andi %0, %5 : vector<1x512xi32>
    %c2_i32 = arith.constant 2 : i32
    %7 = vector.broadcast %c2_i32 : i32 to vector<1x512xi32>
    %8 = arith.cmpi sge, %4, %7 : vector<1x512xi32>
    %c2_i32_1 = arith.constant 2 : i32
    %9 = vector.broadcast %c2_i32_1 : i32 to vector<1x512xi32>
    %10 = arith.cmpi sge, %6, %9 : vector<1x512xi32>
    %11 = arith.andi %8, %10 : vector<1x512xi1>
    %c2_i32_2 = arith.constant 2 : i32
    %12 = vector.broadcast %c2_i32_2 : i32 to vector<1x512xi32>
    %13 = arith.cmpi sge, %4, %12 : vector<1x512xi32>
    %c1_i32 = arith.constant 1 : i32
    %14 = vector.broadcast %c1_i32 : i32 to vector<1x512xi32>
    %15 = arith.cmpi sge, %6, %14 : vector<1x512xi32>
    %16 = arith.andi %13, %15 : vector<1x512xi1>
    %c2_i32_3 = arith.constant 2 : i32
    %17 = vector.broadcast %c2_i32_3 : i32 to vector<1x512xi32>
    %18 = arith.cmpi sge, %4, %17 : vector<1x512xi32>
    %c2_i32_4 = arith.constant 2 : i32
    %19 = vector.broadcast %c2_i32_4 : i32 to vector<1x512xi32>
    %20 = arith.cmpi sge, %4, %19 : vector<1x512xi32>
    %c15_i32_5 = arith.constant 15 : i32
    %21 = vector.broadcast %c15_i32_5 : i32 to vector<1x512xi32>
    %22 = arith.cmpi slt, %6, %21 : vector<1x512xi32>
    %23 = arith.andi %20, %22 : vector<1x512xi1>
    %c2_i32_6 = arith.constant 2 : i32
    %24 = vector.broadcast %c2_i32_6 : i32 to vector<1x512xi32>
    %25 = arith.cmpi sge, %4, %24 : vector<1x512xi32>
    %c14_i32 = arith.constant 14 : i32
    %26 = vector.broadcast %c14_i32 : i32 to vector<1x512xi32>
    %27 = arith.cmpi slt, %6, %26 : vector<1x512xi32>
    %28 = arith.andi %25, %27 : vector<1x512xi1>
    %c1_i32_7 = arith.constant 1 : i32
    %29 = vector.broadcast %c1_i32_7 : i32 to vector<1x512xi32>
    %30 = arith.cmpi sge, %4, %29 : vector<1x512xi32>
    %c2_i32_8 = arith.constant 2 : i32
    %31 = vector.broadcast %c2_i32_8 : i32 to vector<1x512xi32>
    %32 = arith.cmpi sge, %6, %31 : vector<1x512xi32>
    %33 = arith.andi %30, %32 : vector<1x512xi1>
    %c1_i32_9 = arith.constant 1 : i32
    %34 = vector.broadcast %c1_i32_9 : i32 to vector<1x512xi32>
    %35 = arith.cmpi sge, %4, %34 : vector<1x512xi32>
    %c1_i32_10 = arith.constant 1 : i32
    %36 = vector.broadcast %c1_i32_10 : i32 to vector<1x512xi32>
    %37 = arith.cmpi sge, %6, %36 : vector<1x512xi32>
    %38 = arith.andi %35, %37 : vector<1x512xi1>
    %c1_i32_11 = arith.constant 1 : i32
    %39 = vector.broadcast %c1_i32_11 : i32 to vector<1x512xi32>
    %40 = arith.cmpi sge, %4, %39 : vector<1x512xi32>
    %c1_i32_12 = arith.constant 1 : i32
    %41 = vector.broadcast %c1_i32_12 : i32 to vector<1x512xi32>
    %42 = arith.cmpi sge, %4, %41 : vector<1x512xi32>
    %c15_i32_13 = arith.constant 15 : i32
    %43 = vector.broadcast %c15_i32_13 : i32 to vector<1x512xi32>
    %44 = arith.cmpi slt, %6, %43 : vector<1x512xi32>
    %45 = arith.andi %42, %44 : vector<1x512xi1>
    %c1_i32_14 = arith.constant 1 : i32
    %46 = vector.broadcast %c1_i32_14 : i32 to vector<1x512xi32>
    %47 = arith.cmpi sge, %4, %46 : vector<1x512xi32>
    %c14_i32_15 = arith.constant 14 : i32
    %48 = vector.broadcast %c14_i32_15 : i32 to vector<1x512xi32>
    %49 = arith.cmpi slt, %6, %48 : vector<1x512xi32>
    %50 = arith.andi %47, %49 : vector<1x512xi1>
    %c2_i32_16 = arith.constant 2 : i32
    %51 = vector.broadcast %c2_i32_16 : i32 to vector<1x512xi32>
    %52 = arith.cmpi sge, %6, %51 : vector<1x512xi32>
    %c1_i32_17 = arith.constant 1 : i32
    %53 = vector.broadcast %c1_i32_17 : i32 to vector<1x512xi32>
    %54 = arith.cmpi sge, %6, %53 : vector<1x512xi32>
    %c15_i32_18 = arith.constant 15 : i32
    %55 = vector.broadcast %c15_i32_18 : i32 to vector<1x512xi32>
    %56 = arith.cmpi slt, %6, %55 : vector<1x512xi32>
    %c14_i32_19 = arith.constant 14 : i32
    %57 = vector.broadcast %c14_i32_19 : i32 to vector<1x512xi32>
    %58 = arith.cmpi slt, %6, %57 : vector<1x512xi32>
    %c15_i32_20 = arith.constant 15 : i32
    %59 = vector.broadcast %c15_i32_20 : i32 to vector<1x512xi32>
    %60 = arith.cmpi slt, %4, %59 : vector<1x512xi32>
    %c2_i32_21 = arith.constant 2 : i32
    %61 = vector.broadcast %c2_i32_21 : i32 to vector<1x512xi32>
    %62 = arith.cmpi sge, %6, %61 : vector<1x512xi32>
    %63 = arith.andi %60, %62 : vector<1x512xi1>
    %c15_i32_22 = arith.constant 15 : i32
    %64 = vector.broadcast %c15_i32_22 : i32 to vector<1x512xi32>
    %65 = arith.cmpi slt, %4, %64 : vector<1x512xi32>
    %c1_i32_23 = arith.constant 1 : i32
    %66 = vector.broadcast %c1_i32_23 : i32 to vector<1x512xi32>
    %67 = arith.cmpi sge, %6, %66 : vector<1x512xi32>
    %68 = arith.andi %65, %67 : vector<1x512xi1>
    %c15_i32_24 = arith.constant 15 : i32
    %69 = vector.broadcast %c15_i32_24 : i32 to vector<1x512xi32>
    %70 = arith.cmpi slt, %4, %69 : vector<1x512xi32>
    %c15_i32_25 = arith.constant 15 : i32
    %71 = vector.broadcast %c15_i32_25 : i32 to vector<1x512xi32>
    %72 = arith.cmpi slt, %4, %71 : vector<1x512xi32>
    %c15_i32_26 = arith.constant 15 : i32
    %73 = vector.broadcast %c15_i32_26 : i32 to vector<1x512xi32>
    %74 = arith.cmpi slt, %6, %73 : vector<1x512xi32>
    %75 = arith.andi %72, %74 : vector<1x512xi1>
    %c15_i32_27 = arith.constant 15 : i32
    %76 = vector.broadcast %c15_i32_27 : i32 to vector<1x512xi32>
    %77 = arith.cmpi slt, %4, %76 : vector<1x512xi32>
    %c14_i32_28 = arith.constant 14 : i32
    %78 = vector.broadcast %c14_i32_28 : i32 to vector<1x512xi32>
    %79 = arith.cmpi slt, %6, %78 : vector<1x512xi32>
    %80 = arith.andi %77, %79 : vector<1x512xi1>
    %c14_i32_29 = arith.constant 14 : i32
    %81 = vector.broadcast %c14_i32_29 : i32 to vector<1x512xi32>
    %82 = arith.cmpi slt, %4, %81 : vector<1x512xi32>
    %c2_i32_30 = arith.constant 2 : i32
    %83 = vector.broadcast %c2_i32_30 : i32 to vector<1x512xi32>
    %84 = arith.cmpi sge, %6, %83 : vector<1x512xi32>
    %85 = arith.andi %82, %84 : vector<1x512xi1>
    %c14_i32_31 = arith.constant 14 : i32
    %86 = vector.broadcast %c14_i32_31 : i32 to vector<1x512xi32>
    %87 = arith.cmpi slt, %4, %86 : vector<1x512xi32>
    %c1_i32_32 = arith.constant 1 : i32
    %88 = vector.broadcast %c1_i32_32 : i32 to vector<1x512xi32>
    %89 = arith.cmpi sge, %6, %88 : vector<1x512xi32>
    %90 = arith.andi %87, %89 : vector<1x512xi1>
    %c14_i32_33 = arith.constant 14 : i32
    %91 = vector.broadcast %c14_i32_33 : i32 to vector<1x512xi32>
    %92 = arith.cmpi slt, %4, %91 : vector<1x512xi32>
    %c14_i32_34 = arith.constant 14 : i32
    %93 = vector.broadcast %c14_i32_34 : i32 to vector<1x512xi32>
    %94 = arith.cmpi slt, %4, %93 : vector<1x512xi32>
    %c15_i32_35 = arith.constant 15 : i32
    %95 = vector.broadcast %c15_i32_35 : i32 to vector<1x512xi32>
    %96 = arith.cmpi slt, %6, %95 : vector<1x512xi32>
    %97 = arith.andi %94, %96 : vector<1x512xi1>
    %c14_i32_36 = arith.constant 14 : i32
    %98 = vector.broadcast %c14_i32_36 : i32 to vector<1x512xi32>
    %99 = arith.cmpi slt, %4, %98 : vector<1x512xi32>
    %c14_i32_37 = arith.constant 14 : i32
    %100 = vector.broadcast %c14_i32_37 : i32 to vector<1x512xi32>
    %101 = arith.cmpi slt, %6, %100 : vector<1x512xi32>
    %102 = arith.andi %99, %101 : vector<1x512xi1>
    %103 = tpu.iota {dimensions = array<i32: 1>} : vector<1x128xi32>
    %c3_i32 = arith.constant 3 : i32
    %104 = vector.broadcast %c3_i32 : i32 to vector<1x128xi32>
    %105 = arith.shrsi %103, %104 : vector<1x128xi32>
    %c7_i32 = arith.constant 7 : i32
    %106 = vector.broadcast %c7_i32 : i32 to vector<1x128xi32>
    %107 = arith.andi %105, %106 : vector<1x128xi32>
    %c7_i32_38 = arith.constant 7 : i32
    %108 = vector.broadcast %c7_i32_38 : i32 to vector<1x128xi32>
    %109 = arith.andi %103, %108 : vector<1x128xi32>
    %c1_i32_39 = arith.constant 1 : i32
    %110 = vector.broadcast %c1_i32_39 : i32 to vector<1x128xi32>
    %111 = arith.cmpi sge, %107, %110 : vector<1x128xi32>
    %c1_i32_40 = arith.constant 1 : i32
    %112 = vector.broadcast %c1_i32_40 : i32 to vector<1x128xi32>
    %113 = arith.cmpi sge, %109, %112 : vector<1x128xi32>
    %114 = arith.andi %111, %113 : vector<1x128xi1>
    %c1_i32_41 = arith.constant 1 : i32
    %115 = vector.broadcast %c1_i32_41 : i32 to vector<1x128xi32>
    %116 = arith.cmpi sge, %107, %115 : vector<1x128xi32>
    %c1_i32_42 = arith.constant 1 : i32
    %117 = vector.broadcast %c1_i32_42 : i32 to vector<1x128xi32>
    %118 = arith.cmpi sge, %107, %117 : vector<1x128xi32>
    %c7_i32_43 = arith.constant 7 : i32
    %119 = vector.broadcast %c7_i32_43 : i32 to vector<1x128xi32>
    %120 = arith.cmpi slt, %109, %119 : vector<1x128xi32>
    %121 = arith.andi %118, %120 : vector<1x128xi1>
    %c1_i32_44 = arith.constant 1 : i32
    %122 = vector.broadcast %c1_i32_44 : i32 to vector<1x128xi32>
    %123 = arith.cmpi sge, %109, %122 : vector<1x128xi32>
    %c7_i32_45 = arith.constant 7 : i32
    %124 = vector.broadcast %c7_i32_45 : i32 to vector<1x128xi32>
    %125 = arith.cmpi slt, %109, %124 : vector<1x128xi32>
    %c7_i32_46 = arith.constant 7 : i32
    %126 = vector.broadcast %c7_i32_46 : i32 to vector<1x128xi32>
    %127 = arith.cmpi slt, %107, %126 : vector<1x128xi32>
    %c1_i32_47 = arith.constant 1 : i32
    %128 = vector.broadcast %c1_i32_47 : i32 to vector<1x128xi32>
    %129 = arith.cmpi sge, %109, %128 : vector<1x128xi32>
    %130 = arith.andi %127, %129 : vector<1x128xi1>
    %c7_i32_48 = arith.constant 7 : i32
    %131 = vector.broadcast %c7_i32_48 : i32 to vector<1x128xi32>
    %132 = arith.cmpi slt, %107, %131 : vector<1x128xi32>
    %c7_i32_49 = arith.constant 7 : i32
    %133 = vector.broadcast %c7_i32_49 : i32 to vector<1x128xi32>
    %134 = arith.cmpi slt, %107, %133 : vector<1x128xi32>
    %c7_i32_50 = arith.constant 7 : i32
    %135 = vector.broadcast %c7_i32_50 : i32 to vector<1x128xi32>
    %136 = arith.cmpi slt, %109, %135 : vector<1x128xi32>
    %137 = arith.andi %134, %136 : vector<1x128xi1>
    %c0 = arith.constant 0 : index
    %c0_51 = arith.constant 0 : index
    %138 = vector.load %arg1[%c0, %c0_51] : memref<8x512xf32, #tpu.memory_space<vmem>>, vector<8x512xf32>
    %c17_i32 = arith.constant 17 : i32
    %139 = tpu.dynamic_rotate %138 by %c17_i32 dim 1 : vector<8x512xf32>, i32 -> vector<8x512xf32>
    %cst = arith.constant 0.000000e+00 : f32
    %140 = vector.shape_cast %38 : vector<1x512xi1> to vector<1x512xi1>
    %141 = vector.broadcast %140 : vector<1x512xi1> to vector<8x512xi1>
    %142 = vector.broadcast %cst : f32 to vector<8x512xf32>
    %143 = arith.select %141, %139, %142 : vector<8x512xi1>, vector<8x512xf32>
    %c16_i32 = arith.constant 16 : i32
    %144 = tpu.dynamic_rotate %138 by %c16_i32 dim 1 : vector<8x512xf32>, i32 -> vector<8x512xf32>
    %cst_52 = arith.constant 0.000000e+00 : f32
    %145 = vector.shape_cast %40 : vector<1x512xi1> to vector<1x512xi1>
    %146 = vector.broadcast %145 : vector<1x512xi1> to vector<8x512xi1>
    %147 = vector.broadcast %cst_52 : f32 to vector<8x512xf32>
    %148 = arith.select %146, %144, %147 : vector<8x512xi1>, vector<8x512xf32>
    %c15_i32_53 = arith.constant 15 : i32
    %149 = tpu.dynamic_rotate %138 by %c15_i32_53 dim 1 : vector<8x512xf32>, i32 -> vector<8x512xf32>
    %cst_54 = arith.constant 0.000000e+00 : f32
    %150 = vector.shape_cast %45 : vector<1x512xi1> to vector<1x512xi1>
    %151 = vector.broadcast %150 : vector<1x512xi1> to vector<8x512xi1>
    %152 = vector.broadcast %cst_54 : f32 to vector<8x512xf32>
    %153 = arith.select %151, %149, %152 : vector<8x512xi1>, vector<8x512xf32>
    %c1_i32_55 = arith.constant 1 : i32
    %154 = tpu.dynamic_rotate %138 by %c1_i32_55 dim 1 : vector<8x512xf32>, i32 -> vector<8x512xf32>
    %cst_56 = arith.constant 0.000000e+00 : f32
    %155 = vector.shape_cast %54 : vector<1x512xi1> to vector<1x512xi1>
    %156 = vector.broadcast %155 : vector<1x512xi1> to vector<8x512xi1>
    %157 = vector.broadcast %cst_56 : f32 to vector<8x512xf32>
    %158 = arith.select %156, %154, %157 : vector<8x512xi1>, vector<8x512xf32>
    %c511_i32 = arith.constant 511 : i32
    %159 = tpu.dynamic_rotate %138 by %c511_i32 dim 1 : vector<8x512xf32>, i32 -> vector<8x512xf32>
    %cst_57 = arith.constant 0.000000e+00 : f32
    %160 = vector.shape_cast %56 : vector<1x512xi1> to vector<1x512xi1>
    %161 = vector.broadcast %160 : vector<1x512xi1> to vector<8x512xi1>
    %162 = vector.broadcast %cst_57 : f32 to vector<8x512xf32>
    %163 = arith.select %161, %159, %162 : vector<8x512xi1>, vector<8x512xf32>
    %c497_i32 = arith.constant 497 : i32
    %164 = tpu.dynamic_rotate %138 by %c497_i32 dim 1 : vector<8x512xf32>, i32 -> vector<8x512xf32>
    %cst_58 = arith.constant 0.000000e+00 : f32
    %165 = vector.shape_cast %68 : vector<1x512xi1> to vector<1x512xi1>
    %166 = vector.broadcast %165 : vector<1x512xi1> to vector<8x512xi1>
    %167 = vector.broadcast %cst_58 : f32 to vector<8x512xf32>
    %168 = arith.select %166, %164, %167 : vector<8x512xi1>, vector<8x512xf32>
    %c496_i32 = arith.constant 496 : i32
    %169 = tpu.dynamic_rotate %138 by %c496_i32 dim 1 : vector<8x512xf32>, i32 -> vector<8x512xf32>
    %cst_59 = arith.constant 0.000000e+00 : f32
    %170 = vector.shape_cast %70 : vector<1x512xi1> to vector<1x512xi1>
    %171 = vector.broadcast %170 : vector<1x512xi1> to vector<8x512xi1>
    %172 = vector.broadcast %cst_59 : f32 to vector<8x512xf32>
    %173 = arith.select %171, %169, %172 : vector<8x512xi1>, vector<8x512xf32>
    %c495_i32 = arith.constant 495 : i32
    %174 = tpu.dynamic_rotate %138 by %c495_i32 dim 1 : vector<8x512xf32>, i32 -> vector<8x512xf32>
    %cst_60 = arith.constant 0.000000e+00 : f32
    %175 = vector.shape_cast %75 : vector<1x512xi1> to vector<1x512xi1>
    %176 = vector.broadcast %175 : vector<1x512xi1> to vector<8x512xi1>
    %177 = vector.broadcast %cst_60 : f32 to vector<8x512xf32>
    %178 = arith.select %176, %174, %177 : vector<8x512xi1>, vector<8x512xf32>
    %179 = tpu.concatenate %143, %148, %153, %158, %138, %163, %168, %173, %178 in 0 : vector<8x512xf32>, vector<8x512xf32>, vector<8x512xf32>, vector<8x512xf32>, vector<8x512xf32>, vector<8x512xf32>, vector<8x512xf32>, vector<8x512xf32>, vector<8x512xf32> -> vector<72x512xf32>
    %180 = arith.truncf %179 : vector<72x512xf32> to vector<72x512xbf16>
    %c0_61 = arith.constant 0 : index
    %c0_62 = arith.constant 0 : index
    %181 = vector.load %arg2[%c0_61, %c0_62] : memref<8x72xbf16, #tpu.memory_space<vmem>>, vector<8x72xbf16>
    %cst_63 = arith.constant dense<0.000000e+00> : vector<8x512xf32>
    %182 = tpu.matmul %181, %180, %cst_63 {dimension_numbers = #tpu.dot_dimension_numbers<[1], [0], [0], [1], [0, 0, 1, 1], [], []>} : vector<8x72xbf16>, vector<72x512xbf16>, vector<8x512xf32> -> vector<8x512xf32>
    %cst_64 = arith.constant dense<0.000000e+00> : vector<8xf32>
    %183 = vector.multi_reduction <add>, %182, %cst_64 [1] : vector<8x512xf32> to vector<8xf32>
    %184 = vector.shape_cast %183 : vector<8xf32> to vector<8x1xf32>
    %cst_65 = arith.constant 0.001953125 : f32
    %185 = vector.broadcast %cst_65 : f32 to vector<8x1xf32>
    %186 = arith.mulf %184, %185 : vector<8x1xf32>
    %187 = arith.mulf %182, %182 : vector<8x512xf32>
    %cst_66 = arith.constant dense<0.000000e+00> : vector<8xf32>
    %188 = vector.multi_reduction <add>, %187, %cst_66 [1] : vector<8x512xf32> to vector<8xf32>
    %189 = vector.shape_cast %188 : vector<8xf32> to vector<8x1xf32>
    %cst_67 = arith.constant 0.001953125 : f32
    %190 = vector.broadcast %cst_67 : f32 to vector<8x1xf32>
    %191 = arith.mulf %189, %190 : vector<8x1xf32>
    %192 = arith.mulf %186, %186 : vector<8x1xf32>
    %193 = arith.subf %191, %192 : vector<8x1xf32>
    %cst_68 = arith.constant 9.99999974E-6 : f32
    %194 = vector.broadcast %cst_68 : f32 to vector<8x1xf32>
    %195 = arith.addf %193, %194 : vector<8x1xf32>
    %196 = math.rsqrt %195 : vector<8x1xf32>
    %c0_69 = arith.constant 0 : index
    %c0_70 = arith.constant 0 : index
    %197 = vector.load %arg3[%c0_69, %c0_70] : memref<8x1xf32, #tpu.memory_space<vmem>>, vector<8x1xf32>
    %198 = arith.mulf %196, %197 : vector<8x1xf32>
    %199 = vector.broadcast %186 : vector<8x1xf32> to vector<8x512xf32>
    %200 = arith.subf %182, %199 : vector<8x512xf32>
    %201 = vector.broadcast %198 : vector<8x1xf32> to vector<8x512xf32>
    %202 = arith.mulf %200, %201 : vector<8x512xf32>
    %c0_71 = arith.constant 0 : index
    %c0_72 = arith.constant 0 : index
    %203 = vector.load %arg4[%c0_71, %c0_72] : memref<8x1xf32, #tpu.memory_space<vmem>>, vector<8x1xf32>
    %204 = vector.broadcast %203 : vector<8x1xf32> to vector<8x512xf32>
    %205 = arith.addf %202, %204 : vector<8x512xf32>
    %cst_73 = arith.constant 0.000000e+00 : f32
    %206 = vector.broadcast %cst_73 : f32 to vector<8x512xf32>
    %207 = arith.maximumf %205, %206 : vector<8x512xf32>
    %c17_i32_74 = arith.constant 17 : i32
    %208 = tpu.dynamic_rotate %207 by %c17_i32_74 dim 1 : vector<8x512xf32>, i32 -> vector<8x512xf32>
    %cst_75 = arith.constant 0.000000e+00 : f32
    %209 = vector.shape_cast %38 : vector<1x512xi1> to vector<1x512xi1>
    %210 = vector.broadcast %209 : vector<1x512xi1> to vector<8x512xi1>
    %211 = vector.broadcast %cst_75 : f32 to vector<8x512xf32>
    %212 = arith.select %210, %208, %211 : vector<8x512xi1>, vector<8x512xf32>
    %c16_i32_76 = arith.constant 16 : i32
    %213 = tpu.dynamic_rotate %207 by %c16_i32_76 dim 1 : vector<8x512xf32>, i32 -> vector<8x512xf32>
    %cst_77 = arith.constant 0.000000e+00 : f32
    %214 = vector.shape_cast %40 : vector<1x512xi1> to vector<1x512xi1>
    %215 = vector.broadcast %214 : vector<1x512xi1> to vector<8x512xi1>
    %216 = vector.broadcast %cst_77 : f32 to vector<8x512xf32>
    %217 = arith.select %215, %213, %216 : vector<8x512xi1>, vector<8x512xf32>
    %c15_i32_78 = arith.constant 15 : i32
    %218 = tpu.dynamic_rotate %207 by %c15_i32_78 dim 1 : vector<8x512xf32>, i32 -> vector<8x512xf32>
    %cst_79 = arith.constant 0.000000e+00 : f32
    %219 = vector.shape_cast %45 : vector<1x512xi1> to vector<1x512xi1>
    %220 = vector.broadcast %219 : vector<1x512xi1> to vector<8x512xi1>
    %221 = vector.broadcast %cst_79 : f32 to vector<8x512xf32>
    %222 = arith.select %220, %218, %221 : vector<8x512xi1>, vector<8x512xf32>
    %c1_i32_80 = arith.constant 1 : i32
    %223 = tpu.dynamic_rotate %207 by %c1_i32_80 dim 1 : vector<8x512xf32>, i32 -> vector<8x512xf32>
    %cst_81 = arith.constant 0.000000e+00 : f32
    %224 = vector.shape_cast %54 : vector<1x512xi1> to vector<1x512xi1>
    %225 = vector.broadcast %224 : vector<1x512xi1> to vector<8x512xi1>
    %226 = vector.broadcast %cst_81 : f32 to vector<8x512xf32>
    %227 = arith.select %225, %223, %226 : vector<8x512xi1>, vector<8x512xf32>
    %c511_i32_82 = arith.constant 511 : i32
    %228 = tpu.dynamic_rotate %207 by %c511_i32_82 dim 1 : vector<8x512xf32>, i32 -> vector<8x512xf32>
    %cst_83 = arith.constant 0.000000e+00 : f32
    %229 = vector.shape_cast %56 : vector<1x512xi1> to vector<1x512xi1>
    %230 = vector.broadcast %229 : vector<1x512xi1> to vector<8x512xi1>
    %231 = vector.broadcast %cst_83 : f32 to vector<8x512xf32>
    %232 = arith.select %230, %228, %231 : vector<8x512xi1>, vector<8x512xf32>
    %c497_i32_84 = arith.constant 497 : i32
    %233 = tpu.dynamic_rotate %207 by %c497_i32_84 dim 1 : vector<8x512xf32>, i32 -> vector<8x512xf32>
    %cst_85 = arith.constant 0.000000e+00 : f32
    %234 = vector.shape_cast %68 : vector<1x512xi1> to vector<1x512xi1>
    %235 = vector.broadcast %234 : vector<1x512xi1> to vector<8x512xi1>
    %236 = vector.broadcast %cst_85 : f32 to vector<8x512xf32>
    %237 = arith.select %235, %233, %236 : vector<8x512xi1>, vector<8x512xf32>
    %c496_i32_86 = arith.constant 496 : i32
    %238 = tpu.dynamic_rotate %207 by %c496_i32_86 dim 1 : vector<8x512xf32>, i32 -> vector<8x512xf32>
    %cst_87 = arith.constant 0.000000e+00 : f32
    %239 = vector.shape_cast %70 : vector<1x512xi1> to vector<1x512xi1>
    %240 = vector.broadcast %239 : vector<1x512xi1> to vector<8x512xi1>
    %241 = vector.broadcast %cst_87 : f32 to vector<8x512xf32>
    %242 = arith.select %240, %238, %241 : vector<8x512xi1>, vector<8x512xf32>
    %c495_i32_88 = arith.constant 495 : i32
    %243 = tpu.dynamic_rotate %207 by %c495_i32_88 dim 1 : vector<8x512xf32>, i32 -> vector<8x512xf32>
    %cst_89 = arith.constant 0.000000e+00 : f32
    %244 = vector.shape_cast %75 : vector<1x512xi1> to vector<1x512xi1>
    %245 = vector.broadcast %244 : vector<1x512xi1> to vector<8x512xi1>
    %246 = vector.broadcast %cst_89 : f32 to vector<8x512xf32>
    %247 = arith.select %245, %243, %246 : vector<8x512xi1>, vector<8x512xf32>
    %248 = tpu.concatenate %212, %217, %222, %227, %207, %232, %237, %242, %247 in 0 : vector<8x512xf32>, vector<8x512xf32>, vector<8x512xf32>, vector<8x512xf32>, vector<8x512xf32>, vector<8x512xf32>, vector<8x512xf32>, vector<8x512xf32>, vector<8x512xf32> -> vector<72x512xf32>
    %249 = arith.truncf %248 : vector<72x512xf32> to vector<72x512xbf16>
    %c0_90 = arith.constant 0 : index
    %c0_91 = arith.constant 0 : index
    %250 = vector.load %arg5[%c0_90, %c0_91] : memref<8x72xbf16, #tpu.memory_space<vmem>>, vector<8x72xbf16>
    %cst_92 = arith.constant dense<0.000000e+00> : vector<8x512xf32>
    %251 = tpu.matmul %250, %249, %cst_92 {dimension_numbers = #tpu.dot_dimension_numbers<[1], [0], [0], [1], [0, 0, 1, 1], [], []>} : vector<8x72xbf16>, vector<72x512xbf16>, vector<8x512xf32> -> vector<8x512xf32>
    %cst_93 = arith.constant dense<0.000000e+00> : vector<8xf32>
    %252 = vector.multi_reduction <add>, %251, %cst_93 [1] : vector<8x512xf32> to vector<8xf32>
    %253 = vector.shape_cast %252 : vector<8xf32> to vector<8x1xf32>
    %cst_94 = arith.constant 0.001953125 : f32
    %254 = vector.broadcast %cst_94 : f32 to vector<8x1xf32>
    %255 = arith.mulf %253, %254 : vector<8x1xf32>
    %256 = arith.mulf %251, %251 : vector<8x512xf32>
    %cst_95 = arith.constant dense<0.000000e+00> : vector<8xf32>
    %257 = vector.multi_reduction <add>, %256, %cst_95 [1] : vector<8x512xf32> to vector<8xf32>
    %258 = vector.shape_cast %257 : vector<8xf32> to vector<8x1xf32>
    %cst_96 = arith.constant 0.001953125 : f32
    %259 = vector.broadcast %cst_96 : f32 to vector<8x1xf32>
    %260 = arith.mulf %258, %259 : vector<8x1xf32>
    %261 = arith.mulf %255, %255 : vector<8x1xf32>
    %262 = arith.subf %260, %261 : vector<8x1xf32>
    %cst_97 = arith.constant 9.99999974E-6 : f32
    %263 = vector.broadcast %cst_97 : f32 to vector<8x1xf32>
    %264 = arith.addf %262, %263 : vector<8x1xf32>
    %265 = math.rsqrt %264 : vector<8x1xf32>
    %c0_98 = arith.constant 0 : index
    %c0_99 = arith.constant 0 : index
    %266 = vector.load %arg6[%c0_98, %c0_99] : memref<8x1xf32, #tpu.memory_space<vmem>>, vector<8x1xf32>
    %267 = arith.mulf %265, %266 : vector<8x1xf32>
    %268 = vector.broadcast %255 : vector<8x1xf32> to vector<8x512xf32>
    %269 = arith.subf %251, %268 : vector<8x512xf32>
    %270 = vector.broadcast %267 : vector<8x1xf32> to vector<8x512xf32>
    %271 = arith.mulf %269, %270 : vector<8x512xf32>
    %c0_100 = arith.constant 0 : index
    %c0_101 = arith.constant 0 : index
    %272 = vector.load %arg7[%c0_100, %c0_101] : memref<8x1xf32, #tpu.memory_space<vmem>>, vector<8x1xf32>
    %273 = vector.broadcast %272 : vector<8x1xf32> to vector<8x512xf32>
    %274 = arith.addf %271, %273 : vector<8x512xf32>
    %cst_102 = arith.constant 0.000000e+00 : f32
    %275 = vector.broadcast %cst_102 : f32 to vector<8x512xf32>
    %276 = arith.maximumf %274, %275 : vector<8x512xf32>
    %c34_i32 = arith.constant 34 : i32
    %277 = tpu.dynamic_rotate %276 by %c34_i32 dim 1 : vector<8x512xf32>, i32 -> vector<8x512xf32>
    %cst_103 = arith.constant 0.000000e+00 : f32
    %278 = vector.shape_cast %11 : vector<1x512xi1> to vector<1x512xi1>
    %279 = vector.broadcast %278 : vector<1x512xi1> to vector<8x512xi1>
    %280 = vector.broadcast %cst_103 : f32 to vector<8x512xf32>
    %281 = arith.select %279, %277, %280 : vector<8x512xi1>, vector<8x512xf32>
    %c33_i32 = arith.constant 33 : i32
    %282 = tpu.dynamic_rotate %276 by %c33_i32 dim 1 : vector<8x512xf32>, i32 -> vector<8x512xf32>
    %cst_104 = arith.constant 0.000000e+00 : f32
    %283 = vector.shape_cast %16 : vector<1x512xi1> to vector<1x512xi1>
    %284 = vector.broadcast %283 : vector<1x512xi1> to vector<8x512xi1>
    %285 = vector.broadcast %cst_104 : f32 to vector<8x512xf32>
    %286 = arith.select %284, %282, %285 : vector<8x512xi1>, vector<8x512xf32>
    %c32_i32 = arith.constant 32 : i32
    %287 = tpu.dynamic_rotate %276 by %c32_i32 dim 1 : vector<8x512xf32>, i32 -> vector<8x512xf32>
    %cst_105 = arith.constant 0.000000e+00 : f32
    %288 = vector.shape_cast %18 : vector<1x512xi1> to vector<1x512xi1>
    %289 = vector.broadcast %288 : vector<1x512xi1> to vector<8x512xi1>
    %290 = vector.broadcast %cst_105 : f32 to vector<8x512xf32>
    %291 = arith.select %289, %287, %290 : vector<8x512xi1>, vector<8x512xf32>
    %c31_i32 = arith.constant 31 : i32
    %292 = tpu.dynamic_rotate %276 by %c31_i32 dim 1 : vector<8x512xf32>, i32 -> vector<8x512xf32>
    %cst_106 = arith.constant 0.000000e+00 : f32
    %293 = vector.shape_cast %23 : vector<1x512xi1> to vector<1x512xi1>
    %294 = vector.broadcast %293 : vector<1x512xi1> to vector<8x512xi1>
    %295 = vector.broadcast %cst_106 : f32 to vector<8x512xf32>
    %296 = arith.select %294, %292, %295 : vector<8x512xi1>, vector<8x512xf32>
    %c30_i32 = arith.constant 30 : i32
    %297 = tpu.dynamic_rotate %276 by %c30_i32 dim 1 : vector<8x512xf32>, i32 -> vector<8x512xf32>
    %cst_107 = arith.constant 0.000000e+00 : f32
    %298 = vector.shape_cast %28 : vector<1x512xi1> to vector<1x512xi1>
    %299 = vector.broadcast %298 : vector<1x512xi1> to vector<8x512xi1>
    %300 = vector.broadcast %cst_107 : f32 to vector<8x512xf32>
    %301 = arith.select %299, %297, %300 : vector<8x512xi1>, vector<8x512xf32>
    %c18_i32 = arith.constant 18 : i32
    %302 = tpu.dynamic_rotate %276 by %c18_i32 dim 1 : vector<8x512xf32>, i32 -> vector<8x512xf32>
    %cst_108 = arith.constant 0.000000e+00 : f32
    %303 = vector.shape_cast %33 : vector<1x512xi1> to vector<1x512xi1>
    %304 = vector.broadcast %303 : vector<1x512xi1> to vector<8x512xi1>
    %305 = vector.broadcast %cst_108 : f32 to vector<8x512xf32>
    %306 = arith.select %304, %302, %305 : vector<8x512xi1>, vector<8x512xf32>
    %c17_i32_109 = arith.constant 17 : i32
    %307 = tpu.dynamic_rotate %276 by %c17_i32_109 dim 1 : vector<8x512xf32>, i32 -> vector<8x512xf32>
    %cst_110 = arith.constant 0.000000e+00 : f32
    %308 = vector.shape_cast %38 : vector<1x512xi1> to vector<1x512xi1>
    %309 = vector.broadcast %308 : vector<1x512xi1> to vector<8x512xi1>
    %310 = vector.broadcast %cst_110 : f32 to vector<8x512xf32>
    %311 = arith.select %309, %307, %310 : vector<8x512xi1>, vector<8x512xf32>
    %c16_i32_111 = arith.constant 16 : i32
    %312 = tpu.dynamic_rotate %276 by %c16_i32_111 dim 1 : vector<8x512xf32>, i32 -> vector<8x512xf32>
    %cst_112 = arith.constant 0.000000e+00 : f32
    %313 = vector.shape_cast %40 : vector<1x512xi1> to vector<1x512xi1>
    %314 = vector.broadcast %313 : vector<1x512xi1> to vector<8x512xi1>
    %315 = vector.broadcast %cst_112 : f32 to vector<8x512xf32>
    %316 = arith.select %314, %312, %315 : vector<8x512xi1>, vector<8x512xf32>
    %c15_i32_113 = arith.constant 15 : i32
    %317 = tpu.dynamic_rotate %276 by %c15_i32_113 dim 1 : vector<8x512xf32>, i32 -> vector<8x512xf32>
    %cst_114 = arith.constant 0.000000e+00 : f32
    %318 = vector.shape_cast %45 : vector<1x512xi1> to vector<1x512xi1>
    %319 = vector.broadcast %318 : vector<1x512xi1> to vector<8x512xi1>
    %320 = vector.broadcast %cst_114 : f32 to vector<8x512xf32>
    %321 = arith.select %319, %317, %320 : vector<8x512xi1>, vector<8x512xf32>
    %c14_i32_115 = arith.constant 14 : i32
    %322 = tpu.dynamic_rotate %276 by %c14_i32_115 dim 1 : vector<8x512xf32>, i32 -> vector<8x512xf32>
    %cst_116 = arith.constant 0.000000e+00 : f32
    %323 = vector.shape_cast %50 : vector<1x512xi1> to vector<1x512xi1>
    %324 = vector.broadcast %323 : vector<1x512xi1> to vector<8x512xi1>
    %325 = vector.broadcast %cst_116 : f32 to vector<8x512xf32>
    %326 = arith.select %324, %322, %325 : vector<8x512xi1>, vector<8x512xf32>
    %c2_i32_117 = arith.constant 2 : i32
    %327 = tpu.dynamic_rotate %276 by %c2_i32_117 dim 1 : vector<8x512xf32>, i32 -> vector<8x512xf32>
    %cst_118 = arith.constant 0.000000e+00 : f32
    %328 = vector.shape_cast %52 : vector<1x512xi1> to vector<1x512xi1>
    %329 = vector.broadcast %328 : vector<1x512xi1> to vector<8x512xi1>
    %330 = vector.broadcast %cst_118 : f32 to vector<8x512xf32>
    %331 = arith.select %329, %327, %330 : vector<8x512xi1>, vector<8x512xf32>
    %c1_i32_119 = arith.constant 1 : i32
    %332 = tpu.dynamic_rotate %276 by %c1_i32_119 dim 1 : vector<8x512xf32>, i32 -> vector<8x512xf32>
    %cst_120 = arith.constant 0.000000e+00 : f32
    %333 = vector.shape_cast %54 : vector<1x512xi1> to vector<1x512xi1>
    %334 = vector.broadcast %333 : vector<1x512xi1> to vector<8x512xi1>
    %335 = vector.broadcast %cst_120 : f32 to vector<8x512xf32>
    %336 = arith.select %334, %332, %335 : vector<8x512xi1>, vector<8x512xf32>
    %c511_i32_121 = arith.constant 511 : i32
    %337 = tpu.dynamic_rotate %276 by %c511_i32_121 dim 1 : vector<8x512xf32>, i32 -> vector<8x512xf32>
    %cst_122 = arith.constant 0.000000e+00 : f32
    %338 = vector.shape_cast %56 : vector<1x512xi1> to vector<1x512xi1>
    %339 = vector.broadcast %338 : vector<1x512xi1> to vector<8x512xi1>
    %340 = vector.broadcast %cst_122 : f32 to vector<8x512xf32>
    %341 = arith.select %339, %337, %340 : vector<8x512xi1>, vector<8x512xf32>
    %c510_i32 = arith.constant 510 : i32
    %342 = tpu.dynamic_rotate %276 by %c510_i32 dim 1 : vector<8x512xf32>, i32 -> vector<8x512xf32>
    %cst_123 = arith.constant 0.000000e+00 : f32
    %343 = vector.shape_cast %58 : vector<1x512xi1> to vector<1x512xi1>
    %344 = vector.broadcast %343 : vector<1x512xi1> to vector<8x512xi1>
    %345 = vector.broadcast %cst_123 : f32 to vector<8x512xf32>
    %346 = arith.select %344, %342, %345 : vector<8x512xi1>, vector<8x512xf32>
    %c498_i32 = arith.constant 498 : i32
    %347 = tpu.dynamic_rotate %276 by %c498_i32 dim 1 : vector<8x512xf32>, i32 -> vector<8x512xf32>
    %cst_124 = arith.constant 0.000000e+00 : f32
    %348 = vector.shape_cast %63 : vector<1x512xi1> to vector<1x512xi1>
    %349 = vector.broadcast %348 : vector<1x512xi1> to vector<8x512xi1>
    %350 = vector.broadcast %cst_124 : f32 to vector<8x512xf32>
    %351 = arith.select %349, %347, %350 : vector<8x512xi1>, vector<8x512xf32>
    %c497_i32_125 = arith.constant 497 : i32
    %352 = tpu.dynamic_rotate %276 by %c497_i32_125 dim 1 : vector<8x512xf32>, i32 -> vector<8x512xf32>
    %cst_126 = arith.constant 0.000000e+00 : f32
    %353 = vector.shape_cast %68 : vector<1x512xi1> to vector<1x512xi1>
    %354 = vector.broadcast %353 : vector<1x512xi1> to vector<8x512xi1>
    %355 = vector.broadcast %cst_126 : f32 to vector<8x512xf32>
    %356 = arith.select %354, %352, %355 : vector<8x512xi1>, vector<8x512xf32>
    %c496_i32_127 = arith.constant 496 : i32
    %357 = tpu.dynamic_rotate %276 by %c496_i32_127 dim 1 : vector<8x512xf32>, i32 -> vector<8x512xf32>
    %cst_128 = arith.constant 0.000000e+00 : f32
    %358 = vector.shape_cast %70 : vector<1x512xi1> to vector<1x512xi1>
    %359 = vector.broadcast %358 : vector<1x512xi1> to vector<8x512xi1>
    %360 = vector.broadcast %cst_128 : f32 to vector<8x512xf32>
    %361 = arith.select %359, %357, %360 : vector<8x512xi1>, vector<8x512xf32>
    %c495_i32_129 = arith.constant 495 : i32
    %362 = tpu.dynamic_rotate %276 by %c495_i32_129 dim 1 : vector<8x512xf32>, i32 -> vector<8x512xf32>
    %cst_130 = arith.constant 0.000000e+00 : f32
    %363 = vector.shape_cast %75 : vector<1x512xi1> to vector<1x512xi1>
    %364 = vector.broadcast %363 : vector<1x512xi1> to vector<8x512xi1>
    %365 = vector.broadcast %cst_130 : f32 to vector<8x512xf32>
    %366 = arith.select %364, %362, %365 : vector<8x512xi1>, vector<8x512xf32>
    %c494_i32 = arith.constant 494 : i32
    %367 = tpu.dynamic_rotate %276 by %c494_i32 dim 1 : vector<8x512xf32>, i32 -> vector<8x512xf32>
    %cst_131 = arith.constant 0.000000e+00 : f32
    %368 = vector.shape_cast %80 : vector<1x512xi1> to vector<1x512xi1>
    %369 = vector.broadcast %368 : vector<1x512xi1> to vector<8x512xi1>
    %370 = vector.broadcast %cst_131 : f32 to vector<8x512xf32>
    %371 = arith.select %369, %367, %370 : vector<8x512xi1>, vector<8x512xf32>
    %c482_i32 = arith.constant 482 : i32
    %372 = tpu.dynamic_rotate %276 by %c482_i32 dim 1 : vector<8x512xf32>, i32 -> vector<8x512xf32>
    %cst_132 = arith.constant 0.000000e+00 : f32
    %373 = vector.shape_cast %85 : vector<1x512xi1> to vector<1x512xi1>
    %374 = vector.broadcast %373 : vector<1x512xi1> to vector<8x512xi1>
    %375 = vector.broadcast %cst_132 : f32 to vector<8x512xf32>
    %376 = arith.select %374, %372, %375 : vector<8x512xi1>, vector<8x512xf32>
    %c481_i32 = arith.constant 481 : i32
    %377 = tpu.dynamic_rotate %276 by %c481_i32 dim 1 : vector<8x512xf32>, i32 -> vector<8x512xf32>
    %cst_133 = arith.constant 0.000000e+00 : f32
    %378 = vector.shape_cast %90 : vector<1x512xi1> to vector<1x512xi1>
    %379 = vector.broadcast %378 : vector<1x512xi1> to vector<8x512xi1>
    %380 = vector.broadcast %cst_133 : f32 to vector<8x512xf32>
    %381 = arith.select %379, %377, %380 : vector<8x512xi1>, vector<8x512xf32>
    %c480_i32 = arith.constant 480 : i32
    %382 = tpu.dynamic_rotate %276 by %c480_i32 dim 1 : vector<8x512xf32>, i32 -> vector<8x512xf32>
    %cst_134 = arith.constant 0.000000e+00 : f32
    %383 = vector.shape_cast %92 : vector<1x512xi1> to vector<1x512xi1>
    %384 = vector.broadcast %383 : vector<1x512xi1> to vector<8x512xi1>
    %385 = vector.broadcast %cst_134 : f32 to vector<8x512xf32>
    %386 = arith.select %384, %382, %385 : vector<8x512xi1>, vector<8x512xf32>
    %c479_i32 = arith.constant 479 : i32
    %387 = tpu.dynamic_rotate %276 by %c479_i32 dim 1 : vector<8x512xf32>, i32 -> vector<8x512xf32>
    %cst_135 = arith.constant 0.000000e+00 : f32
    %388 = vector.shape_cast %97 : vector<1x512xi1> to vector<1x512xi1>
    %389 = vector.broadcast %388 : vector<1x512xi1> to vector<8x512xi1>
    %390 = vector.broadcast %cst_135 : f32 to vector<8x512xf32>
    %391 = arith.select %389, %387, %390 : vector<8x512xi1>, vector<8x512xf32>
    %c478_i32 = arith.constant 478 : i32
    %392 = tpu.dynamic_rotate %276 by %c478_i32 dim 1 : vector<8x512xf32>, i32 -> vector<8x512xf32>
    %cst_136 = arith.constant 0.000000e+00 : f32
    %393 = vector.shape_cast %102 : vector<1x512xi1> to vector<1x512xi1>
    %394 = vector.broadcast %393 : vector<1x512xi1> to vector<8x512xi1>
    %395 = vector.broadcast %cst_136 : f32 to vector<8x512xf32>
    %396 = arith.select %394, %392, %395 : vector<8x512xi1>, vector<8x512xf32>
    %397 = tpu.concatenate %281, %286, %291, %296, %301, %306, %311, %316, %321, %326, %331, %336, %276, %341, %346, %351 in 0 : vector<8x512xf32>, vector<8x512xf32>, vector<8x512xf32>, vector<8x512xf32>, vector<8x512xf32>, vector<8x512xf32>, vector<8x512xf32>, vector<8x512xf32>, vector<8x512xf32>, vector<8x512xf32>, vector<8x512xf32>, vector<8x512xf32>, vector<8x512xf32>, vector<8x512xf32>, vector<8x512xf32>, vector<8x512xf32> -> vector<128x512xf32>
    %398 = tpu.concatenate %356, %361, %366, %371, %376, %381, %386, %391, %396 in 0 : vector<8x512xf32>, vector<8x512xf32>, vector<8x512xf32>, vector<8x512xf32>, vector<8x512xf32>, vector<8x512xf32>, vector<8x512xf32>, vector<8x512xf32>, vector<8x512xf32> -> vector<72x512xf32>
    %399 = tpu.concatenate %397, %398 in 0 : vector<128x512xf32>, vector<72x512xf32> -> vector<200x512xf32>
    %400 = arith.truncf %399 : vector<200x512xf32> to vector<200x512xbf16>
    %c0_137 = arith.constant 0 : index
    %c0_138 = arith.constant 0 : index
    %401 = vector.load %arg8[%c0_137, %c0_138] : memref<16x200xbf16, #tpu.memory_space<vmem>>, vector<16x200xbf16>
    %cst_139 = arith.constant dense<0.000000e+00> : vector<16x512xf32>
    %402 = tpu.matmul %401, %400, %cst_139 {dimension_numbers = #tpu.dot_dimension_numbers<[1], [0], [0], [1], [0, 0, 1, 1], [], []>} : vector<16x200xbf16>, vector<200x512xbf16>, vector<16x512xf32> -> vector<16x512xf32>
    %403 = arith.truncf %402 : vector<16x512xf32> to vector<16x512xbf16>
    %c0_140 = arith.constant 0 : index
    %c0_141 = arith.constant 0 : index
    %404 = vector.load %arg17[%c0_140, %c0_141] : memref<512x128xbf16, #tpu.memory_space<vmem>>, vector<512x128xbf16>
    %cst_142 = arith.constant dense<0.000000e+00> : vector<16x128xf32>
    %405 = tpu.matmul %403, %404, %cst_142 {dimension_numbers = #tpu.dot_dimension_numbers<[1], [0], [0], [1], [0, 0, 1, 1], [], []>} : vector<16x512xbf16>, vector<512x128xbf16>, vector<16x128xf32> -> vector<16x128xf32>
    %cst_143 = arith.constant dense<0.000000e+00> : vector<16xf32>
    %406 = vector.multi_reduction <add>, %405, %cst_143 [1] : vector<16x128xf32> to vector<16xf32>
    %407 = vector.shape_cast %406 : vector<16xf32> to vector<16x1xf32>
    %cst_144 = arith.constant 7.812500e-03 : f32
    %408 = vector.broadcast %cst_144 : f32 to vector<16x1xf32>
    %409 = arith.mulf %407, %408 : vector<16x1xf32>
    %410 = arith.mulf %405, %405 : vector<16x128xf32>
    %cst_145 = arith.constant dense<0.000000e+00> : vector<16xf32>
    %411 = vector.multi_reduction <add>, %410, %cst_145 [1] : vector<16x128xf32> to vector<16xf32>
    %412 = vector.shape_cast %411 : vector<16xf32> to vector<16x1xf32>
    %cst_146 = arith.constant 7.812500e-03 : f32
    %413 = vector.broadcast %cst_146 : f32 to vector<16x1xf32>
    %414 = arith.mulf %412, %413 : vector<16x1xf32>
    %415 = arith.mulf %409, %409 : vector<16x1xf32>
    %416 = arith.subf %414, %415 : vector<16x1xf32>
    %cst_147 = arith.constant 9.99999974E-6 : f32
    %417 = vector.broadcast %cst_147 : f32 to vector<16x1xf32>
    %418 = arith.addf %416, %417 : vector<16x1xf32>
    %419 = math.rsqrt %418 : vector<16x1xf32>
    %c0_148 = arith.constant 0 : index
    %c0_149 = arith.constant 0 : index
    %420 = vector.load %arg9[%c0_148, %c0_149] : memref<16x1xf32, #tpu.memory_space<vmem>>, vector<16x1xf32>
    %421 = arith.mulf %419, %420 : vector<16x1xf32>
    %422 = vector.broadcast %409 : vector<16x1xf32> to vector<16x128xf32>
    %423 = arith.subf %405, %422 : vector<16x128xf32>
    %424 = vector.broadcast %421 : vector<16x1xf32> to vector<16x128xf32>
    %425 = arith.mulf %423, %424 : vector<16x128xf32>
    %c0_150 = arith.constant 0 : index
    %c0_151 = arith.constant 0 : index
    %426 = vector.load %arg10[%c0_150, %c0_151] : memref<16x1xf32, #tpu.memory_space<vmem>>, vector<16x1xf32>
    %427 = vector.broadcast %426 : vector<16x1xf32> to vector<16x128xf32>
    %428 = arith.addf %425, %427 : vector<16x128xf32>
    %cst_152 = arith.constant 0.000000e+00 : f32
    %429 = vector.broadcast %cst_152 : f32 to vector<16x128xf32>
    %430 = arith.maximumf %428, %429 : vector<16x128xf32>
    %c9_i32 = arith.constant 9 : i32
    %431 = tpu.dynamic_rotate %430 by %c9_i32 dim 1 : vector<16x128xf32>, i32 -> vector<16x128xf32>
    %cst_153 = arith.constant 0.000000e+00 : f32
    %432 = vector.shape_cast %114 : vector<1x128xi1> to vector<1x128xi1>
    %433 = vector.broadcast %432 : vector<1x128xi1> to vector<16x128xi1>
    %434 = vector.broadcast %cst_153 : f32 to vector<16x128xf32>
    %435 = arith.select %433, %431, %434 : vector<16x128xi1>, vector<16x128xf32>
    %c8_i32 = arith.constant 8 : i32
    %436 = tpu.dynamic_rotate %430 by %c8_i32 dim 1 : vector<16x128xf32>, i32 -> vector<16x128xf32>
    %cst_154 = arith.constant 0.000000e+00 : f32
    %437 = vector.shape_cast %116 : vector<1x128xi1> to vector<1x128xi1>
    %438 = vector.broadcast %437 : vector<1x128xi1> to vector<16x128xi1>
    %439 = vector.broadcast %cst_154 : f32 to vector<16x128xf32>
    %440 = arith.select %438, %436, %439 : vector<16x128xi1>, vector<16x128xf32>
    %c7_i32_155 = arith.constant 7 : i32
    %441 = tpu.dynamic_rotate %430 by %c7_i32_155 dim 1 : vector<16x128xf32>, i32 -> vector<16x128xf32>
    %cst_156 = arith.constant 0.000000e+00 : f32
    %442 = vector.shape_cast %121 : vector<1x128xi1> to vector<1x128xi1>
    %443 = vector.broadcast %442 : vector<1x128xi1> to vector<16x128xi1>
    %444 = vector.broadcast %cst_156 : f32 to vector<16x128xf32>
    %445 = arith.select %443, %441, %444 : vector<16x128xi1>, vector<16x128xf32>
    %c1_i32_157 = arith.constant 1 : i32
    %446 = tpu.dynamic_rotate %430 by %c1_i32_157 dim 1 : vector<16x128xf32>, i32 -> vector<16x128xf32>
    %cst_158 = arith.constant 0.000000e+00 : f32
    %447 = vector.shape_cast %123 : vector<1x128xi1> to vector<1x128xi1>
    %448 = vector.broadcast %447 : vector<1x128xi1> to vector<16x128xi1>
    %449 = vector.broadcast %cst_158 : f32 to vector<16x128xf32>
    %450 = arith.select %448, %446, %449 : vector<16x128xi1>, vector<16x128xf32>
    %c127_i32 = arith.constant 127 : i32
    %451 = tpu.dynamic_rotate %430 by %c127_i32 dim 1 : vector<16x128xf32>, i32 -> vector<16x128xf32>
    %cst_159 = arith.constant 0.000000e+00 : f32
    %452 = vector.shape_cast %125 : vector<1x128xi1> to vector<1x128xi1>
    %453 = vector.broadcast %452 : vector<1x128xi1> to vector<16x128xi1>
    %454 = vector.broadcast %cst_159 : f32 to vector<16x128xf32>
    %455 = arith.select %453, %451, %454 : vector<16x128xi1>, vector<16x128xf32>
    %c121_i32 = arith.constant 121 : i32
    %456 = tpu.dynamic_rotate %430 by %c121_i32 dim 1 : vector<16x128xf32>, i32 -> vector<16x128xf32>
    %cst_160 = arith.constant 0.000000e+00 : f32
    %457 = vector.shape_cast %130 : vector<1x128xi1> to vector<1x128xi1>
    %458 = vector.broadcast %457 : vector<1x128xi1> to vector<16x128xi1>
    %459 = vector.broadcast %cst_160 : f32 to vector<16x128xf32>
    %460 = arith.select %458, %456, %459 : vector<16x128xi1>, vector<16x128xf32>
    %c120_i32 = arith.constant 120 : i32
    %461 = tpu.dynamic_rotate %430 by %c120_i32 dim 1 : vector<16x128xf32>, i32 -> vector<16x128xf32>
    %cst_161 = arith.constant 0.000000e+00 : f32
    %462 = vector.shape_cast %132 : vector<1x128xi1> to vector<1x128xi1>
    %463 = vector.broadcast %462 : vector<1x128xi1> to vector<16x128xi1>
    %464 = vector.broadcast %cst_161 : f32 to vector<16x128xf32>
    %465 = arith.select %463, %461, %464 : vector<16x128xi1>, vector<16x128xf32>
    %c119_i32 = arith.constant 119 : i32
    %466 = tpu.dynamic_rotate %430 by %c119_i32 dim 1 : vector<16x128xf32>, i32 -> vector<16x128xf32>
    %cst_162 = arith.constant 0.000000e+00 : f32
    %467 = vector.shape_cast %137 : vector<1x128xi1> to vector<1x128xi1>
    %468 = vector.broadcast %467 : vector<1x128xi1> to vector<16x128xi1>
    %469 = vector.broadcast %cst_162 : f32 to vector<16x128xf32>
    %470 = arith.select %468, %466, %469 : vector<16x128xi1>, vector<16x128xf32>
    %471 = tpu.concatenate %435, %440, %445, %450, %430, %455, %460, %465, %470 in 0 : vector<16x128xf32>, vector<16x128xf32>, vector<16x128xf32>, vector<16x128xf32>, vector<16x128xf32>, vector<16x128xf32>, vector<16x128xf32>, vector<16x128xf32>, vector<16x128xf32> -> vector<144x128xf32>
    %472 = arith.truncf %471 : vector<144x128xf32> to vector<144x128xbf16>
    %c0_163 = arith.constant 0 : index
    %c0_164 = arith.constant 0 : index
    %473 = vector.load %arg11[%c0_163, %c0_164] : memref<16x144xbf16, #tpu.memory_space<vmem>>, vector<16x144xbf16>
    %cst_165 = arith.constant dense<0.000000e+00> : vector<16x128xf32>
    %474 = tpu.matmul %473, %472, %cst_165 {dimension_numbers = #tpu.dot_dimension_numbers<[1], [0], [0], [1], [0, 0, 1, 1], [], []>} : vector<16x144xbf16>, vector<144x128xbf16>, vector<16x128xf32> -> vector<16x128xf32>
    %cst_166 = arith.constant dense<0.000000e+00> : vector<16xf32>
    %475 = vector.multi_reduction <add>, %474, %cst_166 [1] : vector<16x128xf32> to vector<16xf32>
    %476 = vector.shape_cast %475 : vector<16xf32> to vector<16x1xf32>
    %cst_167 = arith.constant 7.812500e-03 : f32
    %477 = vector.broadcast %cst_167 : f32 to vector<16x1xf32>
    %478 = arith.mulf %476, %477 : vector<16x1xf32>
    %479 = arith.mulf %474, %474 : vector<16x128xf32>
    %cst_168 = arith.constant dense<0.000000e+00> : vector<16xf32>
    %480 = vector.multi_reduction <add>, %479, %cst_168 [1] : vector<16x128xf32> to vector<16xf32>
    %481 = vector.shape_cast %480 : vector<16xf32> to vector<16x1xf32>
    %cst_169 = arith.constant 7.812500e-03 : f32
    %482 = vector.broadcast %cst_169 : f32 to vector<16x1xf32>
    %483 = arith.mulf %481, %482 : vector<16x1xf32>
    %484 = arith.mulf %478, %478 : vector<16x1xf32>
    %485 = arith.subf %483, %484 : vector<16x1xf32>
    %cst_170 = arith.constant 9.99999974E-6 : f32
    %486 = vector.broadcast %cst_170 : f32 to vector<16x1xf32>
    %487 = arith.addf %485, %486 : vector<16x1xf32>
    %488 = math.rsqrt %487 : vector<16x1xf32>
    %c0_171 = arith.constant 0 : index
    %c0_172 = arith.constant 0 : index
    %489 = vector.load %arg12[%c0_171, %c0_172] : memref<16x1xf32, #tpu.memory_space<vmem>>, vector<16x1xf32>
    %490 = arith.mulf %488, %489 : vector<16x1xf32>
    %491 = vector.broadcast %478 : vector<16x1xf32> to vector<16x128xf32>
    %492 = arith.subf %474, %491 : vector<16x128xf32>
    %493 = vector.broadcast %490 : vector<16x1xf32> to vector<16x128xf32>
    %494 = arith.mulf %492, %493 : vector<16x128xf32>
    %c0_173 = arith.constant 0 : index
    %c0_174 = arith.constant 0 : index
    %495 = vector.load %arg13[%c0_173, %c0_174] : memref<16x1xf32, #tpu.memory_space<vmem>>, vector<16x1xf32>
    %496 = vector.broadcast %495 : vector<16x1xf32> to vector<16x128xf32>
    %497 = arith.addf %494, %496 : vector<16x128xf32>
    %cst_175 = arith.constant 0.000000e+00 : f32
    %498 = vector.broadcast %cst_175 : f32 to vector<16x128xf32>
    %499 = arith.maximumf %497, %498 : vector<16x128xf32>
    %c9_i32_176 = arith.constant 9 : i32
    %500 = tpu.dynamic_rotate %499 by %c9_i32_176 dim 1 : vector<16x128xf32>, i32 -> vector<16x128xf32>
    %cst_177 = arith.constant 0.000000e+00 : f32
    %501 = vector.shape_cast %114 : vector<1x128xi1> to vector<1x128xi1>
    %502 = vector.broadcast %501 : vector<1x128xi1> to vector<16x128xi1>
    %503 = vector.broadcast %cst_177 : f32 to vector<16x128xf32>
    %504 = arith.select %502, %500, %503 : vector<16x128xi1>, vector<16x128xf32>
    %c8_i32_178 = arith.constant 8 : i32
    %505 = tpu.dynamic_rotate %499 by %c8_i32_178 dim 1 : vector<16x128xf32>, i32 -> vector<16x128xf32>
    %cst_179 = arith.constant 0.000000e+00 : f32
    %506 = vector.shape_cast %116 : vector<1x128xi1> to vector<1x128xi1>
    %507 = vector.broadcast %506 : vector<1x128xi1> to vector<16x128xi1>
    %508 = vector.broadcast %cst_179 : f32 to vector<16x128xf32>
    %509 = arith.select %507, %505, %508 : vector<16x128xi1>, vector<16x128xf32>
    %c7_i32_180 = arith.constant 7 : i32
    %510 = tpu.dynamic_rotate %499 by %c7_i32_180 dim 1 : vector<16x128xf32>, i32 -> vector<16x128xf32>
    %cst_181 = arith.constant 0.000000e+00 : f32
    %511 = vector.shape_cast %121 : vector<1x128xi1> to vector<1x128xi1>
    %512 = vector.broadcast %511 : vector<1x128xi1> to vector<16x128xi1>
    %513 = vector.broadcast %cst_181 : f32 to vector<16x128xf32>
    %514 = arith.select %512, %510, %513 : vector<16x128xi1>, vector<16x128xf32>
    %c1_i32_182 = arith.constant 1 : i32
    %515 = tpu.dynamic_rotate %499 by %c1_i32_182 dim 1 : vector<16x128xf32>, i32 -> vector<16x128xf32>
    %cst_183 = arith.constant 0.000000e+00 : f32
    %516 = vector.shape_cast %123 : vector<1x128xi1> to vector<1x128xi1>
    %517 = vector.broadcast %516 : vector<1x128xi1> to vector<16x128xi1>
    %518 = vector.broadcast %cst_183 : f32 to vector<16x128xf32>
    %519 = arith.select %517, %515, %518 : vector<16x128xi1>, vector<16x128xf32>
    %c127_i32_184 = arith.constant 127 : i32
    %520 = tpu.dynamic_rotate %499 by %c127_i32_184 dim 1 : vector<16x128xf32>, i32 -> vector<16x128xf32>
    %cst_185 = arith.constant 0.000000e+00 : f32
    %521 = vector.shape_cast %125 : vector<1x128xi1> to vector<1x128xi1>
    %522 = vector.broadcast %521 : vector<1x128xi1> to vector<16x128xi1>
    %523 = vector.broadcast %cst_185 : f32 to vector<16x128xf32>
    %524 = arith.select %522, %520, %523 : vector<16x128xi1>, vector<16x128xf32>
    %c121_i32_186 = arith.constant 121 : i32
    %525 = tpu.dynamic_rotate %499 by %c121_i32_186 dim 1 : vector<16x128xf32>, i32 -> vector<16x128xf32>
    %cst_187 = arith.constant 0.000000e+00 : f32
    %526 = vector.shape_cast %130 : vector<1x128xi1> to vector<1x128xi1>
    %527 = vector.broadcast %526 : vector<1x128xi1> to vector<16x128xi1>
    %528 = vector.broadcast %cst_187 : f32 to vector<16x128xf32>
    %529 = arith.select %527, %525, %528 : vector<16x128xi1>, vector<16x128xf32>
    %c120_i32_188 = arith.constant 120 : i32
    %530 = tpu.dynamic_rotate %499 by %c120_i32_188 dim 1 : vector<16x128xf32>, i32 -> vector<16x128xf32>
    %cst_189 = arith.constant 0.000000e+00 : f32
    %531 = vector.shape_cast %132 : vector<1x128xi1> to vector<1x128xi1>
    %532 = vector.broadcast %531 : vector<1x128xi1> to vector<16x128xi1>
    %533 = vector.broadcast %cst_189 : f32 to vector<16x128xf32>
    %534 = arith.select %532, %530, %533 : vector<16x128xi1>, vector<16x128xf32>
    %c119_i32_190 = arith.constant 119 : i32
    %535 = tpu.dynamic_rotate %499 by %c119_i32_190 dim 1 : vector<16x128xf32>, i32 -> vector<16x128xf32>
    %cst_191 = arith.constant 0.000000e+00 : f32
    %536 = vector.shape_cast %137 : vector<1x128xi1> to vector<1x128xi1>
    %537 = vector.broadcast %536 : vector<1x128xi1> to vector<16x128xi1>
    %538 = vector.broadcast %cst_191 : f32 to vector<16x128xf32>
    %539 = arith.select %537, %535, %538 : vector<16x128xi1>, vector<16x128xf32>
    %540 = tpu.concatenate %504, %509, %514, %519, %499, %524, %529, %534, %539 in 0 : vector<16x128xf32>, vector<16x128xf32>, vector<16x128xf32>, vector<16x128xf32>, vector<16x128xf32>, vector<16x128xf32>, vector<16x128xf32>, vector<16x128xf32>, vector<16x128xf32> -> vector<144x128xf32>
    %541 = arith.truncf %540 : vector<144x128xf32> to vector<144x128xbf16>
    %c0_192 = arith.constant 0 : index
    %c0_193 = arith.constant 0 : index
    %542 = vector.load %arg14[%c0_192, %c0_193] : memref<16x144xbf16, #tpu.memory_space<vmem>>, vector<16x144xbf16>
    %cst_194 = arith.constant dense<0.000000e+00> : vector<16x128xf32>
    %543 = tpu.matmul %542, %541, %cst_194 {dimension_numbers = #tpu.dot_dimension_numbers<[1], [0], [0], [1], [0, 0, 1, 1], [], []>} : vector<16x144xbf16>, vector<144x128xbf16>, vector<16x128xf32> -> vector<16x128xf32>
    %cst_195 = arith.constant dense<0.000000e+00> : vector<16xf32>
    %544 = vector.multi_reduction <add>, %543, %cst_195 [1] : vector<16x128xf32> to vector<16xf32>
    %545 = vector.shape_cast %544 : vector<16xf32> to vector<16x1xf32>
    %cst_196 = arith.constant 7.812500e-03 : f32
    %546 = vector.broadcast %cst_196 : f32 to vector<16x1xf32>
    %547 = arith.mulf %545, %546 : vector<16x1xf32>
    %548 = arith.mulf %543, %543 : vector<16x128xf32>
    %cst_197 = arith.constant dense<0.000000e+00> : vector<16xf32>
    %549 = vector.multi_reduction <add>, %548, %cst_197 [1] : vector<16x128xf32> to vector<16xf32>
    %550 = vector.shape_cast %549 : vector<16xf32> to vector<16x1xf32>
    %cst_198 = arith.constant 7.812500e-03 : f32
    %551 = vector.broadcast %cst_198 : f32 to vector<16x1xf32>
    %552 = arith.mulf %550, %551 : vector<16x1xf32>
    %553 = arith.mulf %547, %547 : vector<16x1xf32>
    %554 = arith.subf %552, %553 : vector<16x1xf32>
    %cst_199 = arith.constant 9.99999974E-6 : f32
    %555 = vector.broadcast %cst_199 : f32 to vector<16x1xf32>
    %556 = arith.addf %554, %555 : vector<16x1xf32>
    %557 = math.rsqrt %556 : vector<16x1xf32>
    %c0_200 = arith.constant 0 : index
    %c0_201 = arith.constant 0 : index
    %558 = vector.load %arg15[%c0_200, %c0_201] : memref<16x1xf32, #tpu.memory_space<vmem>>, vector<16x1xf32>
    %559 = arith.mulf %557, %558 : vector<16x1xf32>
    %560 = vector.broadcast %547 : vector<16x1xf32> to vector<16x128xf32>
    %561 = arith.subf %543, %560 : vector<16x128xf32>
    %562 = vector.broadcast %559 : vector<16x1xf32> to vector<16x128xf32>
    %563 = arith.mulf %561, %562 : vector<16x128xf32>
    %c0_202 = arith.constant 0 : index
    %c0_203 = arith.constant 0 : index
    %564 = vector.load %arg16[%c0_202, %c0_203] : memref<16x1xf32, #tpu.memory_space<vmem>>, vector<16x1xf32>
    %565 = vector.broadcast %564 : vector<16x1xf32> to vector<16x128xf32>
    %566 = arith.addf %563, %565 : vector<16x128xf32>
    %cst_204 = arith.constant 0.000000e+00 : f32
    %567 = vector.broadcast %cst_204 : f32 to vector<16x128xf32>
    %568 = arith.maximumf %566, %567 : vector<16x128xf32>
    %cst_205 = arith.constant 0.000000e+00 : f32
    %569 = vector.broadcast %cst_205 : f32 to vector<10x128xf32>
    %c0_206 = arith.constant 0 : index
    %c0_207 = arith.constant 0 : index
    %c0_208 = arith.constant 0 : index
    %570 = vector.load %arg18[%c0_206, %c0_207, %c0_208] : memref<16x10x128xf32, #tpu.memory_space<vmem>>, vector<1x10x128xf32>
    %571 = vector.shape_cast %570 : vector<1x10x128xf32> to vector<10x128xf32>
    %572 = vector.extract_strided_slice %568 {offsets = [0, 0], sizes = [1, 128], strides = [1, 1]} : vector<16x128xf32> to vector<1x128xf32>
    %573 = vector.broadcast %572 : vector<1x128xf32> to vector<10x128xf32>
    %574 = arith.mulf %571, %573 : vector<10x128xf32>
    %575 = arith.addf %569, %574 : vector<10x128xf32>
    %c1 = arith.constant 1 : index
    %c0_209 = arith.constant 0 : index
    %c0_210 = arith.constant 0 : index
    %576 = vector.load %arg18[%c1, %c0_209, %c0_210] : memref<16x10x128xf32, #tpu.memory_space<vmem>>, vector<1x10x128xf32>
    %577 = vector.shape_cast %576 : vector<1x10x128xf32> to vector<10x128xf32>
    %578 = vector.extract_strided_slice %568 {offsets = [1, 0], sizes = [1, 128], strides = [1, 1]} : vector<16x128xf32> to vector<1x128xf32>
    %579 = vector.broadcast %578 : vector<1x128xf32> to vector<10x128xf32>
    %580 = arith.mulf %577, %579 : vector<10x128xf32>
    %581 = arith.addf %575, %580 : vector<10x128xf32>
    %c2 = arith.constant 2 : index
    %c0_211 = arith.constant 0 : index
    %c0_212 = arith.constant 0 : index
    %582 = vector.load %arg18[%c2, %c0_211, %c0_212] : memref<16x10x128xf32, #tpu.memory_space<vmem>>, vector<1x10x128xf32>
    %583 = vector.shape_cast %582 : vector<1x10x128xf32> to vector<10x128xf32>
    %584 = vector.extract_strided_slice %568 {offsets = [2, 0], sizes = [1, 128], strides = [1, 1]} : vector<16x128xf32> to vector<1x128xf32>
    %585 = vector.broadcast %584 : vector<1x128xf32> to vector<10x128xf32>
    %586 = arith.mulf %583, %585 : vector<10x128xf32>
    %587 = arith.addf %581, %586 : vector<10x128xf32>
    %c3 = arith.constant 3 : index
    %c0_213 = arith.constant 0 : index
    %c0_214 = arith.constant 0 : index
    %588 = vector.load %arg18[%c3, %c0_213, %c0_214] : memref<16x10x128xf32, #tpu.memory_space<vmem>>, vector<1x10x128xf32>
    %589 = vector.shape_cast %588 : vector<1x10x128xf32> to vector<10x128xf32>
    %590 = vector.extract_strided_slice %568 {offsets = [3, 0], sizes = [1, 128], strides = [1, 1]} : vector<16x128xf32> to vector<1x128xf32>
    %591 = vector.broadcast %590 : vector<1x128xf32> to vector<10x128xf32>
    %592 = arith.mulf %589, %591 : vector<10x128xf32>
    %593 = arith.addf %587, %592 : vector<10x128xf32>
    %c4 = arith.constant 4 : index
    %c0_215 = arith.constant 0 : index
    %c0_216 = arith.constant 0 : index
    %594 = vector.load %arg18[%c4, %c0_215, %c0_216] : memref<16x10x128xf32, #tpu.memory_space<vmem>>, vector<1x10x128xf32>
    %595 = vector.shape_cast %594 : vector<1x10x128xf32> to vector<10x128xf32>
    %596 = vector.extract_strided_slice %568 {offsets = [4, 0], sizes = [1, 128], strides = [1, 1]} : vector<16x128xf32> to vector<1x128xf32>
    %597 = vector.broadcast %596 : vector<1x128xf32> to vector<10x128xf32>
    %598 = arith.mulf %595, %597 : vector<10x128xf32>
    %599 = arith.addf %593, %598 : vector<10x128xf32>
    %c5 = arith.constant 5 : index
    %c0_217 = arith.constant 0 : index
    %c0_218 = arith.constant 0 : index
    %600 = vector.load %arg18[%c5, %c0_217, %c0_218] : memref<16x10x128xf32, #tpu.memory_space<vmem>>, vector<1x10x128xf32>
    %601 = vector.shape_cast %600 : vector<1x10x128xf32> to vector<10x128xf32>
    %602 = vector.extract_strided_slice %568 {offsets = [5, 0], sizes = [1, 128], strides = [1, 1]} : vector<16x128xf32> to vector<1x128xf32>
    %603 = vector.broadcast %602 : vector<1x128xf32> to vector<10x128xf32>
    %604 = arith.mulf %601, %603 : vector<10x128xf32>
    %605 = arith.addf %599, %604 : vector<10x128xf32>
    %c6 = arith.constant 6 : index
    %c0_219 = arith.constant 0 : index
    %c0_220 = arith.constant 0 : index
    %606 = vector.load %arg18[%c6, %c0_219, %c0_220] : memref<16x10x128xf32, #tpu.memory_space<vmem>>, vector<1x10x128xf32>
    %607 = vector.shape_cast %606 : vector<1x10x128xf32> to vector<10x128xf32>
    %608 = vector.extract_strided_slice %568 {offsets = [6, 0], sizes = [1, 128], strides = [1, 1]} : vector<16x128xf32> to vector<1x128xf32>
    %609 = vector.broadcast %608 : vector<1x128xf32> to vector<10x128xf32>
    %610 = arith.mulf %607, %609 : vector<10x128xf32>
    %611 = arith.addf %605, %610 : vector<10x128xf32>
    %c7 = arith.constant 7 : index
    %c0_221 = arith.constant 0 : index
    %c0_222 = arith.constant 0 : index
    %612 = vector.load %arg18[%c7, %c0_221, %c0_222] : memref<16x10x128xf32, #tpu.memory_space<vmem>>, vector<1x10x128xf32>
    %613 = vector.shape_cast %612 : vector<1x10x128xf32> to vector<10x128xf32>
    %614 = vector.extract_strided_slice %568 {offsets = [7, 0], sizes = [1, 128], strides = [1, 1]} : vector<16x128xf32> to vector<1x128xf32>
    %615 = vector.broadcast %614 : vector<1x128xf32> to vector<10x128xf32>
    %616 = arith.mulf %613, %615 : vector<10x128xf32>
    %617 = arith.addf %611, %616 : vector<10x128xf32>
    %c8 = arith.constant 8 : index
    %c0_223 = arith.constant 0 : index
    %c0_224 = arith.constant 0 : index
    %618 = vector.load %arg18[%c8, %c0_223, %c0_224] : memref<16x10x128xf32, #tpu.memory_space<vmem>>, vector<1x10x128xf32>
    %619 = vector.shape_cast %618 : vector<1x10x128xf32> to vector<10x128xf32>
    %620 = vector.extract_strided_slice %568 {offsets = [8, 0], sizes = [1, 128], strides = [1, 1]} : vector<16x128xf32> to vector<1x128xf32>
    %621 = vector.broadcast %620 : vector<1x128xf32> to vector<10x128xf32>
    %622 = arith.mulf %619, %621 : vector<10x128xf32>
    %623 = arith.addf %617, %622 : vector<10x128xf32>
    %c9 = arith.constant 9 : index
    %c0_225 = arith.constant 0 : index
    %c0_226 = arith.constant 0 : index
    %624 = vector.load %arg18[%c9, %c0_225, %c0_226] : memref<16x10x128xf32, #tpu.memory_space<vmem>>, vector<1x10x128xf32>
    %625 = vector.shape_cast %624 : vector<1x10x128xf32> to vector<10x128xf32>
    %626 = vector.extract_strided_slice %568 {offsets = [9, 0], sizes = [1, 128], strides = [1, 1]} : vector<16x128xf32> to vector<1x128xf32>
    %627 = vector.broadcast %626 : vector<1x128xf32> to vector<10x128xf32>
    %628 = arith.mulf %625, %627 : vector<10x128xf32>
    %629 = arith.addf %623, %628 : vector<10x128xf32>
    %c10 = arith.constant 10 : index
    %c0_227 = arith.constant 0 : index
    %c0_228 = arith.constant 0 : index
    %630 = vector.load %arg18[%c10, %c0_227, %c0_228] : memref<16x10x128xf32, #tpu.memory_space<vmem>>, vector<1x10x128xf32>
    %631 = vector.shape_cast %630 : vector<1x10x128xf32> to vector<10x128xf32>
    %632 = vector.extract_strided_slice %568 {offsets = [10, 0], sizes = [1, 128], strides = [1, 1]} : vector<16x128xf32> to vector<1x128xf32>
    %633 = vector.broadcast %632 : vector<1x128xf32> to vector<10x128xf32>
    %634 = arith.mulf %631, %633 : vector<10x128xf32>
    %635 = arith.addf %629, %634 : vector<10x128xf32>
    %c11 = arith.constant 11 : index
    %c0_229 = arith.constant 0 : index
    %c0_230 = arith.constant 0 : index
    %636 = vector.load %arg18[%c11, %c0_229, %c0_230] : memref<16x10x128xf32, #tpu.memory_space<vmem>>, vector<1x10x128xf32>
    %637 = vector.shape_cast %636 : vector<1x10x128xf32> to vector<10x128xf32>
    %638 = vector.extract_strided_slice %568 {offsets = [11, 0], sizes = [1, 128], strides = [1, 1]} : vector<16x128xf32> to vector<1x128xf32>
    %639 = vector.broadcast %638 : vector<1x128xf32> to vector<10x128xf32>
    %640 = arith.mulf %637, %639 : vector<10x128xf32>
    %641 = arith.addf %635, %640 : vector<10x128xf32>
    %c12 = arith.constant 12 : index
    %c0_231 = arith.constant 0 : index
    %c0_232 = arith.constant 0 : index
    %642 = vector.load %arg18[%c12, %c0_231, %c0_232] : memref<16x10x128xf32, #tpu.memory_space<vmem>>, vector<1x10x128xf32>
    %643 = vector.shape_cast %642 : vector<1x10x128xf32> to vector<10x128xf32>
    %644 = vector.extract_strided_slice %568 {offsets = [12, 0], sizes = [1, 128], strides = [1, 1]} : vector<16x128xf32> to vector<1x128xf32>
    %645 = vector.broadcast %644 : vector<1x128xf32> to vector<10x128xf32>
    %646 = arith.mulf %643, %645 : vector<10x128xf32>
    %647 = arith.addf %641, %646 : vector<10x128xf32>
    %c13 = arith.constant 13 : index
    %c0_233 = arith.constant 0 : index
    %c0_234 = arith.constant 0 : index
    %648 = vector.load %arg18[%c13, %c0_233, %c0_234] : memref<16x10x128xf32, #tpu.memory_space<vmem>>, vector<1x10x128xf32>
    %649 = vector.shape_cast %648 : vector<1x10x128xf32> to vector<10x128xf32>
    %650 = vector.extract_strided_slice %568 {offsets = [13, 0], sizes = [1, 128], strides = [1, 1]} : vector<16x128xf32> to vector<1x128xf32>
    %651 = vector.broadcast %650 : vector<1x128xf32> to vector<10x128xf32>
    %652 = arith.mulf %649, %651 : vector<10x128xf32>
    %653 = arith.addf %647, %652 : vector<10x128xf32>
    %c14 = arith.constant 14 : index
    %c0_235 = arith.constant 0 : index
    %c0_236 = arith.constant 0 : index
    %654 = vector.load %arg18[%c14, %c0_235, %c0_236] : memref<16x10x128xf32, #tpu.memory_space<vmem>>, vector<1x10x128xf32>
    %655 = vector.shape_cast %654 : vector<1x10x128xf32> to vector<10x128xf32>
    %656 = vector.extract_strided_slice %568 {offsets = [14, 0], sizes = [1, 128], strides = [1, 1]} : vector<16x128xf32> to vector<1x128xf32>
    %657 = vector.broadcast %656 : vector<1x128xf32> to vector<10x128xf32>
    %658 = arith.mulf %655, %657 : vector<10x128xf32>
    %659 = arith.addf %653, %658 : vector<10x128xf32>
    %c15 = arith.constant 15 : index
    %c0_237 = arith.constant 0 : index
    %c0_238 = arith.constant 0 : index
    %660 = vector.load %arg18[%c15, %c0_237, %c0_238] : memref<16x10x128xf32, #tpu.memory_space<vmem>>, vector<1x10x128xf32>
    %661 = vector.shape_cast %660 : vector<1x10x128xf32> to vector<10x128xf32>
    %662 = vector.extract_strided_slice %568 {offsets = [15, 0], sizes = [1, 128], strides = [1, 1]} : vector<16x128xf32> to vector<1x128xf32>
    %663 = vector.broadcast %662 : vector<1x128xf32> to vector<10x128xf32>
    %664 = arith.mulf %661, %663 : vector<10x128xf32>
    %665 = arith.addf %659, %664 : vector<10x128xf32>
    %666 = arith.truncf %665 : vector<10x128xf32> to vector<10x128xbf16>
    %c0_239 = arith.constant 0 : index
    %c0_240 = arith.constant 0 : index
    %667 = vector.load %arg19[%c0_239, %c0_240] : memref<128x2xbf16, #tpu.memory_space<vmem>>, vector<128x2xbf16>
    %cst_241 = arith.constant dense<0.000000e+00> : vector<10x2xf32>
    %668 = tpu.matmul %666, %667, %cst_241 {dimension_numbers = #tpu.dot_dimension_numbers<[1], [0], [0], [1], [0, 0, 1, 1], [], []>} : vector<10x128xbf16>, vector<128x2xbf16>, vector<10x2xf32> -> vector<10x2xf32>
    %c0_242 = arith.constant 0 : index
    %c0_243 = arith.constant 0 : index
    %669 = vector.load %arg20[%c0_242, %c0_243] : memref<10x1xf32, #tpu.memory_space<vmem>>, vector<10x1xf32>
    %670 = vector.broadcast %669 : vector<10x1xf32> to vector<10x2xf32>
    %671 = arith.addf %668, %670 : vector<10x2xf32>
    %c0_244 = arith.constant 0 : index
    %c0_245 = arith.constant 0 : index
    %672 = vector.load %arg21[%c0_244, %c0_245] : memref<10x2xf32, #tpu.memory_space<vmem>>, vector<10x2xf32>
    tpu.vector_store %arg21[%c0_244, %c0_245], %671 {strides = array<i32>} : memref<10x2xf32, #tpu.memory_space<vmem>>, vector<10x2xf32>,
    return
  }
  func.func @transform_0(%arg0: i32) -> (i32, i32) {
    %c0_i32 = arith.constant 0 : i32
    %c0_i32_0 = arith.constant 0 : i32
    %c0_i32_1 = arith.constant 0 : i32
    return %c0_i32, %c0_i32_0 : i32, i32
  }
  func.func @transform_1(%arg0: i32) -> (i32, i32) {
    %c0_i32 = arith.constant 0 : i32
    %c0_i32_0 = arith.constant 0 : i32
    %c0_i32_1 = arith.constant 0 : i32
    return %c0_i32, %c0_i32_0 : i32, i32
  }
  func.func @transform_2(%arg0: i32) -> (i32, i32) {
    %c0_i32 = arith.constant 0 : i32
    %c0_i32_0 = arith.constant 0 : i32
    %c0_i32_1 = arith.constant 0 : i32
    return %c0_i32, %c0_i32_0 : i32, i32
  }
  func.func @transform_3(%arg0: i32) -> (i32, i32) {
    %c0_i32 = arith.constant 0 : i32
    %c0_i32_0 = arith.constant 0 : i32
    %c0_i32_1 = arith.constant 0 : i32
    return %c0_i32, %c0_i32_0 : i32, i32
  }
  func.func @transform_4(%arg0: i32) -> (i32, i32) {
    %c0_i32 = arith.constant 0 : i32
    %c0_i32_0 = arith.constant 0 : i32
    %c0_i32_1 = arith.constant 0 : i32
    return %c0_i32, %c0_i32_0 : i32, i32
  }
  func.func @transform_5(%arg0: i32) -> (i32, i32) {
    %c0_i32 = arith.constant 0 : i32
    %c0_i32_0 = arith.constant 0 : i32
    %c0_i32_1 = arith.constant 0 : i32
    return %c0_i32, %c0_i32_0 : i32, i32
  }
  func.func @transform_6(%arg0: i32) -> (i32, i32) {
    %c0_i32 = arith.constant 0 : i32
    %c0_i32_0 = arith.constant 0 : i32
    %c0_i32_1 = arith.constant 0 : i32
    return %c0_i32, %c0_i32_0 : i32, i32
  }
  func.func @transform_7(%arg0: i32) -> (i32, i32) {
    %c0_i32 = arith.constant 0 : i32
    %c0_i32_0 = arith.constant 0 : i32
    %c0_i32_1 = arith.constant 0 : i32
    return %c0_i32, %c0_i32_0 : i32, i32
  }
  func.func @transform_8(%arg0: i32) -> (i32, i32) {
    %c0_i32 = arith.constant 0 : i32
    %c0_i32_0 = arith.constant 0 : i32
    %c0_i32_1 = arith.constant 0 : i32
    return %c0_i32, %c0_i32_0 : i32, i32
  }
  func.func @transform_9(%arg0: i32) -> (i32, i32) {
    %c0_i32 = arith.constant 0 : i32
    %c0_i32_0 = arith.constant 0 : i32
    %c0_i32_1 = arith.constant 0 : i32
    return %c0_i32, %c0_i32_0 : i32, i32
  }
  func.func @transform_10(%arg0: i32) -> (i32, i32) {
    %c0_i32 = arith.constant 0 : i32
    %c0_i32_0 = arith.constant 0 : i32
    %c0_i32_1 = arith.constant 0 : i32
    return %c0_i32, %c0_i32_0 : i32, i32
  }
  func.func @transform_11(%arg0: i32) -> (i32, i32) {
    %c0_i32 = arith.constant 0 : i32
    %c0_i32_0 = arith.constant 0 : i32
    %c0_i32_1 = arith.constant 0 : i32
    return %c0_i32, %c0_i32_0 : i32, i32
  }
  func.func @transform_12(%arg0: i32) -> (i32, i32) {
    %c0_i32 = arith.constant 0 : i32
    %c0_i32_0 = arith.constant 0 : i32
    %c0_i32_1 = arith.constant 0 : i32
    return %c0_i32, %c0_i32_0 : i32, i32
  }
  func.func @transform_13(%arg0: i32) -> (i32, i32) {
    %c0_i32 = arith.constant 0 : i32
    %c0_i32_0 = arith.constant 0 : i32
    %c0_i32_1 = arith.constant 0 : i32
    return %c0_i32, %c0_i32_0 : i32, i32
  }
  func.func @transform_14(%arg0: i32) -> (i32, i32) {
    %c0_i32 = arith.constant 0 : i32
    %c0_i32_0 = arith.constant 0 : i32
    %c0_i32_1 = arith.constant 0 : i32
    return %c0_i32, %c0_i32_0 : i32, i32
  }
  func.func @transform_15(%arg0: i32) -> (i32, i32) {
    %c0_i32 = arith.constant 0 : i32
    %c0_i32_0 = arith.constant 0 : i32
    %c0_i32_1 = arith.constant 0 : i32
    return %c0_i32, %c0_i32_0 : i32, i32
  }
  func.func @transform_16(%arg0: i32) -> (i32, i32) {
    %c0_i32 = arith.constant 0 : i32
    %c0_i32_0 = arith.constant 0 : i32
    %c0_i32_1 = arith.constant 0 : i32
    return %c0_i32, %c0_i32_0 : i32, i32
  }
  func.func @transform_17(%arg0: i32) -> (i32, i32, i32) {
    %c0_i32 = arith.constant 0 : i32
    %c0_i32_0 = arith.constant 0 : i32
    %c0_i32_1 = arith.constant 0 : i32
    %c0_i32_2 = arith.constant 0 : i32
    return %c0_i32, %c0_i32_0, %c0_i32_1 : i32, i32, i32
  }
  func.func @transform_18(%arg0: i32) -> (i32, i32) {
    %c0_i32 = arith.constant 0 : i32
    %c0_i32_0 = arith.constant 0 : i32
    %c0_i32_1 = arith.constant 0 : i32
    return %c0_i32, %c0_i32_0 : i32, i32
  }
  func.func @transform_19(%arg0: i32) -> (i32, i32) {
    %c0_i32 = arith.constant 0 : i32
    %c0_i32_0 = arith.constant 0 : i32
    %c0_i32_1 = arith.constant 0 : i32
    return %c0_i32, %c0_i32_0 : i32, i32
  }
  func.func @transform_20(%arg0: i32) -> (i32, i32) {
    %c0_i32 = arith.constant 0 : i32
    %c0_i32_0 = arith.constant 0 : i32
    %c0_i32_1 = arith.constant 0 : i32
    return %c0_i32, %c0_i32_0 : i32, i32
  }
}

</mosaic_0001>

<bundles_post_ra>
// kernel: conv_classifier_forward.1
= control target key start
LH: loop header
LB: loop body
LE: loop exit
PB: predicated region body
PF: predicated region fallthrough
CT: control target
= control target key end

     0   :  { %s3589_s26 = smov 17   ;;  %s3590_s27 = smov 16   ;;  %v6000_v6 = vmov 0   ;;  %v5999_v7 = vlaneseq  ;;  %v6021_v26 = vmov 0  ;;  %v6023_v32 = vmov 0  ;;  %s5921_s0 = inlined_call_operand.vmem [shape: f32[8,512], index: 0, kind: input, shape index: {}]   ;;  %s5922_s1 = inlined_call_operand.vmem [shape: bf16[8,72], index: 1, kind: input, shape index: {}]   ;;  %s5923_s3 = inlined_call_operand.vmem [shape: f32[8,1], index: 3, kind: input, shape index: {}]   ;;  %s5924_s2 = inlined_call_operand.vmem [shape: f32[8,1], index: 2, kind: input, shape index: {}]   ;;  %s5925_s4 = inlined_call_operand.vmem [shape: bf16[8,72], index: 4, kind: input, shape index: {}]   ;;  %s5926_s6 = inlined_call_operand.vmem [shape: f32[8,1], index: 6, kind: input, shape index: {}]   ;;  %s5927_s5 = inlined_call_operand.vmem [shape: f32[8,1], index: 5, kind: input, shape index: {}]   ;;  %s5928_s7 = inlined_call_operand.vmem [shape: bf16[16,200], index: 7, kind: input, shape index: {}]   ;;  %s5929_s16 = inlined_call_operand.vmem [shape: bf16[512,128], index: 16, kind: input, shape index: {}]   ;;  %s5930_s8 = inlined_call_operand.vmem [shape: f32[16,1], index: 8, kind: input, shape index: {}]   ;;  %s5931_s9 = inlined_call_operand.vmem [shape: f32[16,1], index: 9, kind: input, shape index: {}]   ;;  %s5932_s10 = inlined_call_operand.vmem [shape: bf16[16,144], index: 10, kind: input, shape index: {}]   ;;  %s5933_s11 = inlined_call_operand.vmem [shape: f32[16,1], index: 11, kind: input, shape index: {}]   ;;  %s5934_s12 = inlined_call_operand.vmem [shape: f32[16,1], index: 12, kind: input, shape index: {}]   ;;  %s5935_s13 = inlined_call_operand.vmem [shape: bf16[16,144], index: 13, kind: input, shape index: {}]   ;;  %s5936_s15 = inlined_call_operand.vmem [shape: f32[16,1], index: 15, kind: input, shape index: {}]   ;;  %s5937_s14 = inlined_call_operand.vmem [shape: f32[16,1], index: 14, kind: input, shape index: {}]   ;;  %s5938_s19 = inlined_call_operand.vmem [shape: f32[10,1], index: 19, kind: input, shape index: {}]   ;;  %s5939_s18 = inlined_call_operand.vmem [shape: bf16[128,2], index: 18, kind: input, shape index: {}]   ;;  %s5940_s17 = inlined_call_operand.vmem [shape: f32[16,10,128], index: 17, kind: input, shape index: {}]   ;;  %s5941_s20 = inlined_call_operand.vmem [shape: f32[10,2], index: 20, kind: output, shape index: {}]  }
   0x1   :  { %6015 = sst [smem:[#allocation3_spill]] %s5921_s0  ;;  %s3591_s28 = smov 1   ;;  %464 = vmatprep.mubr.bf16.mxu1 %v6000_v6  ;;  %3127 = vset.pattern.permute.xlu0 %v6000_v6  ;;  %v6025_v36 = vmov 0  ;;  %v6027_v41 = vmov 0  ;;  %v6031_v48 = vmov 0  ;;  %v6033_v56 = vmov 0 }
   0x2   :  { %6016 = sst [smem:[#allocation4_spill]] %s5922_s1  ;;  %s6020_s23 = sld [smem:[#allocation3_spill]]  ;;  %3128 = vset.pattern.permute.xlu1 %v6000_v6  ;;  %759 = vmatprep.mubr.bf16.mxu0 %v6000_v6  ;;  %v3797_v8 = vand.u32 127, %v5999_v7  ;;  %v6035_v62 = vmov 0 }
   0x3   :  { %6017 = sst [smem:[#allocation5_spill]] %s5923_s3  ;;  %s3593_s0 = smov 127  }
   0x4   :  { %6018 = sst [smem:[#allocation6_spill]] %s5924_s2  ;;  %s3594_s21 = smov 112   ;;  %v68_v9 = vadd.s32 128, %v3797_v8  ;;  %v71_v11 = vshra.s32 %v3797_v8, 4  ;;  %v3808_v15 = vand.u32 15, %v3797_v8  ;;  %vm5947_vm5 = vcmp.lt.s32.totalorder %v3797_v8, 17 }
   0x5   :  { %6019 = sst [smem:[#allocation7_spill]] %s5925_s4  ;;  %s3592_s4 = smov 15   ;;  %vm5948_vm6 = vcmp.lt.s32.totalorder %v3797_v8, 16  ;;  %vm5946_vm9 = vcmp.lt.s32.totalorder %v3797_v8, 1  ;;  %vm5945_vm13 = vcmp.lt.s32.totalorder %v3797_v8, 15  ;;  %v70_v52 = vadd.s32 384, %v3797_v8 }
   0x6   :  { %s3595_s1 = smov 113   ;;  %s3597_s22 = smov 111   ;;  %v72_v10 = vshra.s32 %v68_v9, 4  ;;  %v3803_v13 = vand.u32 15, %v68_v9  ;;  %v3805_v14 = vand.u32 15, %v71_v11  ;;  %vm5955_vm2 = vcmp.ge.s32.totalorder %v3808_v15, 1 }
   0x7   :  { %vm5954_vm11 = vcmp.lt.s32.totalorder %v3808_v15, 15  ;;  %v69_v57 = vadd.s32 256, %v3797_v8  ;;  %v74_v9 = vshra.s32 %v70_v52, 4  ;;  %s6066_s3 = sld [smem:[#allocation4_spill]]  ;;  %s6116_s29 = sld [smem:[#allocation5_spill]] }
   0x8   :  { %v3731_v0 = vld [vmem:[%s6020_s23 + $0x18] sm:$0xff]  ;;  %v3736_v1 = vld [vmem:[%s6020_s23] sm:$0xff]  ;;  %v3741_v2 = vld [vmem:[%s6020_s23 + $0x8] sm:$0xff]  ;;  %v3801_v12 = vand.u32 15, %v72_v10  ;;  %vm5953_vm0 = vcmp.ge.s32.totalorder %v3803_v13, 1  ;;  %vm5943_vm3 = vcmp.ge.s32.totalorder %v3805_v14, 1 }
   0x9   :  { %200 = vrot.lane.b32.xlu1 %v3731_v0, %s3589_s26  ;;  %v3087_v3 = vpack.i.bf16 %v3741_v2, %v3736_v1  ;;  %v3756_v4 = vld [vmem:[%s6020_s23 + $0x10] sm:$0xff]  ;;  %vm127_vm7 = vmand %vm5943_vm3, %vm5955_vm2  ;;  %vm5949_vm8 = vcmp.lt.s32.totalorder %v3803_v13, 15  ;;  %s6117_s24 = sld [smem:[#allocation6_spill]]  ;;  %s6160_s2 = sld [smem:[#allocation7_spill]] }
   0xa   :  { %v3107_v5 = vpack.i.bf16 %v3756_v4, %v3741_v2  ;;  %vm5944_vm1 = vcmp.ge.s32.totalorder %v3801_v12, 1  ;;  %vm3865_vm12 = vmpackc.low %vm5943_vm3, %vm127_vm7  ;;  %s3602_s25 = smov 31   ;;  %s3605_s30 = smov 14  }
   0xb   :  { %3088 = vrot.lane.b32.xlu0 %v3087_v3, %s3589_s26  ;;  %vm128_vm4 = vmand %vm5944_vm1, %vm5953_vm0  ;;  %v6024_v32 = vsel %vm3865_vm12, 4294967295, %v6023_v32  ;;  %s3606_s23 = smov 2  }
   0xc   :  { %vm3846_vm10 = vmpackc.low %vm5944_vm1, %vm128_vm4 }
   0xd   :  { %225 = vrot.lane.b32.xlu1 %v3731_v0, %s3590_s27  ;;  %v6022_v26 = vsel %vm3846_vm10, 4294967295, %v6021_v26  ;;  %vm3876_vm14 = vmand %vm5944_vm1, %vm5949_vm8  ;;  %vm5961_vm1 = vcmp.lt.s32.totalorder %v3801_v12, 15 }
   0xe   :  { %v6026_v36 = vsel %vm3876_vm14, 4294967295, %v6025_v36  ;;  %vm3894_vm15 = vmand %vm5943_vm3, %vm5954_vm11  ;;  %vm5950_vm3 = vcmp.lt.s32.totalorder %v3797_v8, 127 }
   0xf   :  { %3093 = vrot.lane.b32.xlu0 %v3087_v3, %s3590_s27  ;;  %v6028_v41 = vsel %vm3894_vm15, 4294967295, %v6027_v41  ;;  %vm3911_vm4 = vmpackc.low %vm5953_vm0, %vm3876_vm14 }
  0x10   :  { %vm3924_vm7 = vmpackc.low %vm5955_vm2, %vm3894_vm15  ;;  %vm6046_vm15 = vcmp.lt.s32.totalorder %v3805_v14, 15 }
  0x11   :  { %3103 = vrot.lane.b32.xlu1 %v3087_v3, %s3591_s28  ;;  %v6032_v48 = vsel %vm3924_vm7, 4294967295, %v6031_v48 }
  0x13   :  { %3098 = vrot.lane.b32.xlu0 %v3087_v3, %s3592_s4 }
  0x15   :  { %275 = vrot.lane.b32.xlu1 %v3731_v0, %s3591_s28 }
  0x17   :  { %250 = vrot.lane.b32.xlu0 %v3731_v0, %s3592_s4 }
  0x19   :  { %294 = vrot.lane.b32.xlu1 %v3736_v1, %s3593_s0 }
  0x1b   :  { %3108 = vrot.lane.b32.xlu0 %v3107_v5, %s3593_s0 }
  0x1d   :  { %3118 = vrot.lane.b32.xlu1 %v3107_v5, %s3594_s21 }
  0x1f   :  { %3113 = vrot.lane.b32.xlu0 %v3107_v5, %s3595_s1 }
  0x21   :  { %344 = vrot.lane.b32.xlu1 %v3736_v1, %s3594_s21 }
  0x23   :  { %319 = vrot.lane.b32.xlu0 %v3736_v1, %s3595_s1 }
  0x25   :  { %373 = vrot.lane.b32.xlu1 %v3756_v4, %s3597_s22 }
  0x27   :  { %3123 = vrot.lane.b32.xlu0 %v3087_v3, %s3597_s22 }
  0x29   :  { %223 = vrot.lane.b32.xlu1 %v3756_v4, %s3590_s27 }
  0x2b   :  { %198 = vrot.lane.b32.xlu0 %v3756_v4, %s3589_s26 }
  0x2d   :  { %273 = vrot.lane.b32.xlu1 %v3756_v4, %s3591_s28 }
  0x2f   :  { %248 = vrot.lane.b32.xlu0 %v3756_v4, %s3592_s4 }
  0x31   :  { %325 = vrot.lane.b32.xlu1 %v3731_v0, %s3595_s1 }
  0x33   :  { %300 = vrot.lane.b32.xlu0 %v3731_v0, %s3593_s0 }
  0x35   :  { %375 = vrot.lane.b32.xlu1 %v3731_v0, %s3597_s22 }
  0x37   :  { %350 = vrot.lane.b32.xlu0 %v3731_v0, %s3594_s21 }
  0x7b   :  { %v3810_v16 = vpop.permute.xlu1 %200 }
  0x7d   :  { %v3812_v17 = vpop.permute.xlu0 %3088 }
  0x7e   :  { %v3091_v18 = vunpack.i.h.bf16 %v3812_v17  ;;  %v3090_v19 = vunpack.i.l.bf16 %v3812_v17  ;;  %v414_v17 = vld [vmem:[%s6066_s3] sm:$0xf]  ;;  %s3601_s3 = smov 32  }
  0x7f   :  { %v3820_v20 = vpop.permute.xlu1 %225 }
  0x80   :  { %v205_v25 = vsel %vm5947_vm5, %v3090_v19, %v3091_v18  ;;  %v206_v27 = vsel %vm5947_vm5, %v3810_v16, %v3090_v19 }
  0x81   :  { %v3827_v21 = vpop.permute.xlu0 %3093 }
  0x82   :  { %v3096_v22 = vunpack.i.h.bf16 %v3827_v21  ;;  %v3095_v23 = vunpack.i.l.bf16 %v3827_v21  ;;  %v6074_v21 = vmov 0 }
  0x83   :  { %v3838_v24 = vpop.permute.xlu1 %3103 }
  0x84   :  { %v3106_v28 = vunpack.i.h.bf16 %v3838_v24  ;;  %v3105_v29 = vunpack.i.l.bf16 %v3838_v24  ;;  %v230_v30 = vsel %vm5948_vm6, %v3095_v23, %v3096_v22  ;;  %v231_v31 = vsel %vm5948_vm6, %v3820_v20, %v3095_v23 }
  0x85   :  { %v3870_v33 = vpop.permute.xlu0 %3098  ;;  %v2603_v34 = vpack.c.bf16 %v230_v30, %v205_v25  ;;  %v2606_v35 = vpack.c.bf16 %v231_v31, %v206_v27  ;;  %vm5957_vm6 = vcmp.lt.s32.totalorder %v3797_v8, 113  ;;  %v6038_v27 = vmov 0 }
  0x86   :  { %v280_v37 = vsel %vm5946_vm9, %v3105_v29, %v3106_v28  ;;  %v3101_v38 = vunpack.i.h.bf16 %v3870_v33  ;;  %v3100_v39 = vunpack.i.l.bf16 %v3870_v33  ;;  %v4009_v31 = vand.u32 15, %v74_v9 }
  0x87   :  { %v3886_v40 = vpop.permute.xlu1 %275  ;;  %2604 = vmatprep.subr.msk.bf16.mxu1 %vm3846_vm10, %v2603_v34  ;;  %v4011_v34 = vand.u32 15, %v70_v52  ;;  %v6083_v33 = vmov 0 }
  0x88   :  { %v255_v42 = vsel %vm5945_vm13, %v3100_v39, %v3101_v38  ;;  %v281_v43 = vsel %vm5946_vm9, %v3886_v40, %v3105_v29  ;;  %2607 = vmatpush1.bf16.msk.msra.mxu1 %vm3865_vm12, %v2606_v35  ;;  %vm5951_vm9 = vmmov 1  }
  0x89   :  { %v3915_v45 = vpop.permute.xlu0 %250  ;;  %v2609_v46 = vpack.c.bf16 %v280_v37, %v255_v42  ;;  %vm3947_vm5 = vmpackc.low %vm5949_vm8, %vm5951_vm9  ;;  %v6040_v37 = vmov 0 }
  0x8a   :  { %v256_v47 = vsel %vm5945_vm13, %v3915_v45, %v3100_v39  ;;  %vm5956_vm13 = vcmp.lt.s32.totalorder %v3797_v8, 112  ;;  %v6034_v56 = vsel %vm3947_vm5, 4294967295, %v6033_v56  ;;  %vm3965_vm8 = vmpackc.low %vm5954_vm11, %vm5951_vm9  ;;  %vm6037_vm9 = vcmp.lt.s32.totalorder %v3805_v14, 15 }
  0x8b   :  { %v2612_v49 = vpack.c.bf16 %v281_v43, %v256_v47  ;;  %v3928_v50 = vpop.permute.xlu1 %294  ;;  %2610 = vmatprep.subr.msk.bf16.mxu1 %vm3911_vm4, %v2609_v46  ;;  %v6036_v62 = vsel %vm3965_vm8, 4294967295, %v6035_v62  ;;  %v4028_v46 = vand.u32 15, %v69_v57 }
  0x8d   :  { %v3933_v51 = vpop.permute.xlu0 %3108  ;;  %2613 = vmatpush1.bf16.msk.msra.mxu1 %vm3924_vm7, %v2612_v49  ;;  %v6043_v49 = vmov 0 }
  0x8e   :  { %v3111_v53 = vunpack.i.h.bf16 %v3933_v51  ;;  %v3110_v54 = vunpack.i.l.bf16 %v3933_v51  ;;  %v6098_v51 = vmov 0 }
  0x8f   :  { %v3942_v55 = vpop.permute.xlu1 %3118 }
  0x90   :  { %v304_v58 = vsel %vm5950_vm3, %v3110_v54, %v3111_v53  ;;  %v305_v59 = vsel %vm5950_vm3, %v3928_v50, %v3110_v54  ;;  %v3121_v60 = vunpack.i.h.bf16 %v3942_v55  ;;  %v3120_v61 = vunpack.i.l.bf16 %v3942_v55  ;;  %vm148_vm3 = vmand %vm5961_vm1, %vm5953_vm0 }
  0x91   :  { %v3970_v63 = vpop.permute.xlu0 %3113  ;;  %v2615_v3 = vpack.c.bf16 %v304_v58, %v3741_v2  ;;  %v2618_v5 = vpack.c.bf16 %v305_v59, %v3736_v1  ;;  %vm147_vm0 = vmand %vm6037_vm9, %vm5955_vm2  ;;  %v73_v1 = vshra.s32 %v69_v57, 4  ;;  %v6047_v57 = vmov 0 }
  0x92   :  { %v354_v10 = vsel %vm5956_vm13, %v3120_v61, %v3121_v60  ;;  %v3116_v11 = vunpack.i.h.bf16 %v3970_v63  ;;  %v3115_v19 = vunpack.i.l.bf16 %v3970_v63  ;;  %vm4003_vm11 = vmpackc.low %vm5961_vm1, %vm148_vm3  ;;  %vm6045_vm3 = vcmp.lt.s32.totalorder %v3808_v15, 15 }
  0x93   :  { %v3984_v23 = vpop.permute.xlu1 %344  ;;  %2616 = vmatprep.subr.msk.bf16.mxu1 %vm3947_vm5, %v2615_v3  ;;  %v6039_v27 = vsel %vm4003_vm11, 4294967295, %v6038_v27  ;;  %vm4018_vm2 = vmpackc.low %vm6037_vm9, %vm147_vm0  ;;  %v4026_v43 = vand.u32 15, %v73_v1  ;;  %vm6042_vm0 = vcmp.lt.s32.totalorder %v3803_v13, 15  ;;  %v6111_v55 = vmov 0 }
  0x94   :  { %v329_v2 = vsel %vm5957_vm6, %v3115_v19, %v3116_v11  ;;  %v355_v25 = vsel %vm5956_vm13, %v3984_v23, %v3120_v61  ;;  %2619 = vmatpush1.bf16.msk.msra.mxu1 %vm3965_vm8, %v2618_v5  ;;  %v6041_v37 = vsel %vm4018_vm2, 4294967295, %v6040_v37  ;;  %vm4039_vm9 = vmand %vm5961_vm1, %vm6042_vm0  ;;  %vm6053_vm1 = vcmp.lt.s32.totalorder %v3797_v8, 16 }
  0x95   :  { %v4007_v29 = vpop.permute.xlu0 %319  ;;  %v2621_v30 = vpack.c.bf16 %v354_v10, %v329_v2  ;;  %v6044_v49 = vsel %vm4039_vm9, 4294967295, %v6043_v49  ;;  %vm4051_vm14 = vmand %vm6046_vm15, %vm6045_vm3  ;;  %vm6052_vm15 = vcmp.ge.s32.totalorder %v4009_v31, 1 }
  0x96   :  { %v330_v35 = vsel %vm5957_vm6, %v4007_v29, %v3115_v19  ;;  %v6048_v57 = vsel %vm4051_vm14, 4294967295, %v6047_v57  ;;  %vm6049_vm6 = vcmp.lt.s32.totalorder %v3797_v8, 111 }
  0x97   :  { %v2624_v39 = vpack.c.bf16 %v355_v25, %v330_v35  ;;  %v4022_v42 = vpop.permute.xlu1 %373  ;;  %2622 = vmatprep.subr.msk.bf16.mxu1 %vm4003_vm11, %v2621_v30  ;;  %vm6050_vm13 = vmmov %vm6049_vm6  ;;  %v6058_v35 = vmov 0 }
  0x99   :  { %v4031_v47 = vpop.permute.xlu0 %3123  ;;  %2625 = vmatpush1.bf16.msk.msra.mxu1 %vm4018_vm2, %v2624_v39  ;;  %vm6051_vm2 = vcmp.ge.s32.totalorder %v4011_v34, 1  ;;  %v6064_v39 = vmov 0 }
  0x9a   :  { %v3126_v52 = vunpack.i.h.bf16 %v4031_v47  ;;  %v3125_v54 = vunpack.i.l.bf16 %v4031_v47  ;;  %vm130_vm3 = vmand %vm6052_vm15, %vm6051_vm2  ;;  %vm6055_vm2 = vcmp.ge.s32.totalorder %v4028_v46, 1  ;;  %vm6056_vm15 = vcmp.ge.s32.totalorder %v4026_v43, 1 }
  0x9b   :  { %v224_v58 = vpop.permute.xlu1 %223  ;;  %vm129_vm0 = vmand %vm6056_vm15, %vm6055_vm2  ;;  %vm6062_vm2 = vcmp.lt.s32.totalorder %v4011_v34, 15 }
  0x9c   :  { %v379_v59 = vsel %vm6049_vm6, %v3126_v52, %v4022_v42  ;;  %v380_v61 = vsel %vm6050_vm13, %v3125_v54, %v3126_v52  ;;  %v228_v10 = vsel %vm6053_vm1, %v224_v58, %v3820_v20  ;;  %vm6054_vm13 = vcmp.lt.s32.totalorder %v3797_v8, 17 }
  0x9d   :  { %v199_v3 = vpop.permute.xlu0 %198  ;;  %v391_v5 = vsel %vm4039_vm9, %v379_v59, 0.0  ;;  %v390_v9 = vsel %vm4051_vm14, %v380_v61, 0.0  ;;  %vm6057_vm9 = vcmp.ge.s32.totalorder %v4009_v31, 1  ;;  %vm5975_vm1 = vcmp.lt.s32.totalorder %v4028_v46, 15 }
  0x9e   :  { %v203_v19 = vsel %vm6054_vm13, %v199_v3, %v3810_v16  ;;  %v411_v1 = vpack.c.bf16 %v391_v5, %v391_v5  ;;  %v410_v2 = vpack.c.bf16 %v390_v9, %v390_v9  ;;  %vm4085_vm6 = vmpackc.low %vm6057_vm9, %vm130_vm3  ;;  %v204_v16 = vsel %vm6054_vm13, %v3091_v18, %v199_v3 }
  0x9f   :  { %v2629_v25 = vpack.c.bf16 %v228_v10, %v203_v19  ;;  %v274_v30 = vpop.permute.xlu1 %273  ;;  %v6059_v35 = vsel %vm4085_vm6, 4294967295, %v6058_v35  ;;  %vm6060_vm14 = vcmask 1043456   ;;  %vm6063_vm15 = vmmov %vm6057_vm9  ;;  %vm5973_vm9 = vcmask 588800  }
  0xa0   :  { %2626 = vmatprep.subr.msk.bf16.mxu1 %vm6060_vm14, %v411_v1  ;;  %vm6061_vm11 = vmmov %vm6060_vm14  ;;  %vm6067_vm3 = vcmp.ge.s32.totalorder %v4026_v43, 1  ;;  %v6068_v18 = vmov 0  ;;  %vm6070_vm13 = vcmp.lt.s32.totalorder %v3797_v8, 16  ;;  %v6079_v9 = vmov 0 }
  0xa1   :  { %v421_v20 = vsel %vm6061_vm11, %v410_v2, 0  ;;  %vm4100_vm8 = vmand %vm6063_vm15, %vm6062_vm2  ;;  %v249_v52 = vpop.permute.xlu0 %248  ;;  %vm5974_vm11 = vcmp.lt.s32.totalorder %v4026_v43, 15  ;;  %v229_v59 = vsel %vm6070_vm13, %v3096_v22, %v224_v58  ;;  %vm6071_vm2 = vcmp.lt.s32.totalorder %v3797_v8, 1 }
  0xa2   :  { %v6065_v39 = vsel %vm4100_vm8, 4294967295, %v6064_v39  ;;  %441 = vmatpush1.bf16.msra.mxu1 %v421_v20  ;;  %vm4109_vm14 = vmpackc.low %vm6067_vm3, %vm129_vm0  ;;  %v278_v61 = vsel %vm6071_vm2, %v274_v30, %v3886_v40  ;;  %vm6072_vm15 = vcmp.lt.s32.totalorder %v3797_v8, 15  ;;  %v2632_v22 = vpack.c.bf16 %v229_v59, %v204_v16 }
  0xa3   :  { %v6069_v18 = vsel %vm4109_vm14, 4294967295, %v6068_v18  ;;  %v253_v3 = vsel %vm6072_vm15, %v249_v52, %v3915_v45  ;;  %2630 = vmatprep.subr.msk.bf16.mxu1 %vm4085_vm6, %v2629_v25  ;;  %vm6073_vm0 = vmmov %vm6067_vm3  ;;  %v326_v5 = vpop.permute.xlu1 %325  ;;  %vm6076_vm13 = vcmp.ge.s32.totalorder %v4011_v34, 1  ;;  %v6077_v40 = vmov 0 }
  0xa4   :  { %vm4130_vm3 = vmand %vm6073_vm0, %vm5975_vm1  ;;  %v2635_v58 = vpack.c.bf16 %v278_v61, %v253_v3  ;;  %v254_v45 = vsel %vm6072_vm15, %v3101_v38, %v249_v52  ;;  %vm6082_vm15 = vcmp.ge.s32.totalorder %v4028_v46, 1  ;;  %v6089_v1 = vmov 0 }
  0xa5   :  { %v6075_v21 = vsel %vm4130_vm3, 4294967295, %v6074_v21  ;;  %vm4138_vm2 = vmpackc.low %vm6076_vm13, %vm4100_vm8  ;;  %2627 = vmatmul.mubr.msk.bf16.vlgmr.msra.gmra.mrb[0].mxu1 %vm5973_vm9, %v414_v17  ;;  %v301_v10 = vpop.permute.xlu0 %300  ;;  %vm6085_vm9 = vcmp.lt.s32.totalorder %v3797_v8, 1 }
  0xa6   :  { %v6078_v40 = vsel %vm4138_vm2, 4294967295, %v6077_v40  ;;  %vm4151_vm0 = vmand %vm5974_vm11, %vm5975_vm1  ;;  %2633 = vmatpush1.bf16.msk.msra.mxu1 %vm4109_vm14, %v2632_v22  ;;  %505 = vmatprep.mubr.bf16.mxu1 %v6000_v6  ;;  %v279_v38 = vsel %vm6085_vm9, %v3106_v28, %v274_v30  ;;  %vm6086_vm11 = vcmp.lt.s32.totalorder %v3797_v8, 127  ;;  %vm6087_vm1 = vmmov 1  }
  0xa7   :  { %v6080_v9 = vsel %vm4151_vm0, 4294967295, %v6079_v9  ;;  %vm4162_vm8 = vmpackc.low %vm6082_vm15, %vm4130_vm3  ;;  %v306_v19 = vsel %vm6086_vm11, %v301_v10, %v3928_v50  ;;  %2636 = vmatprep.subr.msk.bf16.mxu1 %vm4138_vm2, %v2635_v58  ;;  %vm6088_vm15 = vcmp.lt.s32.totalorder %v4011_v34, 15  ;;  %v2638_v2 = vpack.c.bf16 %v279_v38, %v254_v45  ;;  %v376_v25 = vpop.permute.xlu1 %375 }
  0xa8   :  { %6081 = vst [vmem:[#allocation2_spill] sm:$0xff] %v6080_v9  ;;  %v6084_v33 = vsel %vm4162_vm8, 4294967295, %v6083_v33  ;;  %vm4179_vm13 = vmpackc.low %vm6088_vm15, %vm6087_vm1  ;;  %v2641_v24 = vpack.c.bf16 %v306_v19, %v3731_v0  ;;  %vm6091_vm9 = vcmp.ge.s32.totalorder %v4011_v34, 1  ;;  %vm6092_vm3 = vcmp.lt.s32.totalorder %v4009_v31, 15 }
  0xa9   :  { %v6090_v1 = vsel %vm4179_vm13, 4294967295, %v6089_v1  ;;  %vm150_vm5 = vmand %vm6092_vm3, %vm6091_vm9  ;;  %v303_v28 = vsel %vm6086_vm11, %v3111_v53, %v301_v10  ;;  %v6095_v50 = vmov 0  ;;  %v351_v0 = vpop.permute.xlu0 %350  ;;  %vm6100_vm11 = vcmp.lt.s32.totalorder %v3797_v8, 113 }
  0xaa   :  { %vm6093_vm2 = vmmov %vm6088_vm15  ;;  %2639 = vmatpush1.bf16.msk.msra.mxu1 %vm4162_vm8, %v2638_v2  ;;  %v331_v53 = vsel %vm6100_vm11, %v326_v5, %v4007_v29  ;;  %vm6103_vm8 = vcmp.lt.s32.totalorder %v3797_v8, 112  ;;  %v6105_v29 = vmov 0  ;;  %vm6107_vm11 = vcmp.ge.s32.totalorder %v4028_v46, 1 }
  0xab   :  { %vm6094_vm15 = vmmov %vm6092_vm3  ;;  %vm6097_vm3 = vcmp.lt.s32.totalorder %v4028_v46, 15  ;;  %v356_v20 = vsel %vm6103_vm8, %v351_v0, %v3984_v23  ;;  %2642 = vmatprep.subr.msk.bf16.mxu1 %vm4179_vm13, %v2641_v24  ;;  %v353_v23 = vsel %vm6103_vm8, %v3121_v60, %v351_v0 }
  0xac   :  { %vm4196_vm7 = vmand %vm6094_vm15, %vm6093_vm2  ;;  %vm6101_vm2 = vcmp.lt.s32.totalorder %v3797_v8, 111  ;;  %v2647_v52 = vpack.c.bf16 %v356_v20, %v331_v53  ;;  %v549_v20 = vld [vmem:[%s6116_s29] sm:$0xff]  ;;  %s3604_s29 = smov 18  }
  0xad   :  { %v6096_v50 = vsel %vm4196_vm7, 4294967295, %v6095_v50  ;;  %vm4205_vm9 = vmpackc.low %vm6097_vm3, %vm6087_vm1  ;;  %v378_v30 = vsel %vm6101_vm2, %v4022_v42, %v376_v25  ;;  %vm6104_vm1 = vcmp.lt.s32.totalorder %v4009_v31, 15  ;;  %v2644_v42 = vpack.c.bf16 %v303_v28, %v3756_v4 }
  0xae   :  { %v6099_v51 = vsel %vm4205_vm9, 4294967295, %v6098_v51  ;;  %vm6102_vm15 = vmmov %vm6101_vm2  ;;  %vm6108_vm2 = vcmp.lt.s32.totalorder %v4026_v43, 15  ;;  %v392_v47 = vsel %vm4151_vm0, %v378_v30, 0.0 }
  0xaf   :  { %v381_v16 = vsel %vm6102_vm15, %v376_v25, %v3125_v54  ;;  %vm4226_vm3 = vmpackc.low %vm6104_vm1, %vm150_vm5  ;;  %2645 = vmatpush1.bf16.msk.msra.mxu1 %vm4205_vm9, %v2644_v42  ;;  %vm6109_vm5 = vcmp.lt.s32.totalorder %v3797_v8, 113  ;;  %v412_v59 = vpack.c.bf16 %v392_v47, %v392_v47 }
  0xb0   :  { %v6106_v29 = vsel %vm4226_vm3, 4294967295, %v6105_v29  ;;  %vm149_vm15 = vmand %vm6108_vm2, %vm6107_vm11  ;;  %v393_v54 = vsel %vm4196_vm7, %v381_v16, 0.0  ;;  %v328_v4 = vsel %vm6109_vm5, %v3116_v11, %v326_v5  ;;  %2648 = vmatprep.subr.msk.bf16.mxu1 %vm4226_vm3, %v2647_v52  ;;  %vm6115_vm5 = vcmask 588800  }
  0xb1   :  { %vm6110_vm1 = vmmov %vm6108_vm2  ;;  %v2650_v60 = vpack.c.bf16 %v353_v23, %v328_v4  ;;  %v413_v61 = vpack.c.bf16 %v393_v54, %v393_v54  ;;  %vm6113_vm2 = vcmask 1043456  }
  0xb2   :  { %vm4253_vm11 = vmpackc.low %vm6110_vm1, %vm149_vm15  ;;  %vm6118_vm15 = vcmp.lt.s32.totalorder %v3797_v8, 17  ;;  %vm6119_vm1 = vcmp.lt.s32.totalorder %v3797_v8, 16 }
  0xb3   :  { %v6112_v55 = vsel %vm4253_vm11, 4294967295, %v6111_v55  ;;  %2651 = vmatpush1.bf16.msk.msra.mxu1 %vm4253_vm11, %v2650_v60  ;;  %vm6114_vm8 = vmmov %vm6113_vm2 }
  0xb4   :  { %2652 = vmatprep.subr.msk.bf16.mxu1 %vm6113_vm2, %v413_v61  ;;  %v427_v63 = vsel %vm6114_vm8, %v412_v59, 0  ;;  %vm6120_vm2 = vmmov %vm6118_vm15 }
  0xb5   :  { %vm6121_vm8 = vmmov %vm6119_vm1 }
  0xb7   :  { %482 = vmatpush1.bf16.msra.mxu1 %v427_v63 }
  0xba   :  { %2653 = vmatmul.mubr.msk.bf16.vlgmr.msra.gmra.mrb[4].mxu1 %vm6115_vm5, %v414_v17  ;;  %vm6122_vm5 = vmmov %vm6120_vm2 }
  0xbb   :  { %800 = vmatprep.mubr.bf16.mxu1 %v6000_v6 }
 0x178   :  { %v466_v11 = vpop.f32.mrb[0].mxu1 }
 0x179   :  { %v520_v3 = vmul.f32 %v466_v11, %v466_v11  ;;  %v468_v22 = vpop.f32.mrb[1].mxu1 }
 0x17a   :  { %v514_v58 = vadd.f32 %v468_v22, %v466_v11  ;;  %v521_v5 = vmul.f32 %v468_v22, %v468_v22  ;;  %v470_v45 = vpop.f32.mrb[2].mxu1 }
 0x17b   :  { %v471_v10 = vpop.f32.mrb[3].mxu1 }
 0x17c   :  { %v524_v38 = vadd.f32 %v521_v5, %v520_v3 }
 0x18d   :  { %v507_v19 = vpop.f32.mrb[4].mxu1 }
 0x18e   :  { %v522_v2 = vmul.f32 %v507_v19, %v507_v19  ;;  %v509_v24 = vpop.f32.mrb[5].mxu1  ;;  %v515_v25 = vadd.f32 %v514_v58, %v507_v19  ;;  %v534_v58 = vld [vmem:[%s6117_s24] sm:$0xff]  ;;  %s3610_s24 = smov 98  }
 0x18f   :  { %v511_v28 = vpop.f32.mrb[6].mxu1  ;;  %v523_v0 = vmul.f32 %v509_v24, %v509_v24 }
 0x190   :  { %v512_v53 = vpop.f32.mrb[7].mxu1  ;;  %v516_v30 = vadd.f32 %v515_v25, %v509_v24  ;;  %v525_v16 = vadd.f32 %v524_v38, %v522_v2 }
 0x192   :  { %517 = vadd.xlane.f32.xlu0 %v516_v30  ;;  %v526_v17 = vadd.f32 %v525_v16, %v523_v0 }
 0x194   :  { %527 = vadd.xlane.f32.xlu1 %v526_v17 }
 0x1a5   :  { %552 = vperm.xlu1 %3128, %v549_v20  }
 0x21f   :  { %v518_v42 = vpop.xlane.xlu0 %517 }
 0x220   :  { %v519_v52 = vmul.f32 0.001953125, %v518_v42 }
 0x221   :  { %v528_v23 = vpop.xlane.xlu1 %527 }
 0x222   :  { %v529_v47 = vmul.f32 0.001953125, %v528_v23  ;;  %v530_v54 = vmul.f32 %v519_v52, %v519_v52  ;;  %v536_v4 = vsub.f32 %v466_v11, %v519_v52  ;;  %v537_v60 = vsub.f32 %v468_v22, %v519_v52 }
 0x223   :  { %v538_v59 = vsub.f32 %v507_v19, %v519_v52  ;;  %v539_v61 = vsub.f32 %v509_v24, %v519_v52 }
 0x224   :  { %v531_v63 = vsub.f32 %v529_v47, %v530_v54 }
 0x225   :  { %v553_v38 = vpop.permute.xlu1 %552 }
 0x226   :  { %v532_v3 = vadd.f32 1e-05, %v531_v63 }
 0x228   :  { %3573 = vrsqrt.f32 %v532_v3 }
 0x232   :  { %v3574_v5 = vpop.eup %3573 }
 0x233   :  { %v535_v45 = vmul.f32 %v3574_v5, %v534_v58 }
 0x235   :  { %542 = vperm.xlu0 %3127, %v535_v45  }
 0x2b4   :  { %v543_v10 = vpop.permute.xlu0 %542 }
 0x2b5   :  { %v545_v2 = vmul.f32 %v543_v10, %v536_v4  ;;  %v546_v25 = vmul.f32 %v543_v10, %v537_v60  ;;  %v547_v28 = vmul.f32 %v543_v10, %v538_v59  ;;  %v548_v0 = vmul.f32 %v543_v10, %v539_v61 }
 0x2b7   :  { %v555_v11 = vadd.f32 %v553_v38, %v545_v2  ;;  %v556_v22 = vadd.f32 %v553_v38, %v546_v25  ;;  %v557_v19 = vadd.f32 %v553_v38, %v547_v28  ;;  %v558_v24 = vadd.f32 %v553_v38, %v548_v0 }
 0x2b9   :  { %v4269_v53 = vmax.f32 %v555_v11, 0.0  ;;  %v4271_v30 = vmax.f32 %v556_v22, 0.0  ;;  %v4273_v16 = vmax.f32 %v557_v19, 0.0  ;;  %v4275_v17 = vmax.f32 %v558_v24, 0.0 }
 0x2bb   :  { %v3159_v20 = vpack.i.bf16 %v4273_v16, %v4275_v17  ;;  %v3129_v42 = vpack.i.bf16 %v4271_v30, %v4269_v53  ;;  %v3169_v52 = vpack.i.bf16 %v4273_v16, %v4271_v30  ;;  %v3189_v23 = vpack.i.bf16 %v4275_v17, %v4269_v53 }
 0x2bd   :  { %3160 = vrot.lane.b32.xlu0 %v3159_v20, %s3592_s4  ;;  %3130 = vrot.lane.b32.xlu1 %v3129_v42, %s3589_s26 }
 0x2c1   :  { %3170 = vrot.lane.b32.xlu0 %v3169_v52, %s3593_s0  ;;  %3135 = vrot.lane.b32.xlu1 %v3129_v42, %s3590_s27 }
 0x2c5   :  { %3180 = vrot.lane.b32.xlu0 %v3169_v52, %s3595_s1  ;;  %3140 = vrot.lane.b32.xlu1 %v3159_v20, %s3589_s26 }
 0x2c9   :  { %3190 = vrot.lane.b32.xlu0 %v3189_v23, %s3595_s1  ;;  %3145 = vrot.lane.b32.xlu1 %v3159_v20, %s3590_s27 }
 0x2cd   :  { %3200 = vrot.lane.b32.xlu0 %v3129_v42, %s3597_s22  ;;  %3150 = vrot.lane.b32.xlu1 %v3129_v42, %s3592_s4 }
 0x2d1   :  { %681 = vrot.lane.b32.xlu0 %v4275_v17, %s3597_s22  ;;  %3155 = vrot.lane.b32.xlu1 %v3129_v42, %s3591_s28 }
 0x2d5   :  { %3165 = vrot.lane.b32.xlu1 %v3159_v20, %s3591_s28 }
 0x2d9   :  { %3175 = vrot.lane.b32.xlu1 %v3189_v23, %s3593_s0 }
 0x2dd   :  { %3185 = vrot.lane.b32.xlu1 %v3169_v52, %s3594_s21 }
 0x2e1   :  { %3195 = vrot.lane.b32.xlu1 %v3189_v23, %s3594_s21 }
 0x2e5   :  { %679 = vrot.lane.b32.xlu1 %v4273_v16, %s3597_s22 }
 0x32f   :  { %v3131_v47 = vpop.permute.xlu1 %3130  ;;  %v3161_v54 = vpop.permute.xlu0 %3160 }
 0x330   :  { %v3133_v4 = vunpack.i.h.bf16 %v3131_v47  ;;  %v3132_v60 = vunpack.i.l.bf16 %v3131_v47 }
 0x332   :  { %v573_v3 = vsel %vm6118_vm15, %v3132_v60, %v3133_v4  ;;  %vm6123_vm15 = vmmov %vm6119_vm1 }
 0x333   :  { %v3136_v59 = vpop.permute.xlu1 %3135  ;;  %v3171_v10 = vpop.permute.xlu0 %3170 }
 0x334   :  { %v3138_v61 = vunpack.i.h.bf16 %v3136_v59  ;;  %v3137_v63 = vunpack.i.l.bf16 %v3136_v59 }
 0x336   :  { %v589_v58 = vsel %vm6119_vm1, %v3137_v63, %v3138_v61 }
 0x337   :  { %v3141_v5 = vpop.permute.xlu1 %3140  ;;  %v2655_v45 = vpack.c.bf16 %v589_v58, %v573_v3  ;;  %v4310_v11 = vpop.permute.xlu0 %3180 }
 0x338   :  { %v3143_v38 = vunpack.i.h.bf16 %v3141_v5  ;;  %v3142_v2 = vunpack.i.l.bf16 %v3141_v5 }
 0x339   :  { %2656 = vmatprep.subr.msk.bf16.mxu0 %vm3846_vm10, %v2655_v45  ;;  %vm6124_vm10 = vmmov %vm6120_vm2 }
 0x33a   :  { %v571_v22 = vsel %vm6120_vm2, %v3143_v38, %v3142_v2  ;;  %v572_v24 = vsel %vm6122_vm5, %v3133_v4, %v3143_v38  ;;  %v574_v59 = vsel %vm6124_vm10, %v3142_v2, %v3132_v60  ;;  %v3163_v38 = vunpack.i.h.bf16 %v3161_v54 }
 0x33b   :  { %v3146_v25 = vpop.permute.xlu1 %3145  ;;  %v3173_v60 = vunpack.i.h.bf16 %v3171_v10  ;;  %v3172_v2 = vunpack.i.l.bf16 %v3171_v10  ;;  %vm6125_vm10 = vcmp.lt.s32.totalorder %v3797_v8, 15  ;;  %vm6126_vm2 = vcmp.lt.s32.totalorder %v3797_v8, 1 }
 0x33c   :  { %v3148_v28 = vunpack.i.h.bf16 %v3146_v25  ;;  %v3147_v0 = vunpack.i.l.bf16 %v3146_v25  ;;  %v3162_v25 = vunpack.i.l.bf16 %v3161_v54  ;;  %vm6128_vm5 = vcmp.lt.s32.totalorder %v3797_v8, 127 }
 0x33e   :  { %v587_v19 = vsel %vm6121_vm8, %v3148_v28, %v3147_v0  ;;  %v588_v20 = vsel %vm6123_vm15, %v3138_v61, %v3148_v28  ;;  %v590_v52 = vsel %vm6119_vm1, %v3147_v0, %v3137_v63  ;;  %v4330_v61 = vpop.permute.xlu0 %3190  ;;  %vm6127_vm8 = vmmov %vm6125_vm10 }
 0x33f   :  { %v3151_v42 = vpop.permute.xlu1 %3150  ;;  %v2681_v23 = vpack.c.bf16 %v587_v19, %v571_v22  ;;  %v2684_v47 = vpack.c.bf16 %v588_v20, %v572_v24  ;;  %v2658_v3 = vpack.c.bf16 %v590_v52, %v574_v59  ;;  %v636_v52 = vsel %vm6128_vm5, %v3172_v2, %v3173_v60  ;;  %vm6129_vm15 = vmmov %vm6127_vm8 }
 0x340   :  { %v3153_v58 = vunpack.i.h.bf16 %v3151_v42  ;;  %v3152_v5 = vunpack.i.l.bf16 %v3151_v42  ;;  %v603_v42 = vsel %vm6127_vm8, %v3163_v38, %v3162_v25  ;;  %vm6130_vm1 = vmmov %vm6127_vm8  ;;  %vm6134_vm5 = vnez %v6078_v40 }
 0x341   :  { %2682 = vmatprep.subr.msk.bf16.mxu1 %vm4085_vm6, %v2681_v23  ;;  %2659 = vmatpush1.bf16.msk.msra.mxu0 %vm3865_vm12, %v2658_v3  ;;  %vm6132_vm8 = vmmov %vm6126_vm2  ;;  %vm891_vm12 = vcmp.lt.s32.totalorder %v3797_v8, 33  ;;  %vm6192_vm6 = vcmp.ge.s32.totalorder %v4028_v46, 2 }
 0x342   :  { %2685 = vmatpush1.bf16.msk.msra.mxu1 %vm4109_vm14, %v2684_v47  ;;  %v605_v28 = vsel %vm6125_vm10, %v3152_v5, %v3153_v58  ;;  %v604_v54 = vsel %vm6129_vm15, %v3153_v58, %v3163_v38  ;;  %v3201_v10 = vpop.permute.xlu0 %3200  ;;  %v606_v23 = vsel %vm6130_vm1, %v3162_v25, %v3152_v5  ;;  %vm6131_vm10 = vmmov %vm6126_vm2  ;;  %v3182_v5 = vunpack.i.l.bf16 %v4310_v11 }
 0x343   :  { %v3156_v4 = vpop.permute.xlu1 %3155  ;;  %v3203_v25 = vunpack.i.h.bf16 %v3201_v10  ;;  %vm6135_vm15 = vcmp.lt.s32.totalorder %v3797_v8, 127 }
 0x344   :  { %v3158_v63 = vunpack.i.h.bf16 %v3156_v4  ;;  %v3157_v45 = vunpack.i.l.bf16 %v3156_v4  ;;  %vm6136_vm1 = vmmov %vm6135_vm15 }
 0x346   :  { %v621_v0 = vsel %vm6126_vm2, %v3157_v45, %v3158_v63 }
 0x347   :  { %v3166_v22 = vpop.permute.xlu1 %3165  ;;  %v2661_v19 = vpack.c.bf16 %v621_v0, %v605_v28 }
 0x348   :  { %v3168_v24 = vunpack.i.h.bf16 %v3166_v22  ;;  %v3167_v20 = vunpack.i.l.bf16 %v3166_v22  ;;  %v2667_v22 = vpack.c.bf16 %v636_v52, %v4271_v30 }
 0x349   :  { %2662 = vmatprep.subr.msk.bf16.mxu0 %vm3911_vm4, %v2661_v19  ;;  %v3183_v19 = vunpack.i.h.bf16 %v4310_v11  ;;  %vm6133_vm4 = vnez %v6032_v48 }
 0x34a   :  { %v619_v47 = vsel %vm6131_vm10, %v3168_v24, %v3167_v20  ;;  %v620_v59 = vsel %vm6126_vm2, %v3158_v63, %v3168_v24  ;;  %v622_v3 = vsel %vm6132_vm8, %v3167_v20, %v3157_v45  ;;  %v3202_v63 = vunpack.i.l.bf16 %v3201_v10  ;;  %vm6137_vm10 = vmmov %vm6136_vm1 }
 0x34b   :  { %v2690_v4 = vpack.c.bf16 %v620_v59, %v604_v54  ;;  %v3176_v28 = vpop.permute.xlu1 %3175  ;;  %v2664_v0 = vpack.c.bf16 %v622_v3, %v606_v23  ;;  %v2687_v58 = vpack.c.bf16 %v619_v47, %v603_v42  ;;  %vm6138_vm2 = vnez %v6034_v56 }
 0x34c   :  { %v3178_v38 = vunpack.i.h.bf16 %v3176_v28  ;;  %v3177_v44 = vunpack.i.l.bf16 %v3176_v28  ;;  %vm6139_vm8 = vnez %v6084_v33  ;;  %v3192_v54 = vunpack.i.l.bf16 %v4330_v61 }
 0x34d   :  { %2665 = vmatpush1.bf16.msk.msra.mxu0 %vm6133_vm4, %v2664_v0  ;;  %2688 = vmatprep.subr.msk.bf16.mxu1 %vm6134_vm5, %v2687_v58  ;;  %vm6140_vm4 = vnez %v6036_v62  ;;  %vm6141_vm5 = vcmp.lt.s32.totalorder %v3797_v8, 113 }
 0x34e   :  { %v635_v45 = vsel %vm6135_vm15, %v3173_v60, %v3178_v38  ;;  %v637_v24 = vsel %vm6136_vm1, %v3177_v44, %v3172_v2  ;;  %v638_v30 = vsel %vm6137_vm10, %v3178_v38, %v3177_v44  ;;  %2668 = vmatprep.subr.msk.bf16.mxu0 %vm6138_vm2, %v2667_v22  ;;  %2691 = vmatpush1.bf16.msk.msra.mxu1 %vm6139_vm8, %v2690_v4  ;;  %v682_v60 = vpop.permute.xlu0 %681  ;;  %v3193_v2 = vunpack.i.h.bf16 %v4330_v61  ;;  %vm6145_vm8 = vmmov %vm6141_vm5 }
 0x34f   :  { %v2696_v48 = vpack.c.bf16 %v635_v45, %v4273_v16  ;;  %v3186_v40 = vpop.permute.xlu1 %3185  ;;  %v2670_v11 = vpack.c.bf16 %v637_v24, %v4269_v53  ;;  %v2693_v20 = vpack.c.bf16 %v638_v30, %v4275_v17  ;;  %v652_v33 = vsel %vm6141_vm5, %v3182_v5, %v3183_v19 }
 0x350   :  { %v3188_v42 = vunpack.i.h.bf16 %v3186_v40  ;;  %v3187_v52 = vunpack.i.l.bf16 %v3186_v40  ;;  %vm6142_vm15 = vcmp.lt.s32.totalorder %v3797_v8, 112  ;;  %vm6143_vm1 = vcmp.lt.s32.totalorder %v3797_v8, 111 }
 0x351   :  { %2671 = vmatpush1.bf16.msk.msra.mxu0 %vm6140_vm4, %v2670_v11  ;;  %2694 = vmatprep.subr.msk.bf16.mxu1 %vm4179_vm13, %v2693_v20  ;;  %v685_v16 = vsel %vm6143_vm1, %v3202_v63, %v3203_v25  ;;  %vm6144_vm10 = vmmov %vm6143_vm1  ;;  %v651_v59 = vsel %vm6145_vm8, %v3183_v19, %v3193_v2  ;;  %v653_v3 = vsel %vm6141_vm5, %v3192_v54, %v3182_v5 }
 0x352   :  { %v668_v53 = vsel %vm6142_vm15, %v3187_v52, %v3188_v42  ;;  %2697 = vmatpush1.bf16.msk.msra.mxu1 %vm4205_vm9, %v2696_v48  ;;  %v686_v17 = vsel %vm6144_vm10, %v682_v60, %v3202_v63  ;;  %vm6146_vm15 = vmmov %vm6141_vm5  ;;  %vm6147_vm9 = vnez %v6039_v27  ;;  %vm6148_vm1 = vnez %v6048_v57 }
 0x353   :  { %v3196_v61 = vpop.permute.xlu1 %3195  ;;  %v2673_v10 = vpack.c.bf16 %v668_v53, %v652_v33  ;;  %v654_v4 = vsel %vm6146_vm15, %v3193_v2, %v3192_v54  ;;  %v687_v28 = vsel %vm6148_vm1, %v685_v16, 0.0  ;;  %v690_v0 = vsel %vm4196_vm7, %v686_v17, 0.0 }
 0x354   :  { %v3198_v23 = vunpack.i.h.bf16 %v3196_v61  ;;  %v3197_v47 = vunpack.i.l.bf16 %v3196_v61  ;;  %vm6149_vm10 = vcmp.lt.s32.totalorder %v3797_v8, 112  ;;  %vm6152_vm15 = vcmp.lt.s32.totalorder %v3797_v8, 111 }
 0x355   :  { %2674 = vmatprep.subr.msk.bf16.mxu0 %vm6147_vm9, %v2673_v10  ;;  %vm6150_vm8 = vmmov %vm6149_vm10  ;;  %v707_v30 = vpack.c.bf16 %v687_v28, %v687_v28  ;;  %v710_v48 = vpack.c.bf16 %v690_v0, %v690_v0 }
 0x356   :  { %v667_v58 = vsel %vm6149_vm10, %v3188_v42, %v3198_v23  ;;  %v669_v38 = vsel %vm6150_vm8, %v3197_v47, %v3187_v52  ;;  %vm6151_vm5 = vmmov %vm6150_vm8  ;;  %vm6154_vm10 = vnez %v6044_v49  ;;  %vm6155_vm8 = vnez %v6041_v37  ;;  %v711_v52 = vld [vmem:[%s6160_s2] sm:$0xf]  ;;  %s3603_s2 = smov 30  }
 0x357   :  { %v670_v44 = vsel %vm6151_vm5, %v3198_v23, %v3197_v47  ;;  %v2676_v22 = vpack.c.bf16 %v669_v38, %v653_v3  ;;  %v2702_v5 = vpack.c.bf16 %v667_v58, %v651_v59  ;;  %v680_v63 = vpop.permute.xlu1 %679  ;;  %vm6153_vm9 = vmmov %vm6152_vm15 }
 0x358   :  { %v2699_v19 = vpack.c.bf16 %v670_v44, %v654_v4  ;;  %v683_v45 = vsel %vm6152_vm15, %v680_v63, %v682_v60  ;;  %v684_v24 = vsel %vm6153_vm9, %v3203_v25, %v680_v63  ;;  %vm6156_vm9 = vcmask 1043456  }
 0x359   :  { %v688_v40 = vsel %vm6154_vm10, %v684_v24, 0.0  ;;  %v689_v11 = vsel %vm4151_vm0, %v683_v45, 0.0  ;;  %2677 = vmatpush1.bf16.msk.msra.mxu0 %vm6155_vm8, %v2676_v22  ;;  %vm6157_vm5 = vmmov %vm6156_vm9  ;;  %vm6161_vm0 = vcmask 588800   ;;  %v844_v22 = vld [vmem:[%s5926_s6] sm:$0xff]  ;;  %s3600_s6 = smov 33   ;;  %vm6172_vm10 = vcmp.ge.s32.totalorder %v4011_v34, 1 }
 0x35a   :  { %2700 = vmatprep.subr.msk.bf16.mxu1 %vm4226_vm3, %v2699_v19  ;;  %v708_v20 = vpack.c.bf16 %v688_v40, %v688_v40  ;;  %v709_v42 = vpack.c.bf16 %v689_v11, %v689_v11  ;;  %vm6158_vm15 = vmmov %vm6157_vm5  ;;  %vm6169_vm3 = vcmp.ge.s32.totalorder %v4009_v31, 2 }
 0x35b   :  { %2703 = vmatpush1.bf16.msk.msra.mxu1 %vm4253_vm11, %v2702_v5  ;;  %v716_v25 = vsel %vm6158_vm15, %v707_v30, 0  ;;  %vm6159_vm1 = vmmov %vm6157_vm5  ;;  %vm5994_vm15 = vcmp.ge.s32.totalorder %v4011_v34, 2 }
 0x35c   :  { %2704 = vmatprep.subr.msk.bf16.mxu1 %vm6156_vm9, %v710_v48  ;;  %2678 = vmatprep.subr.msk.bf16.mxu0 %vm6157_vm5, %v708_v20  ;;  %v722_v60 = vsel %vm6159_vm1, %v709_v42, 0  ;;  %vm6162_vm8 = vmmov %vm6161_vm0  ;;  %vm5990_vm9 = vcmp.ge.s32.totalorder %v3803_v13, 2  ;;  %vm5995_vm5 = vcmp.ge.s32.totalorder %v3805_v14, 2 }
 0x35d   :  { %736 = vmatpush1.bf16.msra.mxu0 %v716_v25  ;;  %v829_v25 = vld [vmem:[%s5927_s5] sm:$0xff]  ;;  %s3599_s5 = smov 34   ;;  %vm6163_vm1 = vmmov %vm6161_vm0 }
 0x35e   :  { %vm4553_vm7 = vmand %vm6169_vm3, %vm5994_vm15  ;;  %vm6188_vm15 = vcmp.lt.s32.totalorder %v4011_v34, 15 }
 0x35f   :  { %777 = vmatpush1.bf16.msra.mxu1 %v722_v60  ;;  %vm6173_vm4 = vmmov %vm6169_vm3 }
 0x360   :  { %2679 = vmatmul.mubr.msk.bf16.vlgmr.msra.gmra.mrb[0].mxu0 %vm6161_vm0, %v711_v52 }
 0x362   :  { %2705 = vmatmul.mubr.msk.bf16.vlgmr.msra.gmra.mrb[8].mxu1 %vm6162_vm8, %v711_v52  ;;  %vm5991_vm8 = vcmp.ge.s32.totalorder %v3801_v12, 2 }
 0x433   :  { %v761_v2 = vpop.f32.mrb[0].mxu0 }
 0x434   :  { %v815_v54 = vmul.f32 %v761_v2, %v761_v2  ;;  %v763_v33 = vpop.f32.mrb[1].mxu0 }
 0x435   :  { %v802_v53 = vpop.f32.mrb[8].mxu1  ;;  %v809_v16 = vadd.f32 %v763_v33, %v761_v2  ;;  %v816_v17 = vmul.f32 %v763_v33, %v763_v33  ;;  %v765_v10 = vpop.f32.mrb[2].mxu0 }
 0x436   :  { %v817_v61 = vmul.f32 %v802_v53, %v802_v53  ;;  %v804_v23 = vpop.f32.mrb[9].mxu1  ;;  %v766_v47 = vpop.f32.mrb[3].mxu0 }
 0x437   :  { %v806_v59 = vpop.f32.mrb[10].mxu1  ;;  %v810_v4 = vadd.f32 %v809_v16, %v802_v53  ;;  %v819_v28 = vadd.f32 %v816_v17, %v815_v54  ;;  %v818_v58 = vmul.f32 %v804_v23, %v804_v23 }
 0x438   :  { %v807_v3 = vpop.f32.mrb[11].mxu1 }
 0x439   :  { %v811_v0 = vadd.f32 %v810_v4, %v804_v23  ;;  %v820_v38 = vadd.f32 %v819_v28, %v817_v61 }
 0x43b   :  { %812 = vadd.xlane.f32.xlu1 %v811_v0  ;;  %v821_v44 = vadd.f32 %v820_v38, %v818_v58  ;;  %v3524_v38 = vld [vmem:[%s5928_s7 + $0x4] ss:$8 sps:$4 sm:$0xff]  }
 0x43c   :  { %2781 = vmatprep.mubr.msk.bf16.mxu0 %vm6161_vm0, %v3524_v38  ;;  %2855 = vmatprep.mubr.msk.bf16.mxu1 %vm6163_vm1, %v3524_v38  ;;  %vm4536_vm0 = vmand %vm5991_vm8, %vm5990_vm9  ;;  %vm6166_vm1 = vcmp.ge.s32.totalorder %v3803_v13, 1  ;;  %vm5993_vm9 = vcmp.ge.s32.totalorder %v3808_v15, 2 }
 0x43d   :  { %822 = vadd.xlane.f32.xlu0 %v821_v44  ;;  %vm4544_vm11 = vmand %vm5991_vm8, %vm6166_vm1  ;;  %vm6176_vm8 = vcmp.ge.s32.totalorder %v3808_v15, 1 }
 0x43e   :  { %vm4562_vm1 = vmand %vm6173_vm4, %vm6172_vm10  ;;  %vm6182_vm4 = vcmp.ge.s32.totalorder %v3801_v12, 2  ;;  %vm6185_vm10 = vcmp.ge.s32.totalorder %v4028_v46, 1 }
 0x43f   :  { %vm4570_vm13 = vmand %vm5995_vm5, %vm6176_vm8  ;;  %vm85_vm8 = vcmp.ge.s32.totalorder %v4026_v43, 2 }
 0x440   :  { %vm4578_vm3 = vmand %vm5995_vm5, %vm5993_vm9  ;;  %vm6181_vm5 = vcmp.lt.s32.totalorder %v3803_v13, 15  ;;  %vm866_vm9 = vcmp.lt.s32.totalorder %v3797_v8, 34 }
 0x441   :  { %vm4600_vm2 = vmand %vm6182_vm4, %vm6181_vm5  ;;  %vm6189_vm5 = vcmp.ge.s32.totalorder %v4009_v31, 2 }
 0x442   :  { %vm4608_vm14 = vmand %vm85_vm8, %vm6185_vm10 }
 0x443   :  { %vm4617_vm4 = vmand %vm6189_vm5, %vm6188_vm15  ;;  %vm6195_vm15 = vcmp.ge.s32.totalorder %v3801_v12, 2 }
 0x444   :  { %vm4626_vm10 = vmand %vm85_vm8, %vm6192_vm6 }
 0x445   :  { %vm4634_vm6 = vmpackc.low %vm4600_vm2, %vm6195_vm15  ;;  %vm916_vm2 = vcmp.lt.s32.totalorder %v3797_v8, 32 }
 0x446   :  { %vm6201_vm15 = vmpackc.low %vm4544_vm11, %vm4536_vm0  ;;  %vm6208_vm0 = vcmp.lt.s32.totalorder %v4028_v46, 15 }
 0x447   :  { %vm6207_vm11 = vmpackc.low %vm4570_vm13, %vm4578_vm3  ;;  %vm6212_vm13 = vcmp.ge.s32.totalorder %v3801_v12, 2 }
 0x44c   :  { %847 = vperm.xlu1 %3128, %v844_v22  }
 0x4c8   :  { %v813_v19 = vpop.xlane.xlu1 %812 }
 0x4c9   :  { %v814_v5 = vmul.f32 0.001953125, %v813_v19 }
 0x4ca   :  { %v823_v63 = vpop.xlane.xlu0 %822 }
 0x4cb   :  { %v824_v45 = vmul.f32 0.001953125, %v823_v63  ;;  %v825_v24 = vmul.f32 %v814_v5, %v814_v5  ;;  %v831_v30 = vsub.f32 %v761_v2, %v814_v5  ;;  %v832_v48 = vsub.f32 %v763_v33, %v814_v5 }
 0x4cc   :  { %v833_v40 = vsub.f32 %v802_v53, %v814_v5  ;;  %v834_v11 = vsub.f32 %v804_v23, %v814_v5  ;;  %v848_v47 = vpop.permute.xlu1 %847 }
 0x4cd   :  { %v826_v20 = vsub.f32 %v824_v45, %v825_v24 }
 0x4cf   :  { %v827_v42 = vadd.f32 1e-05, %v826_v20 }
 0x4d1   :  { %3575 = vrsqrt.f32 %v827_v42 }
 0x4db   :  { %v3576_v60 = vpop.eup %3575 }
 0x4dc   :  { %v830_v52 = vmul.f32 %v3576_v60, %v829_v25 }
 0x4de   :  { %837 = vperm.xlu0 %3127, %v830_v52  }
 0x55d   :  { %v838_v54 = vpop.permute.xlu0 %837 }
 0x55e   :  { %v840_v16 = vmul.f32 %v838_v54, %v831_v30  ;;  %v841_v17 = vmul.f32 %v838_v54, %v832_v48  ;;  %v842_v61 = vmul.f32 %v838_v54, %v833_v40  ;;  %v843_v10 = vmul.f32 %v838_v54, %v834_v11 }
 0x560   :  { %v4435_v2 = vadd.f32 %v848_v47, %v840_v16  ;;  %v4437_v33 = vadd.f32 %v848_v47, %v841_v17  ;;  %v4439_v53 = vadd.f32 %v848_v47, %v842_v61  ;;  %v4441_v23 = vadd.f32 %v848_v47, %v843_v10 }
 0x562   :  { %v6003_v59 = vmax.f32 %v4435_v2, 0.0  ;;  %v6004_v3 = vmax.f32 %v4437_v33, 0.0  ;;  %v6005_v4 = vmax.f32 %v4439_v53, 0.0  ;;  %v6002_v28 = vmax.f32 %v4441_v23, 0.0 }
 0x564   :  { %v4451_v0 = vpack.i.bf16 %v6002_v28, %v6005_v4  ;;  %v4457_v58 = vpack.i.bf16 %v6004_v3, %v6003_v59 }
 0x566   :  { %3210 = vrot.lane.b32.xlu0 %v4451_v0, %s3599_s5  ;;  %3205 = vrot.lane.b32.xlu1 %v4457_v58, %s3599_s5  ;;  %s3620_s5 = smov 120  }
 0x56a   :  { %3220 = vrot.lane.b32.xlu0 %v4451_v0, %s3600_s6  ;;  %3215 = vrot.lane.b32.xlu1 %v4457_v58, %s3600_s6 }
 0x56e   :  { %3230 = vrot.lane.b32.xlu0 %v4451_v0, %s3601_s3  ;;  %3225 = vrot.lane.b32.xlu1 %v4457_v58, %s3601_s3  ;;  %s3614_s3 = smov 94  }
 0x572   :  { %3240 = vrot.lane.b32.xlu0 %v4451_v0, %s3602_s25  ;;  %3235 = vrot.lane.b32.xlu1 %v4457_v58, %s3602_s25 }
 0x576   :  { %3250 = vrot.lane.b32.xlu0 %v4451_v0, %s3603_s2  ;;  %3245 = vrot.lane.b32.xlu1 %v4457_v58, %s3603_s2 }
 0x57a   :  { %3260 = vrot.lane.b32.xlu0 %v4451_v0, %s3604_s29  ;;  %3255 = vrot.lane.b32.xlu1 %v4457_v58, %s3604_s29 }
 0x57e   :  { %3270 = vrot.lane.b32.xlu0 %v4451_v0, %s3589_s26  ;;  %3265 = vrot.lane.b32.xlu1 %v4457_v58, %s3589_s26  ;;  %s3607_s26 = smov 126  }
 0x582   :  { %3280 = vrot.lane.b32.xlu0 %v4451_v0, %s3590_s27  ;;  %3275 = vrot.lane.b32.xlu1 %v4457_v58, %s3590_s27  ;;  %s3608_s27 = smov 114  }
 0x586   :  { %3290 = vrot.lane.b32.xlu0 %v4451_v0, %s3592_s4  ;;  %3285 = vrot.lane.b32.xlu1 %v4457_v58, %s3592_s4  ;;  %s3609_s4 = smov 110  }
 0x58a   :  { %3300 = vrot.lane.b32.xlu0 %v4451_v0, %s3605_s30  ;;  %3295 = vrot.lane.b32.xlu1 %v4457_v58, %s3605_s30 }
 0x58e   :  { %3310 = vrot.lane.b32.xlu0 %v4451_v0, %s3606_s23  ;;  %3305 = vrot.lane.b32.xlu1 %v4457_v58, %s3606_s23 }
 0x592   :  { %3320 = vrot.lane.b32.xlu0 %v4451_v0, %s3591_s28  ;;  %3315 = vrot.lane.b32.xlu1 %v4457_v58, %s3591_s28 }
 0x596   :  { %3330 = vrot.lane.b32.xlu0 %v4451_v0, %s3593_s0  ;;  %3325 = vrot.lane.b32.xlu1 %v4457_v58, %s3593_s0 }
 0x59a   :  { %3340 = vrot.lane.b32.xlu0 %v4451_v0, %s3607_s26  ;;  %3335 = vrot.lane.b32.xlu1 %v4457_v58, %s3607_s26 }
 0x59e   :  { %3350 = vrot.lane.b32.xlu0 %v4451_v0, %s3608_s27  ;;  %3345 = vrot.lane.b32.xlu1 %v4457_v58, %s3608_s27 }
 0x5a2   :  { %3360 = vrot.lane.b32.xlu0 %v4451_v0, %s3595_s1  ;;  %3355 = vrot.lane.b32.xlu1 %v4457_v58, %s3595_s1  ;;  %s3611_s1 = smov 97  }
 0x5a6   :  { %3370 = vrot.lane.b32.xlu0 %v4451_v0, %s3594_s21  ;;  %3365 = vrot.lane.b32.xlu1 %v4457_v58, %s3594_s21  ;;  %s3612_s21 = smov 96  }
 0x5aa   :  { %3380 = vrot.lane.b32.xlu0 %v4451_v0, %s3597_s22  ;;  %3375 = vrot.lane.b32.xlu1 %v4457_v58, %s3597_s22  ;;  %s3613_s22 = smov 95  }
 0x5ae   :  { %3390 = vrot.lane.b32.xlu0 %v4451_v0, %s3609_s4  ;;  %3385 = vrot.lane.b32.xlu1 %v4457_v58, %s3609_s4 }
 0x5b2   :  { %3400 = vrot.lane.b32.xlu0 %v4451_v0, %s3610_s24  ;;  %3395 = vrot.lane.b32.xlu1 %v4457_v58, %s3610_s24 }
 0x5b6   :  { %3410 = vrot.lane.b32.xlu0 %v4451_v0, %s3611_s1  ;;  %3405 = vrot.lane.b32.xlu1 %v4457_v58, %s3611_s1  ;;  %s3616_s1 = smov 9  }
 0x5ba   :  { %3420 = vrot.lane.b32.xlu0 %v4451_v0, %s3612_s21  ;;  %3415 = vrot.lane.b32.xlu1 %v4457_v58, %s3612_s21  ;;  %s3618_s21 = smov 121  }
 0x5be   :  { %3430 = vrot.lane.b32.xlu0 %v4451_v0, %s3613_s22  ;;  %3425 = vrot.lane.b32.xlu1 %v4457_v58, %s3613_s22  ;;  %s3619_s22 = smov 119  }
 0x5c2   :  { %3440 = vrot.lane.b32.xlu0 %v4451_v0, %s3614_s3  ;;  %3435 = vrot.lane.b32.xlu1 %v4457_v58, %s3614_s3 }
 0x5d8   :  { %v3211_v24 = vpop.permute.xlu0 %3210  ;;  %v3206_v30 = vpop.permute.xlu1 %3205 }
 0x5d9   :  { %v3213_v40 = vunpack.i.h.bf16 %v3211_v24  ;;  %v3212_v11 = vunpack.i.l.bf16 %v3211_v24  ;;  %v3208_v20 = vunpack.i.h.bf16 %v3206_v30  ;;  %v3207_v42 = vunpack.i.l.bf16 %v3206_v30 }
 0x5db   :  { %v867_v0 = vsel %vm866_vm9, %v3212_v11, %v3213_v40  ;;  %v868_v58 = vsel %vm866_vm9, %v3208_v20, %v3212_v11  ;;  %v869_v38 = vsel %vm866_vm9, %v3207_v42, %v3208_v20  ;;  %v870_v24 = vsel %vm866_vm9, %v3213_v40, %v3207_v42  ;;  %vm2785_vm9 = vmpackc.low %vm4608_vm14, %vm4626_vm10 }
 0x5dc   :  { %v3221_v52 = vpop.permute.xlu0 %3220  ;;  %v3216_v54 = vpop.permute.xlu1 %3215  ;;  %vm6202_vm14 = vmpackc.low %vm4562_vm1, %vm4553_vm7  ;;  %vm6204_vm10 = vcmp.ge.s32.totalorder %v3805_v14, 2  ;;  %vm6009_vm1 = vcmp.lt.s32.totalorder %v3808_v15, 14 }
 0x5dd   :  { %v3223_v17 = vunpack.i.h.bf16 %v3221_v52  ;;  %v3222_v61 = vunpack.i.l.bf16 %v3221_v52  ;;  %v3218_v10 = vunpack.i.h.bf16 %v3216_v54  ;;  %v3217_v47 = vunpack.i.l.bf16 %v3216_v54  ;;  %vm4679_vm7 = vmand %vm85_vm8, %vm6208_vm0 }
 0x5de   :  { %vm6219_vm0 = vcmp.ge.s32.totalorder %v3805_v14, 2 }
 0x5df   :  { %v892_v30 = vsel %vm891_vm12, %v3222_v61, %v3223_v17  ;;  %v893_v7 = vsel %vm891_vm12, %v3218_v10, %v3222_v61  ;;  %v894_v6 = vsel %vm891_vm12, %v3217_v47, %v3218_v10  ;;  %v895_v28 = vsel %vm891_vm12, %v3223_v17, %v3217_v47  ;;  %vm6198_vm12 = vmmov %vm6189_vm5 }
 0x5e0   :  { %v2783_v3 = vpack.c.bf16 %v892_v30, %v867_v0  ;;  %v2709_v52 = vpack.c.bf16 %v894_v6, %v869_v38  ;;  %v2712_v4 = vpack.c.bf16 %v895_v28, %v870_v24  ;;  %v2786_v54 = vpack.c.bf16 %v893_v7, %v868_v58  ;;  %v3231_v9 = vpop.permute.xlu0 %3230  ;;  %v3226_v11 = vpop.permute.xlu1 %3225  ;;  %vm4646_vm5 = vmpackc.low %vm4617_vm4, %vm6198_vm12 }
 0x5e1   :  { %v3233_v6 = vunpack.i.h.bf16 %v3231_v9  ;;  %v3232_v28 = vunpack.i.l.bf16 %v3231_v9  ;;  %v3228_v7 = vunpack.i.h.bf16 %v3226_v11  ;;  %v3227_v40 = vunpack.i.l.bf16 %v3226_v11 }
 0x5e2   :  { %2710 = vmatprep.subr.msk.bf16.mxu0 %vm6201_vm15, %v2709_v52  ;;  %2784 = vmatprep.subr.msk.bf16.mxu1 %vm6202_vm14, %v2783_v3  ;;  %vm6203_vm4 = vcmp.lt.s32.totalorder %v3808_v15, 15  ;;  %vm941_vm15 = vcmp.lt.s32.totalorder %v3797_v8, 31  ;;  %vm6211_vm14 = vcmp.lt.s32.totalorder %v3803_v13, 14 }
 0x5e3   :  { %vm4665_vm12 = vmand %vm6204_vm10, %vm6203_vm4  ;;  %2713 = vmatpush1.bf16.msk.msra.mxu0 %vm6207_vm11, %v2712_v4  ;;  %2787 = vmatpush1.bf16.msk.msra.mxu1 %vm2785_vm9, %v2786_v54  ;;  %vm6008_vm4 = vcmp.lt.s32.totalorder %v4011_v34, 14  ;;  %vm6215_vm9 = vcmp.ge.s32.totalorder %v3803_v13, 2  ;;  %vm6216_vm10 = vcmp.ge.s32.totalorder %v3801_v12, 1  ;;  %v917_v42 = vsel %vm916_vm2, %v3232_v28, %v3233_v6 }
 0x5e4   :  { %v3241_v44 = vpop.permute.xlu0 %3240  ;;  %v3236_v22 = vpop.permute.xlu1 %3235  ;;  %vm4689_vm3 = vmand %vm6212_vm13, %vm6211_vm14  ;;  %v918_v25 = vsel %vm916_vm2, %v3228_v7, %v3232_v28  ;;  %v919_v60 = vsel %vm916_vm2, %v3227_v40, %v3228_v7  ;;  %v920_v16 = vsel %vm916_vm2, %v3233_v6, %v3227_v40 }
 0x5e5   :  { %v3243_v19 = vunpack.i.h.bf16 %v3241_v44  ;;  %v3242_v5 = vunpack.i.l.bf16 %v3241_v44  ;;  %v3238_v63 = vunpack.i.h.bf16 %v3236_v22  ;;  %v3237_v45 = vunpack.i.l.bf16 %v3236_v22  ;;  %vm4698_vm11 = vmand %vm6216_vm10, %vm6215_vm9 }
 0x5e6   :  { %vm4714_vm14 = vmpackc.low %vm4665_vm12, %vm6219_vm0  ;;  %vm6227_vm9 = vcmp.ge.s32.totalorder %v4011_v34, 2  ;;  %vm6228_vm10 = vcmp.ge.s32.totalorder %v4009_v31, 1 }
 0x5e7   :  { %v942_v61 = vsel %vm941_vm15, %v3242_v5, %v3243_v19  ;;  %v943_v10 = vsel %vm941_vm15, %v3238_v63, %v3242_v5  ;;  %v944_v47 = vsel %vm941_vm15, %v3237_v45, %v3238_v63  ;;  %v945_v0 = vsel %vm941_vm15, %v3243_v19, %v3237_v45  ;;  %vm4730_vm2 = vmpackc.low %vm4679_vm7, %vm85_vm8 }
 0x5e8   :  { %v2789_v38 = vpack.c.bf16 %v942_v61, %v917_v42  ;;  %v2715_v24 = vpack.c.bf16 %v944_v47, %v919_v60  ;;  %v2718_v30 = vpack.c.bf16 %v945_v0, %v920_v16  ;;  %v2792_v52 = vpack.c.bf16 %v943_v10, %v918_v25  ;;  %v3251_v54 = vpop.permute.xlu0 %3250  ;;  %v3246_v11 = vpop.permute.xlu1 %3245  ;;  %vm2720_vm12 = vmpackc.low %vm4698_vm11, %vm4689_vm3 }
 0x5e9   :  { %vm6224_vm15 = vcmp.ge.s32.totalorder %v4009_v31, 2  ;;  %vm6010_vm7 = vcmp.lt.s32.totalorder %v4028_v46, 14  ;;  %v3253_v28 = vunpack.i.h.bf16 %v3251_v54  ;;  %v3252_v7 = vunpack.i.l.bf16 %v3251_v54  ;;  %vm4755_vm0 = vmand %vm6228_vm10, %vm6227_vm9 }
 0x5ea   :  { %vm4742_vm13 = vmand %vm6224_vm15, %vm6008_vm4  ;;  %v3248_v40 = vunpack.i.h.bf16 %v3246_v11  ;;  %v3247_v9 = vunpack.i.l.bf16 %v3246_v11  ;;  %2716 = vmatprep.subr.msk.bf16.mxu0 %vm4634_vm6, %v2715_v24  ;;  %2790 = vmatprep.subr.msk.bf16.mxu1 %vm4646_vm5, %v2789_v38  ;;  %vm966_vm15 = vcmp.lt.s32.totalorder %v3797_v8, 30  ;;  %vm6231_vm6 = vcmp.ge.s32.totalorder %v3805_v14, 2 }
 0x5eb   :  { %2719 = vmatpush1.bf16.msk.msra.mxu0 %vm4714_vm14, %v2718_v30  ;;  %vm4766_vm4 = vmand %vm6231_vm6, %vm6009_vm1  ;;  %2793 = vmatpush1.bf16.msk.msra.mxu1 %vm4730_vm2, %v2792_v52  ;;  %vm991_vm5 = vcmp.lt.s32.totalorder %v3797_v8, 18  ;;  %vm6234_vm9 = vcmp.ge.s32.totalorder %v3808_v15, 2  ;;  %vm6235_vm10 = vcmp.ge.s32.totalorder %v3805_v14, 1  ;;  %v967_v25 = vsel %vm966_vm15, %v3252_v7, %v3253_v28 }
 0x5ec   :  { %v3261_v48 = vpop.permute.xlu0 %3260  ;;  %v3256_v44 = vpop.permute.xlu1 %3255  ;;  %vm4777_vm14 = vmand %vm6235_vm10, %vm6234_vm9  ;;  %v968_v60 = vsel %vm966_vm15, %v3248_v40, %v3252_v7  ;;  %v969_v16 = vsel %vm966_vm15, %v3247_v9, %v3248_v40  ;;  %v970_v17 = vsel %vm966_vm15, %v3253_v28, %v3247_v9  ;;  %vm6240_vm6 = vcmp.ge.s32.totalorder %v4028_v46, 2 }
 0x5ed   :  { %v3263_v19 = vunpack.i.h.bf16 %v3261_v48  ;;  %v3262_v5 = vunpack.i.l.bf16 %v3261_v48  ;;  %v3258_v63 = vunpack.i.h.bf16 %v3256_v44  ;;  %v3257_v45 = vunpack.i.l.bf16 %v3256_v44  ;;  %vm4785_vm2 = vmand %vm85_vm8, %vm6010_vm7 }
 0x5ee   :  { %vm6241_vm9 = vcmp.ge.s32.totalorder %v4026_v43, 1  ;;  %vm2794_vm15 = vmpackc.low %vm4755_vm0, %vm4742_vm13  ;;  %vm6248_vm11 = vcmp.lt.s32.totalorder %v3797_v8, 16 }
 0x5ef   :  { %vm4801_vm8 = vmand %vm6241_vm9, %vm6240_vm6  ;;  %v992_v10 = vsel %vm991_vm5, %v3262_v5, %v3263_v19  ;;  %v993_v47 = vsel %vm991_vm5, %v3258_v63, %v3262_v5  ;;  %v994_v0 = vsel %vm991_vm5, %v3257_v45, %v3258_v63  ;;  %v995_v58 = vsel %vm991_vm5, %v3263_v19, %v3257_v45 }
 0x5f0   :  { %v2795_v38 = vpack.c.bf16 %v992_v10, %v967_v25  ;;  %v2721_v24 = vpack.c.bf16 %v994_v0, %v969_v16  ;;  %v2724_v30 = vpack.c.bf16 %v995_v58, %v970_v17  ;;  %v2798_v52 = vpack.c.bf16 %v993_v47, %v968_v60  ;;  %v3271_v54 = vpop.permute.xlu0 %3270  ;;  %v3266_v11 = vpop.permute.xlu1 %3265  ;;  %vm2723_vm10 = vmpackc.low %vm4777_vm14, %vm4766_vm4 }
 0x5f1   :  { %vm2797_vm5 = vmpackc.low %vm4801_vm8, %vm4785_vm2  ;;  %v3273_v6 = vunpack.i.h.bf16 %v3271_v54  ;;  %v3272_v28 = vunpack.i.l.bf16 %v3271_v54  ;;  %v3268_v7 = vunpack.i.h.bf16 %v3266_v11  ;;  %v3267_v40 = vunpack.i.l.bf16 %v3266_v11 }
 0x5f2   :  { %2722 = vmatprep.subr.msk.bf16.mxu0 %vm2720_vm12, %v2721_v24  ;;  %2796 = vmatprep.subr.msk.bf16.mxu1 %vm2794_vm15, %v2795_v38  ;;  %vm6244_vm4 = vcmp.lt.s32.totalorder %v3797_v8, 17  ;;  %vm6249_vm12 = vmmov %vm6248_vm11  ;;  %vm6252_vm6 = vnez %v6022_v26  ;;  %vm6253_vm9 = vnez %v6059_v35  ;;  %vm6254_vm8 = vcmp.lt.s32.totalorder %v3803_v13, 14 }
 0x5f3   :  { %2725 = vmatpush1.bf16.msk.msra.mxu0 %vm2723_vm10, %v2724_v30  ;;  %2799 = vmatpush1.bf16.msk.msra.mxu1 %vm2797_vm5, %v2798_v52  ;;  %v1016_v19 = vsel %vm6244_vm4, %v3272_v28, %v3273_v6  ;;  %vm6245_vm13 = vmmov %vm6244_vm4  ;;  %vm6255_vm15 = vcmp.ge.s32.totalorder %v3801_v12, 1  ;;  %vm6258_vm5 = vcmp.ge.s32.totalorder %v3805_v14, 1 }
 0x5f4   :  { %v3281_v9 = vpop.permute.xlu0 %3280  ;;  %v3276_v3 = vpop.permute.xlu1 %3275  ;;  %v1017_v5 = vsel %vm6245_vm13, %v3268_v7, %v3272_v28  ;;  %vm6246_vm0 = vmmov %vm6244_vm4  ;;  %vm6261_vm13 = vnez %v6024_v32 }
 0x5f5   :  { %v3283_v59 = vunpack.i.h.bf16 %v3281_v9  ;;  %v3282_v48 = vunpack.i.l.bf16 %v3281_v9  ;;  %v3278_v44 = vunpack.i.h.bf16 %v3276_v3  ;;  %v3277_v22 = vunpack.i.l.bf16 %v3276_v3  ;;  %vm6247_vm3 = vmmov %vm6246_vm0 }
 0x5f6   :  { %v1018_v4 = vsel %vm6246_vm0, %v3267_v40, %v3268_v7  ;;  %v1019_v20 = vsel %vm6247_vm3, %v3273_v6, %v3267_v40  ;;  %vm6250_vm14 = vmmov %vm6248_vm11  ;;  %vm6262_vm0 = vnez %v6069_v18  ;;  %vm1064_vm3 = vcmp.lt.s32.totalorder %v3797_v8, 14 }
 0x5f7   :  { %v1032_v63 = vsel %vm6248_vm11, %v3282_v48, %v3283_v59  ;;  %v1033_v45 = vsel %vm6249_vm12, %v3278_v44, %v3282_v48  ;;  %v1034_v42 = vsel %vm6250_vm14, %v3277_v22, %v3278_v44  ;;  %vm6251_vm2 = vmmov %vm6248_vm11  ;;  %vm6263_vm11 = vcmp.lt.s32.totalorder %v4011_v34, 14 }
 0x5f8   :  { %v1035_v25 = vsel %vm6251_vm2, %v3283_v59, %v3277_v22  ;;  %v2801_v60 = vpack.c.bf16 %v1032_v63, %v1016_v19  ;;  %v2727_v16 = vpack.c.bf16 %v1034_v42, %v1018_v4  ;;  %v2804_v61 = vpack.c.bf16 %v1033_v45, %v1017_v5  ;;  %v3291_v10 = vpop.permute.xlu0 %3290  ;;  %v3286_v47 = vpop.permute.xlu1 %3285  ;;  %vm4854_vm10 = vmand %vm6255_vm15, %vm6254_vm8 }
 0x5f9   :  { %v2730_v17 = vpack.c.bf16 %v1035_v25, %v1019_v20  ;;  %v3293_v0 = vunpack.i.h.bf16 %v3291_v10  ;;  %v3292_v58 = vunpack.i.l.bf16 %v3291_v10  ;;  %v3288_v38 = vunpack.i.h.bf16 %v3286_v47  ;;  %vm4862_vm4 = vmand %vm6258_vm5, %vm6009_vm1 }
 0x5fa   :  { %v3287_v24 = vunpack.i.l.bf16 %v3286_v47  ;;  %2728 = vmatprep.subr.msk.bf16.mxu0 %vm6252_vm6, %v2727_v16  ;;  %2802 = vmatprep.subr.msk.bf16.mxu1 %vm6253_vm9, %v2801_v60  ;;  %vm6264_vm12 = vcmp.ge.s32.totalorder %v4009_v31, 1  ;;  %vm6267_vm2 = vnez %v6026_v36  ;;  %vm6268_vm9 = vcmp.lt.s32.totalorder %v3797_v8, 15 }
 0x5fb   :  { %2731 = vmatpush1.bf16.msk.msra.mxu0 %vm6261_vm13, %v2730_v17  ;;  %2805 = vmatpush1.bf16.msk.msra.mxu1 %vm6262_vm0, %v2804_v61  ;;  %vm4875_vm14 = vmand %vm6264_vm12, %vm6263_vm11  ;;  %v1048_v18 = vsel %vm6268_vm9, %v3292_v58, %v3293_v0  ;;  %vm6272_vm13 = vcmp.ge.s32.totalorder %v4026_v43, 1  ;;  %vm6275_vm11 = vnez %v6065_v39 }
 0x5fc   :  { %v3301_v26 = vpop.permute.xlu0 %3300  ;;  %v3296_v35 = vpop.permute.xlu1 %3295  ;;  %vm2732_vm6 = vmpackc.low %vm4854_vm10, %vm6267_vm2  ;;  %vm6279_vm10 = vcmp.ge.s32.totalorder %v3803_v13, 1 }
 0x5fd   :  { %v3303_v11 = vunpack.i.h.bf16 %v3301_v26  ;;  %v3302_v6 = vunpack.i.l.bf16 %v3301_v26  ;;  %v3298_v28 = vunpack.i.h.bf16 %v3296_v35  ;;  %v3297_v32 = vunpack.i.l.bf16 %v3296_v35  ;;  %vm6269_vm8 = vmmov %vm6268_vm9 }
 0x5fe   :  { %v1049_v7 = vsel %vm6269_vm8, %v3288_v38, %v3292_v58  ;;  %vm6270_vm15 = vmmov %vm6269_vm8  ;;  %vm6276_vm9 = vnez %v6028_v41 }
 0x5ff   :  { %v1050_v40 = vsel %vm6270_vm15, %v3287_v24, %v3288_v38  ;;  %vm6271_vm5 = vmmov %vm6269_vm8  ;;  %v1065_v59 = vsel %vm1064_vm3, %v3302_v6, %v3303_v11  ;;  %v1066_v48 = vsel %vm1064_vm3, %v3298_v28, %v3302_v6  ;;  %v1067_v44 = vsel %vm1064_vm3, %v3297_v32, %v3298_v28 }
 0x600   :  { %v1051_v9 = vsel %vm6271_vm5, %v3293_v0, %v3287_v24  ;;  %vm4895_vm0 = vmand %vm6272_vm13, %vm6010_vm7  ;;  %v1068_v22 = vsel %vm1064_vm3, %v3303_v11, %v3297_v32  ;;  %v2807_v19 = vpack.c.bf16 %v1065_v59, %v1048_v18  ;;  %v2733_v5 = vpack.c.bf16 %v1067_v44, %v1050_v40  ;;  %v3311_v63 = vpop.permute.xlu0 %3310  ;;  %v3306_v45 = vpop.permute.xlu1 %3305 }
 0x601   :  { %vm2806_vm12 = vmpackc.low %vm4875_vm14, %vm6275_vm11  ;;  %v2736_v4 = vpack.c.bf16 %v1068_v22, %v1051_v9  ;;  %v2810_v20 = vpack.c.bf16 %v1066_v48, %v1049_v7  ;;  %vm6277_vm15 = vnez %v6075_v21  ;;  %v3313_v39 = vunpack.i.h.bf16 %v3311_v63 }
 0x602   :  { %vm2735_vm8 = vmpackc.low %vm4862_vm4, %vm6276_vm9  ;;  %v3312_v42 = vunpack.i.l.bf16 %v3311_v63  ;;  %v3308_v25 = vunpack.i.h.bf16 %v3306_v45  ;;  %v3307_v60 = vunpack.i.l.bf16 %v3306_v45  ;;  %2734 = vmatprep.subr.msk.bf16.mxu0 %vm2732_vm6, %v2733_v5  ;;  %2808 = vmatprep.subr.msk.bf16.mxu1 %vm2806_vm12, %v2807_v19  ;;  %vm1089_vm4 = vcmp.lt.s32.totalorder %v3797_v8, 2 }
 0x603   :  { %vm2809_vm3 = vmpackc.low %vm4895_vm0, %vm6277_vm15  ;;  %2737 = vmatpush1.bf16.msk.msra.mxu0 %vm2735_vm8, %v2736_v4  ;;  %vm6278_vm14 = vcmp.ge.s32.totalorder %v3803_v13, 2  ;;  %vm6282_vm6 = vcmp.lt.s32.totalorder %v3797_v8, 1  ;;  %vm6286_vm11 = vcmp.ge.s32.totalorder %v4011_v34, 2  ;;  %vm6287_vm12 = vcmp.ge.s32.totalorder %v4011_v34, 1 }
 0x604   :  { %2811 = vmatpush1.bf16.msk.msra.mxu1 %vm2809_vm3, %v2810_v20  ;;  %v3321_v41 = vpop.permute.xlu0 %3320  ;;  %v3316_v21 = vpop.permute.xlu1 %3315  ;;  %v1090_v47 = vsel %vm1089_vm4, %v3312_v42, %v3313_v39  ;;  %v1091_v0 = vsel %vm1089_vm4, %v3308_v25, %v3312_v42  ;;  %v1092_v58 = vsel %vm1089_vm4, %v3307_v60, %v3308_v25  ;;  %v1093_v38 = vsel %vm1089_vm4, %v3313_v39, %v3307_v60  ;;  %vm4929_vm2 = vmpackc.low %vm6279_vm10, %vm6278_vm14 }
 0x605   :  { %v3323_v16 = vunpack.i.h.bf16 %v3321_v41  ;;  %v3322_v17 = vunpack.i.l.bf16 %v3321_v41  ;;  %v3318_v61 = vunpack.i.h.bf16 %v3316_v21  ;;  %v3317_v10 = vunpack.i.l.bf16 %v3316_v21  ;;  %vm6283_vm5 = vmmov %vm6282_vm6 }
 0x606   :  { %vm6284_vm13 = vmmov %vm6283_vm5  ;;  %vm6288_vm8 = vcmp.ge.s32.totalorder %v3808_v15, 2  ;;  %vm6289_vm15 = vcmp.ge.s32.totalorder %v3808_v15, 1  ;;  %vm6290_vm4 = vcmp.ge.s32.totalorder %v4028_v46, 2  ;;  %vm6291_vm14 = vcmp.ge.s32.totalorder %v4028_v46, 1 }
 0x607   :  { %v1114_v24 = vsel %vm6282_vm6, %v3322_v17, %v3323_v16  ;;  %v1115_v30 = vsel %vm6283_vm5, %v3318_v61, %v3322_v17  ;;  %v1116_v52 = vsel %vm6284_vm13, %v3317_v10, %v3318_v61  ;;  %vm6285_vm0 = vmmov %vm6283_vm5  ;;  %vm6292_vm6 = vcmp.lt.s32.totalorder %v3797_v8, 127 }
 0x608   :  { %v1117_v26 = vsel %vm6285_vm0, %v3323_v16, %v3317_v10  ;;  %vm2812_vm9 = vmpackc.low %vm6287_vm12, %vm6286_vm11  ;;  %v2813_v35 = vpack.c.bf16 %v1114_v24, %v1090_v47  ;;  %v2739_v54 = vpack.c.bf16 %v1116_v52, %v1092_v58  ;;  %v2816_v6 = vpack.c.bf16 %v1115_v30, %v1091_v0  ;;  %v3331_v28 = vpop.permute.xlu0 %3330  ;;  %v3326_v32 = vpop.permute.xlu1 %3325 }
 0x609   :  { %v2742_v11 = vpack.c.bf16 %v1117_v26, %v1093_v38  ;;  %vm2741_vm3 = vmpackc.low %vm6289_vm15, %vm6288_vm8  ;;  %v3333_v18 = vunpack.i.h.bf16 %v3331_v28  ;;  %v3332_v7 = vunpack.i.l.bf16 %v3331_v28  ;;  %v3328_v40 = vunpack.i.h.bf16 %v3326_v32 }
 0x60a   :  { %v3327_v9 = vunpack.i.l.bf16 %v3326_v32  ;;  %vm2815_vm10 = vmpackc.low %vm6291_vm14, %vm6290_vm4  ;;  %2740 = vmatprep.subr.msk.bf16.mxu0 %vm4929_vm2, %v2739_v54  ;;  %2814 = vmatprep.subr.msk.bf16.mxu1 %vm2812_vm9, %v2813_v35  ;;  %v6296_v22 = vmax.f32 %v4439_v53, 0.0  ;;  %v6297_v5 = vmax.f32 %v4437_v33, 0.0  ;;  %v6298_v20 = vmax.f32 %v4435_v2, 0.0 }
 0x60b   :  { %v1130_v3 = vsel %vm6292_vm6, %v3332_v7, %v3333_v18  ;;  %vm6293_vm5 = vmmov %vm6292_vm6  ;;  %2743 = vmatpush1.bf16.msk.msra.mxu0 %vm2741_vm3, %v2742_v11  ;;  %v6299_v45 = vmax.f32 %v4441_v23, 0.0  ;;  %2817 = vmatpush1.bf16.msk.msra.mxu1 %vm2815_vm10, %v2816_v6  ;;  %vm6300_vm2 = vcmp.ge.s32.totalorder %v3803_v13, 2  ;;  %vm6301_vm11 = vcmp.lt.s32.totalorder %v3801_v12, 15 }
 0x60c   :  { %v1131_v59 = vsel %vm6293_vm5, %v3328_v40, %v3332_v7  ;;  %vm6294_vm13 = vmmov %vm6293_vm5  ;;  %v2822_v19 = vpack.c.bf16 %v1130_v3, %v6296_v22  ;;  %v3341_v42 = vpop.permute.xlu0 %3340  ;;  %v3336_v25 = vpop.permute.xlu1 %3335  ;;  %vm6302_vm9 = vnez %v6034_v56  ;;  %vm6303_vm8 = vnez %v6090_v1 }
 0x60d   :  { %v1132_v48 = vsel %vm6294_vm13, %v3327_v9, %v3328_v40  ;;  %vm6295_vm0 = vmmov %vm6293_vm5  ;;  %v2745_v4 = vpack.c.bf16 %v1131_v59, %v6297_v5  ;;  %v3343_v60 = vunpack.i.h.bf16 %v3341_v42  ;;  %v3342_v53 = vunpack.i.l.bf16 %v3341_v42 }
 0x60e   :  { %v1133_v44 = vsel %vm6295_vm0, %v3333_v18, %v3327_v9  ;;  %v2748_v63 = vpack.c.bf16 %v1132_v48, %v6298_v20  ;;  %vm144_vm12 = vmand %vm6301_vm11, %vm6300_vm2  ;;  %v3338_v41 = vunpack.i.h.bf16 %v3336_v25  ;;  %v3337_v21 = vunpack.i.l.bf16 %v3336_v25 }
 0x60f   :  { %v2819_v39 = vpack.c.bf16 %v1133_v44, %v6299_v45  ;;  %2746 = vmatprep.subr.msk.bf16.mxu0 %vm6302_vm9, %v2745_v4  ;;  %vm1146_vm15 = vcmp.lt.s32.totalorder %v3797_v8, 126  ;;  %vm6304_vm3 = vnez %v6036_v62  ;;  %vm6305_vm4 = vcmp.lt.s32.totalorder %v3803_v13, 14 }
 0x610   :  { %2749 = vmatpush1.bf16.msk.msra.mxu0 %vm6304_vm3, %v2748_v63  ;;  %vm4984_vm14 = vmpackc.low %vm144_vm12, %vm6305_vm4  ;;  %vm6308_vm10 = vnez %v6099_v51  ;;  %vm1171_vm6 = vcmp.lt.s32.totalorder %v3797_v8, 114  ;;  %v3351_v56 = vpop.permute.xlu0 %3350  ;;  %v3346_v33 = vpop.permute.xlu1 %3345  ;;  %vm6309_vm5 = vcmp.ge.s32.totalorder %v4011_v34, 2  ;;  %vm6310_vm13 = vcmp.lt.s32.totalorder %v4009_v31, 15 }
 0x611   :  { %2820 = vmatprep.subr.msk.bf16.mxu1 %vm6303_vm8, %v2819_v39  ;;  %vm4995_vm0 = vmand %vm6310_vm13, %vm6309_vm5  ;;  %v3353_v1 = vunpack.i.h.bf16 %v3351_v56  ;;  %v3352_v23 = vunpack.i.l.bf16 %v3351_v56  ;;  %v3348_v16 = vunpack.i.h.bf16 %v3346_v33  ;;  %v3347_v17 = vunpack.i.l.bf16 %v3346_v33 }
 0x612   :  { %2823 = vmatpush1.bf16.msk.msra.mxu1 %vm6308_vm10, %v2822_v19  ;;  %vm6313_vm2 = vcmp.ge.s32.totalorder %v3808_v15, 2  ;;  %vm6314_vm11 = vcmp.lt.s32.totalorder %v3805_v14, 15  ;;  %v1147_v61 = vsel %vm1146_vm15, %v3342_v53, %v3343_v60  ;;  %v1148_v10 = vsel %vm1146_vm15, %v3338_v41, %v3342_v53 }
 0x613   :  { %vm5003_vm12 = vmand %vm6314_vm11, %vm6313_vm2  ;;  %v1149_v47 = vsel %vm1146_vm15, %v3337_v21, %v3338_v41  ;;  %v1150_v0 = vsel %vm1146_vm15, %v3343_v60, %v3337_v21  ;;  %vm6317_vm9 = vcmp.ge.s32.totalorder %v4028_v46, 2  ;;  %vm6318_vm8 = vcmp.lt.s32.totalorder %v4026_v43, 15 }
 0x614   :  { %vm145_vm3 = vmand %vm6318_vm8, %vm6317_vm9  ;;  %v1172_v58 = vsel %vm1171_vm6, %v3352_v23, %v3353_v1  ;;  %v1173_v38 = vsel %vm1171_vm6, %v3348_v16, %v3352_v23  ;;  %v1174_v36 = vsel %vm1171_vm6, %v3347_v17, %v3348_v16  ;;  %v1175_v24 = vsel %vm1171_vm6, %v3353_v1, %v3347_v17  ;;  %v3361_v54 = vpop.permute.xlu0 %3360  ;;  %v3356_v11 = vpop.permute.xlu1 %3355  ;;  %v3538_v16 = vld [vmem:[%s5929_s16 + $0x90] sm:$0xff]  }
 0x615   :  { %vm6319_vm4 = vcmp.lt.s32.totalorder %v4011_v34, 14  ;;  %v2828_v30 = vpack.c.bf16 %v1172_v58, %v1147_v61  ;;  %v2751_v52 = vpack.c.bf16 %v1173_v38, %v1148_v10  ;;  %v2754_v26 = vpack.c.bf16 %v1174_v36, %v1149_v47  ;;  %vm2753_vm10 = vmpackc.low %vm5003_vm12, %vm6009_vm1 }
 0x616   :  { %vm2824_vm15 = vmpackc.low %vm4995_vm0, %vm6319_vm4  ;;  %v2825_v35 = vpack.c.bf16 %v1175_v24, %v1150_v0  ;;  %v3363_v6 = vunpack.i.h.bf16 %v3361_v54  ;;  %v3362_v28 = vunpack.i.l.bf16 %v3361_v54  ;;  %v3358_v32 = vunpack.i.h.bf16 %v3356_v11  ;;  %v6369_v54 = vld [vmem:[#allocation2_spill] sm:$0xff] }
 0x617   :  { %vm2827_vm5 = vmpackc.low %vm145_vm3, %vm6010_vm7  ;;  %v3357_v18 = vunpack.i.l.bf16 %v3356_v11  ;;  %2752 = vmatprep.subr.msk.bf16.mxu0 %vm4984_vm14, %v2751_v52  ;;  %vm6320_vm6 = vcmp.lt.s32.totalorder %v3803_v13, 14  ;;  %vm6321_vm13 = vcmp.lt.s32.totalorder %v3801_v12, 15  ;;  %vm6011_vm2 = vcmp.lt.s32.totalorder %v3801_v12, 14 }
 0x618   :  { %2826 = vmatprep.subr.msk.bf16.mxu1 %vm2824_vm15, %v2825_v35  ;;  %2755 = vmatpush1.bf16.msk.msra.mxu0 %vm2753_vm10, %v2754_v26  ;;  %v3371_v7 = vpop.permute.xlu0 %3370  ;;  %v3366_v40 = vpop.permute.xlu1 %3365  ;;  %vm5043_vm0 = vmand %vm6321_vm13, %vm6320_vm6  ;;  %vm6325_vm11 = vcmp.lt.s32.totalorder %v4009_v31, 15  ;;  %vm6328_vm9 = vcmp.lt.s32.totalorder %v3797_v8, 113  ;;  %vm6332_vm15 = vcmp.lt.s32.totalorder %v3805_v14, 15  ;;  %v6333_v63 = vmov 0 }
 0x619   :  { %2829 = vmatpush1.bf16.msk.msra.mxu1 %vm2827_vm5, %v2828_v30  ;;  %v3373_v3 = vunpack.i.h.bf16 %v3371_v7  ;;  %v3372_v59 = vunpack.i.l.bf16 %v3371_v7  ;;  %v3368_v48 = vunpack.i.h.bf16 %v3366_v40  ;;  %v3367_v44 = vunpack.i.l.bf16 %v3366_v40  ;;  %vm6324_vm14 = vmmov %vm6319_vm4 }
 0x61a   :  { %vm5052_vm12 = vmand %vm6325_vm11, %vm6324_vm14  ;;  %v1196_v19 = vsel %vm6328_vm9, %v3362_v28, %v3363_v6  ;;  %vm6335_vm5 = vcmp.lt.s32.totalorder %v3797_v8, 112  ;;  %vm6339_vm11 = vnez %v6044_v49 }
 0x61b   :  { %vm6329_vm8 = vmmov %vm6328_vm9  ;;  %v1212_v45 = vsel %vm6335_vm5, %v3372_v59, %v3373_v3 }
 0x61c   :  { %v1197_v5 = vsel %vm6329_vm8, %v3358_v32, %v3362_v28  ;;  %vm6330_vm3 = vmmov %vm6329_vm8  ;;  %v2834_v60 = vpack.c.bf16 %v1212_v45, %v1196_v19  ;;  %v3381_v2 = vpop.permute.xlu0 %3380  ;;  %v3376_v56 = vpop.permute.xlu1 %3375  ;;  %vm6340_vm8 = vnez %v6096_v50 }
 0x61d   :  { %v1198_v4 = vsel %vm6330_vm3, %v3357_v18, %v3358_v32  ;;  %vm6331_vm4 = vmmov %vm6330_vm3  ;;  %v3383_v33 = vunpack.i.h.bf16 %v3381_v2  ;;  %v3382_v62 = vunpack.i.l.bf16 %v3381_v2  ;;  %v3378_v1 = vunpack.i.h.bf16 %v3376_v56 }
 0x61e   :  { %v1199_v20 = vsel %vm6331_vm4, %v3363_v6, %v3357_v18  ;;  %vm5068_vm10 = vmand %vm6332_vm15, %vm6009_vm1  ;;  %v3377_v23 = vunpack.i.l.bf16 %v3376_v56  ;;  %vm6347_vm15 = vnez %v6041_v37  ;;  %vm6348_vm3 = vcmp.ge.s32.totalorder %v3803_v13, 2  ;;  %v3548_v37 = vld [vmem:[%s5929_s16 + $0xe8] sm:$0xff]  }
 0x61f   :  { %v6334_v63 = vsel %vm5068_vm10, 4294967295, %v6333_v63  ;;  %vm6336_vm6 = vmmov %vm6335_vm5  ;;  %vm6362_vm4 = vcmp.ge.s32.totalorder %v4011_v34, 1  ;;  %vm6365_vm10 = vcmp.lt.s32.totalorder %v3797_v8, 110 }
 0x620   :  { %v1213_v39 = vsel %vm6336_vm6, %v3368_v48, %v3372_v59  ;;  %vm6337_vm13 = vmmov %vm6335_vm5  ;;  %vm6342_vm6 = vnez %v6039_v27  ;;  %v3386_v17 = vpop.permute.xlu1 %3385 }
 0x621   :  { %v1214_v42 = vsel %vm6337_vm13, %v3367_v44, %v3368_v48  ;;  %vm6338_vm14 = vmmov %vm6335_vm5  ;;  %v2757_v53 = vpack.c.bf16 %v1213_v39, %v1197_v5  ;;  %vm6013_vm5 = vcmp.lt.s32.totalorder %v4009_v31, 14  ;;  %vm6343_vm13 = vnez %v6106_v29  ;;  %v3391_v29 = vpop.permute.xlu0 %3390 }
 0x622   :  { %v1215_v25 = vsel %vm6338_vm14, %v3373_v3, %v3367_v44  ;;  %v2760_v41 = vpack.c.bf16 %v1214_v42, %v1198_v4  ;;  %vm6344_vm14 = vcmp.lt.s32.totalorder %v4026_v43, 15  ;;  %vm5111_vm9 = vmand %vm6011_vm2, %vm6348_vm3  ;;  %v3393_v51 = vunpack.i.h.bf16 %v3391_v29 }
 0x623   :  { %v2831_v21 = vpack.c.bf16 %v1215_v25, %v1199_v20  ;;  %2758 = vmatprep.subr.msk.bf16.mxu0 %vm6342_vm6, %v2757_v53  ;;  %vm5101_vm1 = vmand %vm6344_vm14, %vm6010_vm7  ;;  %vm6351_vm6 = vnez %v6112_v55  ;;  %vm6352_vm14 = vcmp.ge.s32.totalorder %v3803_v13, 1  ;;  %v3392_v61 = vunpack.i.l.bf16 %v3391_v29 }
 0x624   :  { %2761 = vmatpush1.bf16.msk.msra.mxu0 %vm6347_vm15, %v2760_v41  ;;  %vm5122_vm15 = vmand %vm6011_vm2, %vm6352_vm14  ;;  %v3388_v10 = vunpack.i.h.bf16 %v3386_v17  ;;  %v3387_v47 = vunpack.i.l.bf16 %v3386_v17  ;;  %v6356_v55 = vmov 0  ;;  %v3396_v7 = vpop.permute.xlu1 %3395  ;;  %v6403_v29 = vmov 0 }
 0x625   :  { %2832 = vmatprep.subr.msk.bf16.mxu1 %vm6343_vm13, %v2831_v21  ;;  %vm6358_vm13 = vcmp.lt.s32.totalorder %v3797_v8, 111  ;;  %v1245_v30 = vsel %vm6365_vm10, %v3392_v61, %v3393_v51  ;;  %v3401_v18 = vpop.permute.xlu0 %3400  ;;  %v3398_v59 = vunpack.i.h.bf16 %v3396_v7  ;;  %v3397_v48 = vunpack.i.l.bf16 %v3396_v7 }
 0x626   :  { %2835 = vmatpush1.bf16.msk.msra.mxu1 %vm6351_vm6, %v2834_v60  ;;  %vm6355_vm6 = vcmp.ge.s32.totalorder %v4011_v34, 2  ;;  %v1228_v0 = vsel %vm6358_vm13, %v3382_v62, %v3383_v33  ;;  %vm6359_vm14 = vmmov %vm6358_vm13  ;;  %v3403_v40 = vunpack.i.h.bf16 %v3401_v18  ;;  %v3402_v3 = vunpack.i.l.bf16 %v3401_v18 }
 0x627   :  { %vm5131_vm7 = vmand %vm6013_vm5, %vm6355_vm6  ;;  %v1229_v58 = vsel %vm6359_vm14, %v3378_v1, %v3382_v62  ;;  %v2840_v11 = vpack.c.bf16 %v1245_v30, %v1228_v0 }
 0x628   :  { %v6357_v55 = vsel %vm5131_vm7, 4294967295, %v6356_v55  ;;  %vm6360_vm2 = vmmov %vm6358_vm13  ;;  %vm6377_vm7 = vnez %v6334_v63 }
 0x629   :  { %v1230_v38 = vsel %vm6360_vm2, %v3377_v23, %v3378_v1  ;;  %vm6361_vm3 = vmmov %vm6360_vm2  ;;  %v3411_v50 = vpop.permute.xlu0 %3410 }
 0x62a   :  { %v1231_v36 = vsel %vm6361_vm3, %v3383_v33, %v3377_v23  ;;  %vm5147_vm6 = vmand %vm6013_vm5, %vm6362_vm4  ;;  %vm6370_vm3 = vnez %v6369_v54  ;;  %vm6374_vm5 = vcmp.lt.s32.totalorder %v3805_v14, 14  ;;  %vm1269_vm4 = vcmp.lt.s32.totalorder %v3797_v8, 98 }
 0x62b   :  { %vm6366_vm13 = vmmov %vm6365_vm10  ;;  %v3413_v22 = vunpack.i.h.bf16 %v3411_v50  ;;  %v3412_v19 = vunpack.i.l.bf16 %v3411_v50  ;;  %v1270_v63 = vsel %vm1269_vm4, %v3402_v3, %v3403_v40  ;;  %v1271_v45 = vsel %vm1269_vm4, %v3398_v59, %v3402_v3 }
 0x62c   :  { %v1246_v52 = vsel %vm6366_vm13, %v3388_v10, %v3392_v61  ;;  %vm6367_vm14 = vmmov %vm6365_vm10  ;;  %vm6373_vm13 = vcmp.ge.s32.totalorder %v3808_v15, 2  ;;  %v1272_v39 = vsel %vm1269_vm4, %v3397_v48, %v3398_v59  ;;  %v1273_v42 = vsel %vm1269_vm4, %v3403_v40, %v3397_v48 }
 0x62d   :  { %v1247_v26 = vsel %vm6367_vm14, %v3387_v47, %v3388_v10  ;;  %vm6368_vm2 = vmmov %vm6365_vm10  ;;  %v2763_v6 = vpack.c.bf16 %v1246_v52, %v1229_v58  ;;  %v3421_v1 = vpop.permute.xlu0 %3420 }
 0x62e   :  { %v1248_v35 = vsel %vm6368_vm2, %v3393_v51, %v3387_v47  ;;  %v2766_v28 = vpack.c.bf16 %v1247_v26, %v1230_v38  ;;  %vm6371_vm2 = vmpackc.low %vm5043_vm0, %vm6339_vm11  ;;  %vm6378_vm0 = vnez %v6048_v57  ;;  %v3406_v57 = vpop.permute.xlu1 %3405  ;;  %v3423_v17 = vunpack.i.h.bf16 %v3421_v1  ;;  %v3553_v38 = vld [vmem:[%s5929_s16 + $0x30] sm:$0xff]  }
 0x62f   :  { %v2837_v32 = vpack.c.bf16 %v1248_v35, %v1231_v36  ;;  %2764 = vmatprep.subr.msk.bf16.mxu0 %vm6371_vm2, %v2763_v6  ;;  %vm6372_vm10 = vmpackc.low %vm5052_vm12, %vm6340_vm8  ;;  %vm6380_vm2 = vcmp.ge.s32.totalorder %v3808_v15, 1  ;;  %v3408_v5 = vunpack.i.h.bf16 %v3406_v57  ;;  %v3407_v4 = vunpack.i.l.bf16 %v3406_v57 }
 0x630   :  { %vm5186_vm14 = vmand %vm6374_vm5, %vm6373_vm13  ;;  %vm6386_vm13 = vcmp.lt.s32.totalorder %v4026_v43, 14  ;;  %v3422_v51 = vunpack.i.l.bf16 %v3421_v1  ;;  %v3536_v1 = vld [vmem:[%s5929_s16 + $0xd0] sm:$0xff]  }
 0x631   :  { %2838 = vmatprep.subr.msk.bf16.mxu1 %vm6372_vm10, %v2837_v32  ;;  %vm6379_vm11 = vmpackc.low %vm6377_vm7, %vm6378_vm0  ;;  %vm1294_vm10 = vcmp.lt.s32.totalorder %v3797_v8, 97  ;;  %vm6385_vm7 = vcmp.ge.s32.totalorder %v4028_v46, 2 }
 0x632   :  { %2767 = vmatpush1.bf16.msk.msra.mxu0 %vm6379_vm11, %v2766_v28  ;;  %vm6381_vm12 = vmmov %vm6374_vm5  ;;  %vm6389_vm11 = vcmp.ge.s32.totalorder %v4028_v46, 1  ;;  %v1295_v60 = vsel %vm1294_vm10, %v3412_v19, %v3413_v22  ;;  %v1296_v53 = vsel %vm1294_vm10, %v3408_v5, %v3412_v19  ;;  %v1297_v41 = vsel %vm1294_vm10, %v3407_v4, %v3408_v5  ;;  %v3416_v23 = vpop.permute.xlu1 %3415 }
 0x633   :  { %vm5200_vm8 = vmand %vm6381_vm12, %vm6380_vm2  ;;  %vm6393_vm2 = vcmp.lt.s32.totalorder %v3803_v13, 15  ;;  %vm6394_vm12 = vcmp.lt.s32.totalorder %v3801_v12, 14  ;;  %v1298_v21 = vsel %vm1294_vm10, %v3413_v22, %v3407_v4  ;;  %v2846_v2 = vpack.c.bf16 %v1295_v60, %v1270_v63  ;;  %v3526_v60 = vld [vmem:[%s5928_s7] ss:$8 sps:$4 sm:$0xff]  }
 0x634   :  { %vm6384_vm5 = vmpackc.low %vm5101_vm1, %vm6370_vm3  ;;  %v2769_v56 = vpack.c.bf16 %v1296_v53, %v1271_v45  ;;  %v2772_v33 = vpack.c.bf16 %v1297_v41, %v1272_v39  ;;  %v2843_v62 = vpack.c.bf16 %v1298_v21, %v1273_v42  ;;  %v3418_v61 = vunpack.i.h.bf16 %v3416_v23  ;;  %v3527_v45 = vld [vmem:[%s5929_s16 + $0x40] sm:$0xff]   ;;  %v3531_v21 = vld [vmem:[%s5929_s16 + $0x48] sm:$0xff]  }
 0x635   :  { %2841 = vmatpush1.bf16.msk.msra.mxu1 %vm6384_vm5, %v2840_v11  ;;  %vm5214_vm0 = vmand %vm6386_vm13, %vm6385_vm7  ;;  %v3417_v10 = vunpack.i.l.bf16 %v3416_v23  ;;  %v3528_v39 = vld [vmem:[%s5929_s16 + $0xc0] sm:$0xff]   ;;  %v3537_v23 = vld [vmem:[%s5929_s16 + $0x10] sm:$0xff]  }
 0x636   :  { %vm6390_vm1 = vmmov %vm6386_vm13  ;;  %vm6397_vm13 = vcmp.lt.s32.totalorder %v3803_v13, 14  ;;  %v3426_v27 = vpop.permute.xlu1 %3425  ;;  %v3529_v53 = vld [vmem:[%s5929_s16] sm:$0xff]   ;;  %v3540_v13 = vld [vmem:[%s5929_s16 + $0xd8] sm:$0xff]  }
 0x637   :  { %vm5222_vm3 = vmand %vm6390_vm1, %vm6389_vm11  ;;  %vm6401_vm1 = vcmp.lt.s32.totalorder %v4011_v34, 14  ;;  %v3428_v0 = vunpack.i.h.bf16 %v3426_v27  ;;  %v3427_v58 = vunpack.i.l.bf16 %v3426_v27  ;;  %v3530_v41 = vld [vmem:[%s5929_s16 + $0x80] sm:$0xff]   ;;  %v3547_v27 = vld [vmem:[%s5929_s16 + $0x68] sm:$0xff]  }
 0x638   :  { %vm5238_vm5 = vmand %vm6394_vm12, %vm6393_vm2  ;;  %vm6402_vm2 = vcmp.lt.s32.totalorder %v4009_v31, 14  ;;  %v3545_v12 = vld [vmem:[%s5929_s16 + $0x20] sm:$0xff]   ;;  %v3558_v31 = vld [vmem:[%s5929_s16 + $0xb8] sm:$0xff]  }
 0x639   :  { %vm2845_vm7 = vmpackc.low %vm5222_vm3, %vm5214_vm0 }
 0x63a   :  { %vm6398_vm10 = vmmov %vm6394_vm12  ;;  %v3436_v3 = vpop.permute.xlu1 %3435 }
 0x63b   :  { %vm5262_vm11 = vmand %vm6398_vm10, %vm6397_vm13  ;;  %vm6409_vm13 = vnez %v6357_v55  ;;  %v3438_v49 = vunpack.i.h.bf16 %v3436_v3  ;;  %v3437_v50 = vunpack.i.l.bf16 %v3436_v3 }
 0x63c   :  { %vm5270_vm12 = vmand %vm6402_vm2, %vm6401_vm1 }
 0x63d   :  { %v6404_v29 = vsel %vm5270_vm12, 4294967295, %v6403_v29  ;;  %vm6405_vm4 = vmmov %vm6398_vm10 }
 0x63e   :  { %vm5278_vm0 = vmpackc.low %vm5238_vm5, %vm6405_vm4  ;;  %vm6411_vm5 = vcmp.lt.s32.totalorder %v4011_v34, 15  ;;  %v3431_v34 = vpop.permute.xlu0 %3430 }
 0x63f   :  { %vm6408_vm3 = vmpackc.low %vm5122_vm15, %vm5111_vm9  ;;  %vm6414_vm9 = vcmp.lt.s32.totalorder %v3808_v15, 15  ;;  %vm6415_vm15 = vcmp.lt.s32.totalorder %v3805_v14, 14  ;;  %v3433_v47 = vunpack.i.h.bf16 %v3431_v34  ;;  %v3432_v55 = vunpack.i.l.bf16 %v3431_v34  ;;  %v3546_v34 = vld [vmem:[%s5929_s16 + $0xa0] sm:$0xff]  }
 0x640   :  { %2770 = vmatprep.subr.msk.bf16.mxu0 %vm6408_vm3, %v2769_v56  ;;  %vm6410_vm10 = vmpackc.low %vm5147_vm6, %vm6409_vm13  ;;  %vm1344_vm6 = vcmp.lt.s32.totalorder %v3797_v8, 95  ;;  %vm1369_vm13 = vcmp.lt.s32.totalorder %v3797_v8, 94  ;;  %v3533_v56 = vld [vmem:[%s5929_s16 + $0x8] sm:$0xff]  }
 0x641   :  { %2844 = vmatprep.subr.msk.bf16.mxu1 %vm6410_vm10, %v2843_v62  ;;  %vm6412_vm4 = vmmov %vm6402_vm2  ;;  %vm1319_vm2 = vcmp.lt.s32.totalorder %v3797_v8, 96  ;;  %vm6418_vm10 = vcmp.lt.s32.totalorder %v4028_v46, 15  ;;  %v1345_v26 = vsel %vm1344_vm6, %v3432_v55, %v3433_v47  ;;  %v1346_v35 = vsel %vm1344_vm6, %v3428_v0, %v3432_v55  ;;  %v3535_v62 = vld [vmem:[%s5929_s16 + $0x50] sm:$0xff]   ;;  %v3550_v55 = vld [vmem:[%s5929_s16 + $0xa8] sm:$0xff]  }
 0x642   :  { %vm174_vm1 = vmand %vm6412_vm4, %vm6411_vm5  ;;  %2847 = vmatpush1.bf16.msk.msra.mxu1 %vm2845_vm7, %v2846_v2  ;;  %v1320_v36 = vsel %vm1319_vm2, %v3422_v51, %v3423_v17  ;;  %v1321_v24 = vsel %vm1319_vm2, %v3418_v61, %v3422_v51  ;;  %v1322_v30 = vsel %vm1319_vm2, %v3417_v10, %v3418_v61  ;;  %v1323_v52 = vsel %vm1319_vm2, %v3423_v17, %v3417_v10  ;;  %v3441_v40 = vpop.permute.xlu0 %3440  ;;  %v3532_v2 = vld [vmem:[%s5929_s16 + $0xc8] sm:$0xff]   ;;  %v3541_v17 = vld [vmem:[%s5929_s16 + $0x18] sm:$0xff]  }
 0x643   :  { %vm6413_vm12 = vmpackc.low %vm5200_vm8, %vm5186_vm14  ;;  %vm6419_vm14 = vcmp.lt.s32.totalorder %v4026_v43, 14  ;;  %v1347_v54 = vsel %vm1344_vm6, %v3427_v58, %v3428_v0  ;;  %v1348_v11 = vsel %vm1344_vm6, %v3433_v47, %v3427_v58  ;;  %v2852_v28 = vpack.c.bf16 %v1345_v26, %v1320_v36  ;;  %v3542_v51 = vld [vmem:[%s5929_s16 + $0x98] sm:$0xff]   ;;  %v3543_v61 = vld [vmem:[%s5929_s16 + $0x60] sm:$0xff]  }
 0x644   :  { %2773 = vmatpush1.bf16.msk.msra.mxu0 %vm6413_vm12, %v2772_v33  ;;  %vm5306_vm3 = vmand %vm6415_vm15, %vm6414_vm9  ;;  %v2775_v32 = vpack.c.bf16 %v1346_v35, %v1321_v24  ;;  %v2778_v18 = vpack.c.bf16 %v1347_v54, %v1322_v30  ;;  %v2849_v7 = vpack.c.bf16 %v1348_v11, %v1323_v52  ;;  %vm6431_vm9 = vcmp.lt.s32.totalorder %v3808_v15, 14  ;;  %v3534_v33 = vld [vmem:[%s5929_s16 + $0x88] sm:$0xff]   ;;  %v3544_v10 = vld [vmem:[%s5929_s16 + $0xe0] sm:$0xff]  }
 0x645   :  { %vm5316_vm8 = vmand %vm6419_vm14, %vm6418_vm10  ;;  %v3443_v48 = vunpack.i.h.bf16 %v3441_v40  ;;  %v3442_v44 = vunpack.i.l.bf16 %v3441_v40  ;;  %vm6435_vm6 = vcmp.lt.s32.totalorder %v4028_v46, 14  ;;  %v1372_v57 = vsel %vm1369_vm13, %v3437_v50, %v3438_v49  ;;  %v3549_v47 = vld [vmem:[%s5929_s16 + $0x28] sm:$0xff]   ;;  %v3551_v0 = vld [vmem:[%s5929_s16 + $0x70] sm:$0xff]  }
 0x646   :  { %vm6422_vm7 = vmmov %vm6412_vm4  ;;  %2776 = vmatprep.subr.msk.bf16.mxu0 %vm5278_vm0, %v2775_v32  ;;  %vm6437_vm0 = vnez %v6404_v29  ;;  %v3539_v29 = vld [vmem:[%s5929_s16 + $0x58] sm:$0xff]   ;;  %v3552_v58 = vld [vmem:[%s5929_s16 + $0xf0] sm:$0xff]   ;;  %v6442_v26 = vmov 0  }
 0x647   :  { %vm5322_vm12 = vmpackc.low %vm174_vm1, %vm6422_vm7  ;;  %v1370_v14 = vsel %vm1369_vm13, %v3442_v44, %v3443_v48  ;;  %v1371_v15 = vsel %vm1369_vm13, %v3438_v49, %v3442_v44  ;;  %v1373_v46 = vsel %vm1369_vm13, %v3443_v48, %v3437_v50  ;;  %v3554_v36 = vld [vmem:[%s5929_s16 + $0xb0] sm:$0xff]   ;;  %v3555_v24 = vld [vmem:[%s5929_s16 + $0x78] sm:$0xff]  }
 0x648   :  { %vm6425_vm5 = vmmov %vm6415_vm15  ;;  %2850 = vmatprep.subr.msk.bf16.mxu1 %vm5322_vm12, %v2849_v7  ;;  %v1383_v43 = vsel %vm5262_vm11, %v1371_v15, 0.0  ;;  %v1385_v9 = vsel %vm6437_vm0, %v1373_v46, 0.0  ;;  %vm6438_vm11 = vcmask 1043456   ;;  %v3556_v30 = vld [vmem:[%s5929_s16 + $0xf8] sm:$0xff]   ;;  %vm2032_vm12 = vcmask 130048  }
 0x649   :  { %vm5338_vm4 = vmpackc.low %vm5306_vm3, %vm6425_vm5  ;;  %v1435_v5 = vpack.c.bf16 %v1383_v43, %v1383_v43  ;;  %v1437_v4 = vpack.c.bf16 %v1385_v9, %v1385_v9  ;;  %v3557_v52 = vld [vmem:[%s5929_s16 + $0x38] sm:$0xff]  }
 0x64a   :  { %vm6428_vm1 = vmmov %vm6419_vm14  ;;  %2779 = vmatpush1.bf16.msk.msra.mxu0 %vm5338_vm4, %v2778_v18 }
 0x64b   :  { %vm5354_vm2 = vmpackc.low %vm5316_vm8, %vm6428_vm1  ;;  %2780 = vmatprep.subr.msk.bf16.mxu0 %vm6438_vm11, %v1435_v5 }
 0x64c   :  { %vm6432_vm15 = vmmov %vm6425_vm5  ;;  %2853 = vmatpush1.bf16.msk.msra.mxu1 %vm5354_vm2, %v2852_v28 }
 0x64d   :  { %vm5362_vm3 = vmand %vm6432_vm15, %vm6431_vm9 }
 0x64e   :  { %vm6436_vm10 = vmmov %vm6428_vm1  ;;  %v1382_v22 = vsel %vm5362_vm3, %v1372_v57, 0.0 }
 0x64f   :  { %vm177_vm14 = vmand %vm6436_vm10, %vm6435_vm6  ;;  %v1434_v20 = vpack.c.bf16 %v1382_v22, %v1382_v22 }
 0x650   :  { %v1384_v19 = vsel %vm177_vm14, %v1370_v14, 0.0  ;;  %vm6439_vm13 = vmmov %vm6438_vm11 }
 0x651   :  { %v1436_v63 = vpack.c.bf16 %v1384_v19, %v1384_v19  ;;  %2854 = vmatprep.subr.msk.bf16.mxu1 %vm6439_vm13, %v1437_v4  ;;  %vm6440_vm8 = vmmov %vm6438_vm11 }
 0x652   :  { %v1453_v42 = vsel %vm6440_vm8, %v1434_v20, 0  ;;  %vm6441_vm7 = vmmov %vm6440_vm8 }
 0x653   :  { %v1459_v25 = vsel %vm6441_vm7, %v1436_v63, 0  ;;  %1489 = vmatpush1.bf16.msra.mxu0 %v1453_v42 }
 0x654   :  { %1532 = vmatpush1.bf16.msra.mxu1 %v1459_v25  ;;  %2980 = vmatprep.subr.bf16.mxu0 %v3527_v45 }
 0x655   :  { %3002 = vmatprep.subr.bf16.mxu1 %v3528_v39 }
 0x656   :  { %1497 = vmatmul.mubr.bf16.vlgmr.msra.gmra.mrb[4].mxu0 %v3526_v60 }
 0x657   :  { %1540 = vmatmul.mubr.bf16.vlgmr.msra.gmra.mrb[12].mxu1 %v3526_v60  ;;  %2981 = vmatpush3.bf16.msra.mxu0 %v3529_v53 }
 0x658   :  { %3003 = vmatpush3.bf16.msra.mxu1 %v3530_v41  ;;  %2982 = vmatprep.subr.bf16.mxu0 %v3531_v21 }
 0x659   :  { %3004 = vmatprep.subr.bf16.mxu1 %v3532_v2 }
 0x65b   :  { %2983 = vmatpush3.bf16.msra.mxu0 %v3533_v56 }
 0x65c   :  { %3005 = vmatpush3.bf16.msra.mxu1 %v3534_v33  ;;  %2984 = vmatprep.subr.bf16.mxu0 %v3535_v62 }
 0x65d   :  { %3006 = vmatprep.subr.bf16.mxu1 %v3536_v1 }
 0x65f   :  { %2985 = vmatpush3.bf16.msra.mxu0 %v3537_v23 }
 0x660   :  { %3007 = vmatpush3.bf16.msra.mxu1 %v3538_v16  ;;  %2986 = vmatprep.subr.bf16.mxu0 %v3539_v29  ;;  %v1915_v29 = vld [vmem:[%s5930_s8 + $0x8] sm:$0xff] }
 0x661   :  { %3008 = vmatprep.subr.bf16.mxu1 %v3540_v13 }
 0x663   :  { %2987 = vmatpush3.bf16.msra.mxu0 %v3541_v17  ;;  %v1914_v17 = vld [vmem:[%s5930_s8] sm:$0xff]  ;;  %s3615_s8 = smov 8  }
 0x664   :  { %3009 = vmatpush3.bf16.msra.mxu1 %v3542_v51  ;;  %2988 = vmatprep.subr.bf16.mxu0 %v3543_v61 }
 0x665   :  { %3010 = vmatprep.subr.bf16.mxu1 %v3544_v10 }
 0x667   :  { %2989 = vmatpush3.bf16.msra.mxu0 %v3545_v12  ;;  %v1932_v12 = vld [vmem:[%s5931_s9] sm:$0xff] }
 0x668   :  { %3011 = vmatpush3.bf16.msra.mxu1 %v3546_v34  ;;  %2990 = vmatprep.subr.bf16.mxu0 %v3547_v27  ;;  %v1933_v34 = vld [vmem:[%s5931_s9 + $0x8] sm:$0xff]  ;;  %s3617_s9 = smov 7  }
 0x669   :  { %3012 = vmatprep.subr.bf16.mxu1 %v3548_v37 }
 0x66b   :  { %2991 = vmatpush3.bf16.msra.mxu0 %v3549_v47 }
 0x66c   :  { %3013 = vmatpush3.bf16.msra.mxu1 %v3550_v55  ;;  %2992 = vmatprep.subr.bf16.mxu0 %v3551_v0 }
 0x66d   :  { %3014 = vmatprep.subr.bf16.mxu1 %v3552_v58 }
 0x66f   :  { %2993 = vmatpush3.bf16.msra.mxu0 %v3553_v38 }
 0x670   :  { %3015 = vmatpush3.bf16.msra.mxu1 %v3554_v36  ;;  %2994 = vmatprep.subr.bf16.mxu0 %v3555_v24 }
 0x671   :  { %3016 = vmatprep.subr.bf16.mxu1 %v3556_v30 }
 0x673   :  { %2995 = vmatpush3.bf16.msra.mxu0 %v3557_v52 }
 0x674   :  { %3017 = vmatpush3.bf16.msra.mxu1 %v3558_v31  ;;  %2036 = vmatprep.subr.bf16.mxu0 %v6442_v26 }
 0x675   :  { %2204 = vmatprep.subr.bf16.mxu1 %v6442_v26 }
 0x729   :  { %v1498_v35 = vpop.f32.mrb[4].mxu0 }
 0x72a   :  { %v1541_v54 = vpop.f32.mrb[12].mxu1  ;;  %v1500_v11 = vpop.f32.mrb[5].mxu0 }
 0x72b   :  { %v1543_v6 = vpop.f32.mrb[13].mxu1  ;;  %v1502_v28 = vpop.f32.mrb[6].mxu0 }
 0x72c   :  { %v1545_v32 = vpop.f32.mrb[14].mxu1  ;;  %v1550_v18 = vpack.c.bf16 %v1502_v28, %v1498_v35  ;;  %v1504_v40 = vpop.f32.mrb[7].mxu0 }
 0x72d   :  { %v1552_v7 = vpack.c.bf16 %v1545_v32, %v1541_v54  ;;  %v1547_v3 = vpop.f32.mrb[15].mxu1  ;;  %v1551_v59 = vpack.c.bf16 %v1504_v40, %v1500_v11  ;;  %v3559_v11 = vld [vmem:[%s5932_s10 + $0x4] ss:$8 sps:$4 sm:$0xff]   ;;  %v181_v32 = vand.u32 7, %v3797_v8 }
 0x72e   :  { %v1553_v48 = vpack.c.bf16 %v1547_v3, %v1543_v6  ;;  %v179_v6 = vshra.s32 %v3797_v8, 3 }
 0x72f   :  { %1842 = vmatprep.mubr.bf16.mxu0 %v1551_v59  ;;  %vm5523_vm4 = vcmp.ge.s32.totalorder %v181_v32, 1  ;;  %vm5537_vm9 = vcmp.lt.s32.totalorder %v181_v32, 7 }
 0x730   :  { %1883 = vmatprep.mubr.bf16.mxu1 %v1553_v48  ;;  %1843 = vmatmul.mubr.bf16.vlgmr.msra.gmra.mrb[8].mxu0 %v1550_v18  ;;  %v180_v28 = vand.u32 7, %v179_v6  ;;  %vm2899_vm10 = vmpackc.low %vm5523_vm4, %vm5523_vm4 }
 0x731   :  { %1884 = vmatmul.mubr.bf16.vlgmr.msra.gmra.mrb[16].mxu1 %v1552_v7  ;;  %2914 = vmatprep.mubr.msk.bf16.mxu0 %vm2032_vm12, %v3559_v11  ;;  %vm2902_vm0 = vmpackc.low %vm5537_vm9, %vm5537_vm9 }
 0x732   :  { %vm182_vm5 = vcmp.ge.s32.totalorder %v180_v28, 1  ;;  %vm187_vm14 = vcmp.lt.s32.totalorder %v180_v28, 7 }
 0x733   :  { %vm5530_vm1 = vmand %vm182_vm5, %vm5523_vm4 }
 0x734   :  { %vm2890_vm2 = vmpackc.low %vm5530_vm1, %vm5530_vm1  ;;  %vm2596_vm1 = vcmask 9216  }
 0x735   :  { %vm5549_vm15 = vmpackc.low %vm182_vm5, %vm182_vm5 }
 0x736   :  { %vm5556_vm3 = vmand %vm182_vm5, %vm5537_vm9 }
 0x737   :  { %vm2896_vm6 = vmpackc.low %vm5556_vm3, %vm5556_vm3 }
 0x738   :  { %vm5588_vm11 = vmand %vm187_vm14, %vm5523_vm4  ;;  %vm2594_vm4 = vcmask 15360  }
 0x739   :  { %vm2905_vm13 = vmpackc.low %vm5588_vm11, %vm5588_vm11 }
 0x73a   :  { %vm5609_vm8 = vmpackc.low %vm187_vm14, %vm187_vm14 }
 0x73b   :  { %vm5616_vm7 = vmand %vm187_vm14, %vm5537_vm9 }
 0x73c   :  { %vm2911_vm5 = vmpackc.low %vm5616_vm7, %vm5616_vm7 }
 0x803   :  { %v2996_v44 = vpop.f32.mrb[8].mxu0 }
 0x804   :  { %v3018_v49 = vpop.f32.mrb[16].mxu1  ;;  %v2997_v50 = vpop.f32.mrb[9].mxu0 }
 0x805   :  { %v3019_v14 = vpop.f32.mrb[17].mxu1  ;;  %v2998_v15 = vadd.f32 %v2997_v50, %v2996_v44  ;;  %v2999_v46 = vpop.f32.mrb[10].mxu0 }
 0x806   :  { %v3020_v57 = vadd.f32 %v3019_v14, %v3018_v49  ;;  %v3021_v43 = vpop.f32.mrb[18].mxu1  ;;  %v3000_v9 = vpop.f32.mrb[11].mxu0 }
 0x807   :  { %v3022_v22 = vpop.f32.mrb[19].mxu1  ;;  %v3001_v5 = vadd.f32 %v3000_v9, %v2999_v46 }
 0x808   :  { %v1886_v19 = vadd.f32 %v3020_v57, %v2998_v15  ;;  %v3023_v4 = vadd.f32 %v3022_v22, %v3021_v43 }
 0x80a   :  { %v1889_v20 = vadd.f32 %v3023_v4, %v3001_v5  ;;  %1892 = vadd.xlane.f32.xlu1 %v1886_v19  ;;  %v1898_v45 = vmul.f32 %v1886_v19, %v1886_v19 }
 0x80c   :  { %1894 = vadd.xlane.f32.xlu0 %v1889_v20  ;;  %v1899_v63 = vmul.f32 %v1889_v20, %v1889_v20 }
 0x80e   :  { %1902 = vadd.xlane.f32.xlu1 %v1899_v63 }
 0x810   :  { %1900 = vadd.xlane.f32.xlu0 %v1898_v45 }
 0x897   :  { %v1893_v39 = vpop.xlane.xlu1 %1892 }
 0x898   :  { %v1896_v25 = vmul.f32 0.0078125, %v1893_v39 }
 0x899   :  { %v1895_v42 = vpop.xlane.xlu0 %1894 }
 0x89a   :  { %v1897_v60 = vmul.f32 0.0078125, %v1895_v42  ;;  %v1906_v56 = vmul.f32 %v1896_v25, %v1896_v25  ;;  %v1918_v37 = vsub.f32 %v1886_v19, %v1896_v25 }
 0x89b   :  { %v1903_v53 = vpop.xlane.xlu1 %1902 }
 0x89c   :  { %v1907_v41 = vmul.f32 %v1897_v60, %v1897_v60  ;;  %v1905_v21 = vmul.f32 0.0078125, %v1903_v53  ;;  %v1919_v55 = vsub.f32 %v1889_v20, %v1897_v60 }
 0x89d   :  { %v1901_v2 = vpop.xlane.xlu0 %1900 }
 0x89e   :  { %v1909_v33 = vsub.f32 %v1905_v21, %v1907_v41  ;;  %v1904_v62 = vmul.f32 0.0078125, %v1901_v2 }
 0x8a0   :  { %v1911_v1 = vadd.f32 1e-05, %v1909_v33  ;;  %v1908_v23 = vsub.f32 %v1904_v62, %v1906_v56 }
 0x8a2   :  { %3577 = vrsqrt.f32 %v1911_v1  ;;  %v1910_v16 = vadd.f32 1e-05, %v1908_v23 }
 0x8a4   :  { %3579 = vrsqrt.f32 %v1910_v16 }
 0x8ac   :  { %v3578_v13 = vpop.eup %3577 }
 0x8ad   :  { %v1917_v51 = vmul.f32 %v3578_v13, %v1915_v29  ;;  %v2285_v13 = vld [vmem:[%s5936_s15] sm:$0xff] }
 0x8ae   :  { %v3580_v61 = vpop.eup %3579 }
 0x8af   :  { %1927 = vperm.xlu1 %3128, %v1917_v51   ;;  %v1916_v10 = vmul.f32 %v3580_v61, %v1914_v17  ;;  %v3561_v51 = vld [vmem:[%s5932_s10] ss:$8 sps:$4 sm:$0xff]  }
 0x8b1   :  { %1922 = vperm.xlu0 %3127, %v1916_v10  }
 0x8b3   :  { %1936 = vperm.xlu1 %3128, %v1932_v12  }
 0x8b5   :  { %1941 = vperm.xlu0 %3127, %v1933_v34  }
 0x92e   :  { %v1928_v27 = vpop.permute.xlu1 %1927 }
 0x92f   :  { %v1931_v38 = vmul.f32 %v1928_v27, %v1919_v55 }
 0x930   :  { %v1923_v47 = vpop.permute.xlu0 %1922 }
 0x931   :  { %v1930_v0 = vmul.f32 %v1923_v47, %v1918_v37 }
 0x932   :  { %v1937_v58 = vpop.permute.xlu1 %1936 }
 0x933   :  { %v1944_v36 = vadd.f32 %v1937_v58, %v1930_v0 }
 0x934   :  { %v1942_v24 = vpop.permute.xlu0 %1941 }
 0x935   :  { %v1945_v30 = vadd.f32 %v1942_v24, %v1931_v38  ;;  %v1946_v52 = vmax.f32 %v1944_v36, 0.0 }
 0x937   :  { %v1947_v31 = vmax.f32 %v1945_v30, 0.0 }
 0x939   :  { %v3449_v35 = vpack.i.bf16 %v1947_v31, %v1946_v52  ;;  %v2016_v54 = vpack.c.bf16 %v1947_v31, %v1946_v52 }
 0x93b   :  { %3450 = vrot.lane.b32.xlu0 %v3449_v35, %s3615_s8  ;;  %3445 = vrot.lane.b32.xlu1 %v3449_v35, %s3616_s1 }
 0x93f   :  { %3460 = vrot.lane.b32.xlu0 %v3449_v35, %s3591_s28  ;;  %3455 = vrot.lane.b32.xlu1 %v3449_v35, %s3617_s9 }
 0x943   :  { %3470 = vrot.lane.b32.xlu0 %v3449_v35, %s3618_s21  ;;  %3465 = vrot.lane.b32.xlu1 %v3449_v35, %s3593_s0 }
 0x947   :  { %3480 = vrot.lane.b32.xlu0 %v3449_v35, %s3619_s22  ;;  %3475 = vrot.lane.b32.xlu1 %v3449_v35, %s3620_s5 }
 0x9ad   :  { %v3451_v40 = vpop.permute.xlu0 %3450  ;;  %v3446_v3 = vpop.permute.xlu1 %3445 }
 0x9ae   :  { %v3448_v59 = vunpack.i.h.bf16 %v3446_v3  ;;  %v3447_v48 = vunpack.i.l.bf16 %v3446_v3  ;;  %v3453_v8 = vunpack.i.h.bf16 %v3451_v40  ;;  %v3452_v44 = vunpack.i.l.bf16 %v3451_v40  ;;  %v2100_v40 = vld [vmem:[%s5933_s11 + $0x8] sm:$0xff] }
 0x9b0   :  { %v2891_v49 = vpack.c.bf16 %v3448_v59, %v3447_v48  ;;  %v2894_v57 = vpack.c.bf16 %v3453_v8, %v3452_v44  ;;  %v2099_v59 = vld [vmem:[%s5933_s11] sm:$0xff] }
 0x9b1   :  { %v3456_v50 = vpop.permute.xlu1 %3455  ;;  %v3461_v22 = vpop.permute.xlu0 %3460 }
 0x9b2   :  { %2892 = vmatpush1.bf16.msk.msra.mxu0 %vm2890_vm2, %v2891_v49  ;;  %v3458_v46 = vunpack.i.h.bf16 %v3456_v50  ;;  %v3457_v43 = vunpack.i.l.bf16 %v3456_v50  ;;  %v3463_v19 = vunpack.i.h.bf16 %v3461_v22  ;;  %v3462_v5 = vunpack.i.l.bf16 %v3461_v22  ;;  %v2117_v49 = vld [vmem:[%s5934_s12] sm:$0xff]  ;;  %v2118_v50 = vld [vmem:[%s5934_s12 + $0x8] sm:$0xff] }
 0x9b3   :  { %2038 = vmatprep.subr.bf16.mxu0 %v6442_v26 }
 0x9b4   :  { %v2897_v4 = vpack.c.bf16 %v3458_v46, %v3457_v43  ;;  %v2900_v20 = vpack.c.bf16 %v3463_v19, %v3462_v5 }
 0x9b5   :  { %v3466_v63 = vpop.permute.xlu1 %3465  ;;  %v3471_v42 = vpop.permute.xlu0 %3470 }
 0x9b6   :  { %2895 = vmatpush1.bf16.msk.msra.mxu0 %vm5549_vm15, %v2894_v57  ;;  %v3468_v45 = vunpack.i.h.bf16 %v3466_v63  ;;  %v3467_v39 = vunpack.i.l.bf16 %v3466_v63  ;;  %v3473_v25 = vunpack.i.h.bf16 %v3471_v42  ;;  %v3472_v60 = vunpack.i.l.bf16 %v3471_v42 }
 0x9b7   :  { %2040 = vmatprep.subr.bf16.mxu0 %v6442_v26 }
 0x9b8   :  { %v2903_v53 = vpack.c.bf16 %v3468_v45, %v3467_v39  ;;  %v2906_v2 = vpack.c.bf16 %v3473_v25, %v3472_v60  ;;  %v3562_v25 = vld [vmem:[%s5935_s13 + $0x4] ss:$8 sps:$4 sm:$0xff]  }
 0x9b9   :  { %v3476_v21 = vpop.permute.xlu1 %3475  ;;  %v3481_v62 = vpop.permute.xlu0 %3480  ;;  %2941 = vmatprep.mubr.msk.bf16.mxu1 %vm2032_vm12, %v3562_v25  ;;  %v2494_v25 = vld [vmem:[%s5938_s19 + $0x8] sm:$0x3]  ;;  %vm3622_vm12 = vmmov 0  }
 0x9ba   :  { %2898 = vmatpush1.bf16.msk.msra.mxu0 %vm2896_vm6, %v2897_v4  ;;  %v3478_v56 = vunpack.i.h.bf16 %v3476_v21  ;;  %v3477_v33 = vunpack.i.l.bf16 %v3476_v21  ;;  %v3483_v23 = vunpack.i.h.bf16 %v3481_v62  ;;  %v3482_v16 = vunpack.i.l.bf16 %v3481_v62 }
 0x9bb   :  { %2042 = vmatprep.subr.bf16.mxu0 %v6442_v26 }
 0x9bc   :  { %v2909_v29 = vpack.c.bf16 %v3478_v56, %v3477_v33  ;;  %v2912_v17 = vpack.c.bf16 %v3483_v23, %v3482_v16 }
 0x9be   :  { %2901 = vmatpush1.bf16.msk.msra.mxu0 %vm2899_vm10, %v2900_v20 }
 0x9bf   :  { %2044 = vmatprep.subr.bf16.mxu0 %v6442_v26 }
 0x9c2   :  { %2045 = vmatpush1.bf16.msra.mxu0 %v2016_v54 }
 0x9c3   :  { %2046 = vmatprep.subr.bf16.mxu0 %v6442_v26 }
 0x9c6   :  { %2904 = vmatpush1.bf16.msk.msra.mxu0 %vm2902_vm0, %v2903_v53 }
 0x9c7   :  { %2048 = vmatprep.subr.bf16.mxu0 %v6442_v26 }
 0x9ca   :  { %2907 = vmatpush1.bf16.msk.msra.mxu0 %vm2905_vm13, %v2906_v2 }
 0x9cb   :  { %2050 = vmatprep.subr.bf16.mxu0 %v6442_v26 }
 0x9ce   :  { %2910 = vmatpush1.bf16.msk.msra.mxu0 %vm5609_vm8, %v2909_v29 }
 0x9cf   :  { %2052 = vmatprep.subr.bf16.mxu0 %v6442_v26 }
 0x9d2   :  { %2913 = vmatpush1.bf16.msk.msra.mxu0 %vm2911_vm5, %v2912_v17 }
 0x9d5   :  { %2069 = vmatmul.mubr.bf16.vlgmr.msra.gmra.mrb[12].mxu0 %v3561_v51 }
 0xaa8   :  { %v2070_v61 = vpop.f32.mrb[12].mxu0 }
 0xaa9   :  { %2077 = vadd.xlane.f32.xlu1 %v2070_v61  ;;  %v2072_v10 = vpop.f32.mrb[13].mxu0  ;;  %v2083_v37 = vmul.f32 %v2070_v61, %v2070_v61 }
 0xaaa   :  { %v2073_v12 = vpop.f32.mrb[14].mxu0 }
 0xaab   :  { %v2084_v34 = vmul.f32 %v2073_v12, %v2073_v12  ;;  %2079 = vadd.xlane.f32.xlu0 %v2073_v12  ;;  %v2075_v27 = vpop.f32.mrb[15].mxu0 }
 0xaad   :  { %2087 = vadd.xlane.f32.xlu1 %v2084_v34 }
 0xaaf   :  { %2085 = vadd.xlane.f32.xlu0 %v2083_v37 }
 0xb36   :  { %v2078_v47 = vpop.xlane.xlu1 %2077 }
 0xb37   :  { %v2081_v55 = vmul.f32 0.0078125, %v2078_v47 }
 0xb38   :  { %v2080_v0 = vpop.xlane.xlu0 %2079 }
 0xb39   :  { %v2082_v58 = vmul.f32 0.0078125, %v2080_v0  ;;  %v2103_v38 = vsub.f32 %v2070_v61, %v2081_v55  ;;  %v2091_v35 = vmul.f32 %v2081_v55, %v2081_v55 }
 0xb3a   :  { %v2088_v36 = vpop.xlane.xlu1 %2087 }
 0xb3b   :  { %v2092_v24 = vmul.f32 %v2082_v58, %v2082_v58  ;;  %v2090_v30 = vmul.f32 0.0078125, %v2088_v36  ;;  %v2104_v52 = vsub.f32 %v2073_v12, %v2082_v58 }
 0xb3c   :  { %v2086_v31 = vpop.xlane.xlu0 %2085 }
 0xb3d   :  { %v2094_v54 = vsub.f32 %v2090_v30, %v2092_v24  ;;  %v2089_v11 = vmul.f32 0.0078125, %v2086_v31  ;;  %v3564_v31 = vld [vmem:[%s5935_s13] ss:$8 sps:$4 sm:$0xff]  }
 0xb3f   :  { %v2096_v6 = vadd.f32 1e-05, %v2094_v54  ;;  %v2093_v28 = vsub.f32 %v2089_v11, %v2091_v35 }
 0xb41   :  { %3581 = vrsqrt.f32 %v2096_v6  ;;  %v2095_v32 = vadd.f32 1e-05, %v2093_v28 }
 0xb43   :  { %3583 = vrsqrt.f32 %v2095_v32 }
 0xb4b   :  { %v3582_v3 = vpop.eup %3581 }
 0xb4c   :  { %v2102_v48 = vmul.f32 %v3582_v3, %v2100_v40 }
 0xb4d   :  { %v3584_v8 = vpop.eup %3583 }
 0xb4e   :  { %2112 = vperm.xlu1 %3128, %v2102_v48   ;;  %v2101_v44 = vmul.f32 %v3584_v8, %v2099_v59 }
 0xb50   :  { %2107 = vperm.xlu0 %3127, %v2101_v44  }
 0xb52   :  { %2121 = vperm.xlu1 %3128, %v2117_v49  }
 0xb54   :  { %2126 = vperm.xlu0 %3127, %v2118_v50  }
 0xbcd   :  { %v2113_v57 = vpop.permute.xlu1 %2112 }
 0xbce   :  { %v2116_v19 = vmul.f32 %v2113_v57, %v2104_v52 }
 0xbcf   :  { %v2108_v46 = vpop.permute.xlu0 %2107 }
 0xbd0   :  { %v2115_v43 = vmul.f32 %v2108_v46, %v2103_v38 }
 0xbd1   :  { %v2122_v22 = vpop.permute.xlu1 %2121 }
 0xbd2   :  { %v2129_v5 = vadd.f32 %v2122_v22, %v2115_v43 }
 0xbd3   :  { %v2127_v4 = vpop.permute.xlu0 %2126 }
 0xbd4   :  { %v2130_v20 = vadd.f32 %v2127_v4, %v2116_v19  ;;  %v2131_v63 = vmax.f32 %v2129_v5, 0.0  ;;  %v2267_v5 = vld [vmem:[%s5937_s14] sm:$0xff] }
 0xbd6   :  { %v2132_v45 = vmax.f32 %v2130_v20, 0.0 }
 0xbd8   :  { %v3489_v39 = vpack.i.bf16 %v2132_v45, %v2131_v63  ;;  %v2185_v42 = vpack.c.bf16 %v2132_v45, %v2131_v63  ;;  %v2286_v63 = vld [vmem:[%s5936_s15 + $0x8] sm:$0xff] }
 0xbd9   :  { %v2268_v45 = vld [vmem:[%s5937_s14 + $0x8] sm:$0xff] }
 0xbda   :  { %3490 = vrot.lane.b32.xlu0 %v3489_v39, %s3615_s8  ;;  %3485 = vrot.lane.b32.xlu1 %v3489_v39, %s3616_s1 }
 0xbde   :  { %3500 = vrot.lane.b32.xlu0 %v3489_v39, %s3591_s28  ;;  %3495 = vrot.lane.b32.xlu1 %v3489_v39, %s3617_s9 }
 0xbe2   :  { %3510 = vrot.lane.b32.xlu0 %v3489_v39, %s3618_s21  ;;  %3505 = vrot.lane.b32.xlu1 %v3489_v39, %s3593_s0 }
 0xbe6   :  { %3520 = vrot.lane.b32.xlu0 %v3489_v39, %s3619_s22  ;;  %3515 = vrot.lane.b32.xlu1 %v3489_v39, %s3620_s5 }
 0xc4c   :  { %v3491_v60 = vpop.permute.xlu0 %3490  ;;  %v3486_v53 = vpop.permute.xlu1 %3485 }
 0xc4d   :  { %v3488_v21 = vunpack.i.h.bf16 %v3486_v53  ;;  %v3487_v2 = vunpack.i.l.bf16 %v3486_v53  ;;  %v3493_v56 = vunpack.i.h.bf16 %v3491_v60  ;;  %v3492_v33 = vunpack.i.l.bf16 %v3491_v60  ;;  %v2493_v60 = vld [vmem:[%s5938_s19] sm:$0xff] }
 0xc4e   :  { %v3621_v53 = vmov 0.0  }
 0xc4f   :  { %v2918_v62 = vpack.c.bf16 %v3488_v21, %v3487_v2  ;;  %v2921_v16 = vpack.c.bf16 %v3493_v56, %v3492_v33  ;;  %3033 = vmatprep.subr.bf16.mxu0 %v3621_v53  ;;  %v3565_v21 = vld [vmem:[%s5939_s18] sm:$0xff]   ;;  %3049 = vmatprep.mubr.msk.bf16.mxu0 %vm3622_vm12, %v3621_v53  ;;  %v3566_v2 = vld [vmem:[%s5939_s18 + $0x8] sm:$0xff]   ;;  %v3567_v56 = vld [vmem:[%s5939_s18 + $0x10] sm:$0xff]  }
 0xc50   :  { %v3496_v23 = vpop.permute.xlu1 %3495  ;;  %v3501_v51 = vpop.permute.xlu0 %3500  ;;  %3034 = vmatpush3.bf16.msra.mxu0 %v3565_v21  ;;  %v3568_v33 = vld [vmem:[%s5939_s18 + $0x18] sm:$0xff]  }
 0xc51   :  { %2919 = vmatpush1.bf16.msk.msra.mxu1 %vm2890_vm2, %v2918_v62  ;;  %v3498_v29 = vunpack.i.h.bf16 %v3496_v23  ;;  %v3497_v17 = vunpack.i.l.bf16 %v3496_v23  ;;  %v3503_v61 = vunpack.i.h.bf16 %v3501_v51  ;;  %v3502_v10 = vunpack.i.l.bf16 %v3501_v51  ;;  %3035 = vmatprep.subr.bf16.mxu0 %v3621_v53  ;;  %v3569_v62 = vld [vmem:[%s5939_s18 + $0x20] sm:$0xff]   ;;  %v3570_v23 = vld [vmem:[%s5939_s18 + $0x28] sm:$0xff]  }
 0xc52   :  { %2206 = vmatprep.subr.bf16.mxu1 %v6442_v26 }
 0xc53   :  { %v2924_v12 = vpack.c.bf16 %v3498_v29, %v3497_v17  ;;  %v2927_v7 = vpack.c.bf16 %v3503_v61, %v3502_v10  ;;  %v3572_v29 = vld [vmem:[%s5939_s18 + $0x38] sm:$0xff]   ;;  %v6459_v17 = vlaneseq }
 0xc54   :  { %v3506_v34 = vpop.permute.xlu1 %3505  ;;  %v3511_v37 = vpop.permute.xlu0 %3510  ;;  %3036 = vmatpush3.bf16.msra.mxu0 %v3566_v2 }
 0xc55   :  { %2922 = vmatpush1.bf16.msk.msra.mxu1 %vm5549_vm15, %v2921_v16  ;;  %v3508_v15 = vunpack.i.h.bf16 %v3506_v34  ;;  %v3507_v27 = vunpack.i.l.bf16 %v3506_v34  ;;  %v3513_v9 = vunpack.i.h.bf16 %v3511_v37  ;;  %v3512_v47 = vunpack.i.l.bf16 %v3511_v37  ;;  %3037 = vmatprep.subr.bf16.mxu0 %v3621_v53  ;;  %v3571_v16 = vld [vmem:[%s5939_s18 + $0x30] sm:$0xff]  }
 0xc56   :  { %2208 = vmatprep.subr.bf16.mxu1 %v6442_v26  ;;  %v5768_v51 = vshrl.u32 %v6459_v17, 7 }
 0xc57   :  { %v2930_v55 = vpack.c.bf16 %v3508_v15, %v3507_v27  ;;  %v2933_v18 = vpack.c.bf16 %v3513_v9, %v3512_v47 }
 0xc58   :  { %v3516_v0 = vpop.permute.xlu1 %3515  ;;  %v3521_v36 = vpop.permute.xlu0 %3520  ;;  %3038 = vmatpush3.bf16.msra.mxu0 %v3567_v56  ;;  %v2305_v34 = vsub.s32 0, %v5768_v51  ;;  %v2316_v15 = vsub.s32 1, %v5768_v51  ;;  %v2327_v27 = vsub.s32 2, %v5768_v51  ;;  %v2338_v9 = vsub.s32 3, %v5768_v51  ;;  %v2953_v56 = vld [vmem:[%s5940_s17 + $0x68] sm:$0x3] }
 0xc59   :  { %2925 = vmatpush1.bf16.msk.msra.mxu1 %vm2896_vm6, %v2924_v12  ;;  %v3518_v58 = vunpack.i.h.bf16 %v3516_v0  ;;  %v3517_v38 = vunpack.i.l.bf16 %v3516_v0  ;;  %v3523_v24 = vunpack.i.h.bf16 %v3521_v36  ;;  %v3522_v30 = vunpack.i.l.bf16 %v3521_v36  ;;  %3039 = vmatprep.subr.bf16.mxu0 %v3621_v53  ;;  %v2302_v0 = vld [vmem:[%s5940_s17 + $0x8] sm:$0x3] }
 0xc5a   :  { %2210 = vmatprep.subr.bf16.mxu1 %v6442_v26 }
 0xc5b   :  { %v2936_v52 = vpack.c.bf16 %v3518_v58, %v3517_v38  ;;  %v2939_v14 = vpack.c.bf16 %v3523_v24, %v3522_v30  ;;  %v2349_v58 = vsub.s32 4, %v5768_v51  ;;  %v2943_v24 = vld [vmem:[%s5940_s17 + $0x18] sm:$0x3] }
 0xc5c   :  { %3040 = vmatpush3.bf16.msra.mxu0 %v3568_v33 }
 0xc5d   :  { %2928 = vmatpush1.bf16.msk.msra.mxu1 %vm2899_vm10, %v2927_v7  ;;  %3041 = vmatprep.subr.bf16.mxu0 %v3621_v53 }
 0xc5e   :  { %2212 = vmatprep.subr.bf16.mxu1 %v6442_v26 }
 0xc60   :  { %3042 = vmatpush3.bf16.msra.mxu0 %v3569_v62 }
 0xc61   :  { %2213 = vmatpush1.bf16.msra.mxu1 %v2185_v42  ;;  %3043 = vmatprep.subr.bf16.mxu0 %v3621_v53 }
 0xc62   :  { %2214 = vmatprep.subr.bf16.mxu1 %v6442_v26 }
 0xc64   :  { %3044 = vmatpush3.bf16.msra.mxu0 %v3570_v23 }
 0xc65   :  { %2931 = vmatpush1.bf16.msk.msra.mxu1 %vm2902_vm0, %v2930_v55  ;;  %3045 = vmatprep.subr.bf16.mxu0 %v3621_v53  ;;  %v2301_v55 = vld [vmem:[%s5940_s17] sm:$0xff] }
 0xc66   :  { %2216 = vmatprep.subr.bf16.mxu1 %v6442_v26 }
 0xc68   :  { %3046 = vmatpush3.bf16.msra.mxu0 %v3571_v16  ;;  %v2954_v16 = vld [vmem:[%s5940_s17 + $0x70] sm:$0xff] }
 0xc69   :  { %2934 = vmatpush1.bf16.msk.msra.mxu1 %vm2905_vm13, %v2933_v18  ;;  %3047 = vmatprep.subr.bf16.mxu0 %v3621_v53  ;;  %v2942_v18 = vld [vmem:[%s5940_s17 + $0x10] sm:$0xff]  ;;  %v2952_v53 = vld [vmem:[%s5940_s17 + $0x60] sm:$0xff] }
 0xc6a   :  { %2218 = vmatprep.subr.bf16.mxu1 %v6442_v26 }
 0xc6c   :  { %3048 = vmatpush3.bf16.msra.mxu0 %v3572_v29 }
 0xc6d   :  { %2937 = vmatpush1.bf16.msk.msra.mxu1 %vm5609_vm8, %v2936_v52 }
 0xc6e   :  { %2220 = vmatprep.subr.bf16.mxu1 %v6442_v26 }
 0xc71   :  { %2940 = vmatpush1.bf16.msk.msra.mxu1 %vm2911_vm5, %v2939_v14  ;;  %v2944_v14 = vld [vmem:[%s5940_s17 + $0x20] sm:$0xff] }
 0xc74   :  { %2237 = vmatmul.mubr.bf16.vlgmr.msra.gmra.mrb[20].mxu1 %v3564_v31  ;;  %v2360_v31 = vsub.s32 5, %v5768_v51 }
 0xd47   :  { %v5703_v41 = vpop.f32.mrb[20].mxu1 }
 0xd48   :  { %v2251_v1 = vmul.f32 %v5703_v41, %v5703_v41  ;;  %2245 = vadd.xlane.f32.xlu1 %v5703_v41  ;;  %v2240_v26 = vpop.f32.mrb[21].mxu1 }
 0xd49   :  { %v5708_v35 = vpop.f32.mrb[22].mxu1 }
 0xd4a   :  { %v2252_v54 = vmul.f32 %v5708_v35, %v5708_v35  ;;  %2253 = vadd.xlane.f32.xlu0 %v2251_v1  ;;  %v2243_v11 = vpop.f32.mrb[23].mxu1 }
 0xd4c   :  { %2255 = vadd.xlane.f32.xlu1 %v2252_v54 }
 0xd4e   :  { %2247 = vadd.xlane.f32.xlu0 %v5708_v35 }
 0xd5d   :  { %2289 = vperm.xlu1 %3128, %v2285_v13  }
 0xdd5   :  { %v2246_v6 = vpop.xlane.xlu1 %2245 }
 0xdd6   :  { %v5716_v28 = vmul.f32 0.0078125, %v2246_v6  ;;  %v2946_v6 = vld [vmem:[%s5940_s17 + $0x30] sm:$0xff] }
 0xdd7   :  { %v2254_v32 = vpop.xlane.xlu0 %2253 }
 0xdd8   :  { %v2259_v40 = vmul.f32 %v5716_v28, %v5716_v28  ;;  %v2257_v3 = vmul.f32 0.0078125, %v2254_v32  ;;  %v2271_v59 = vsub.f32 %v5703_v41, %v5716_v28  ;;  %v2371_v28 = vsub.s32 6, %v5768_v51 }
 0xdd9   :  { %v2256_v8 = vpop.xlane.xlu1 %2255 }
 0xdda   :  { %v2261_v48 = vsub.f32 %v2257_v3, %v2259_v40  ;;  %v2258_v57 = vmul.f32 0.0078125, %v2256_v8 }
 0xddb   :  { %v2248_v44 = vpop.xlane.xlu0 %2247 }
 0xddc   :  { %v2263_v49 = vadd.f32 1e-05, %v2261_v48  ;;  %v5722_v50 = vmul.f32 0.0078125, %v2248_v44 }
 0xddd   :  { %v2290_v12 = vpop.permute.xlu1 %2289 }
 0xdde   :  { %3585 = vrsqrt.f32 %v2263_v49  ;;  %v2260_v46 = vmul.f32 %v5722_v50, %v5722_v50  ;;  %v2272_v43 = vsub.f32 %v5708_v35, %v5722_v50  ;;  %v2945_v35 = vld [vmem:[%s5940_s17 + $0x28] sm:$0x3]  ;;  %v2948_v49 = vld [vmem:[%s5940_s17 + $0x40] sm:$0xff] }
 0xde0   :  { %v2262_v22 = vsub.f32 %v2258_v57, %v2260_v46  ;;  %v2949_v46 = vld [vmem:[%s5940_s17 + $0x48] sm:$0x3] }
 0xde2   :  { %v2264_v19 = vadd.f32 1e-05, %v2262_v22  ;;  %v2382_v22 = vsub.s32 7, %v5768_v51 }
 0xde4   :  { %3587 = vrsqrt.f32 %v2264_v19 }
 0xde8   :  { %v3586_v4 = vpop.eup %3585 }
 0xde9   :  { %v2269_v20 = vmul.f32 %v3586_v4, %v2267_v5  ;;  %v2950_v4 = vld [vmem:[%s5940_s17 + $0x50] sm:$0xff] }
 0xdeb   :  { %2275 = vperm.xlu0 %3127, %v2269_v20  }
 0xdee   :  { %v3588_v39 = vpop.eup %3587 }
 0xdef   :  { %2294 = vperm.xlu0 %3127, %v2286_v63   ;;  %v2270_v42 = vmul.f32 %v3588_v39, %v2268_v45  ;;  %v2951_v39 = vld [vmem:[%s5940_s17 + $0x58] sm:$0x3] }
 0xdf1   :  { %2280 = vperm.xlu1 %3128, %v2270_v42  }
 0xdf3   :  { %2502 = vperm.xlu0 %3127, %v2494_v25  }
 0xdf5   :  { %2497 = vperm.xlu1 %3128, %v2493_v60  }
 0xe6a   :  { %v2276_v61 = vpop.permute.xlu0 %2275 }
 0xe6b   :  { %v2283_v10 = vmul.f32 %v2276_v61, %v2271_v59  ;;  %v2947_v59 = vld [vmem:[%s5940_s17 + $0x38] sm:$0x3] }
 0xe6c   :  { %v2955_v61 = vld [vmem:[%s5940_s17 + $0x78] sm:$0x3] }
 0xe6d   :  { %v2297_v7 = vadd.f32 %v2290_v12, %v2283_v10 }
 0xe6e   :  { %v2295_v11 = vpop.permute.xlu0 %2294 }
 0xe6f   :  { %v2299_v37 = vmax.f32 %v2297_v7, 0.0 }
 0xe70   :  { %v2281_v47 = vpop.permute.xlu1 %2280 }
 0xe71   :  { %v2284_v38 = vmul.f32 %v2281_v47, %v2272_v43  ;;  %v2306_v36 = vrot.slane %v2299_v37, %v2305_v34  ;;  %v2317_v30 = vrot.slane %v2299_v37, %v2316_v15  ;;  %v2328_v52 = vrot.slane %v2299_v37, %v2327_v27 }
 0xe72   :  { %v2339_v54 = vrot.slane %v2299_v37, %v2338_v9  ;;  %v2350_v48 = vrot.slane %v2299_v37, %v2349_v58  ;;  %v2361_v43 = vrot.slane %v2299_v37, %v2360_v31  ;;  %v2372_v42 = vrot.slane %v2299_v37, %v2371_v28 }
 0xe73   :  { %v2307_v41 = vmul.f32 %v2306_v36, %v2301_v55  ;;  %v2308_v1 = vmul.f32 %v2306_v36, %v2302_v0  ;;  %v2318_v26 = vmul.f32 %v2942_v18, %v2317_v30  ;;  %v2319_v13 = vmul.f32 %v2943_v24, %v2317_v30  ;;  %v2957_v0 = vld [vmem:[%s5940_s17 + $0x88] sm:$0x3] }
 0xe74   :  { %v2298_v32 = vadd.f32 %v2295_v11, %v2284_v38  ;;  %v2329_v3 = vmul.f32 %v2944_v14, %v2328_v52  ;;  %v2330_v44 = vmul.f32 %v2945_v35, %v2328_v52  ;;  %v2340_v57 = vmul.f32 %v2946_v6, %v2339_v54  ;;  %v2959_v52 = vld [vmem:[%s5940_s17 + $0x98] sm:$0x3] }
 0xe75   :  { %v2320_v40 = vadd.f32 %v2318_v26, %v2307_v41  ;;  %v2321_v8 = vadd.f32 %v2319_v13, %v2308_v1  ;;  %v2341_v5 = vmul.f32 %v2947_v59, %v2339_v54  ;;  %v2351_v45 = vmul.f32 %v2948_v49, %v2350_v48  ;;  %v2961_v54 = vld [vmem:[%s5940_s17 + $0xa8] sm:$0x3] }
 0xe76   :  { %v5824_v20 = vmax.f32 %v2298_v32, 0.0  ;;  %v2352_v60 = vmul.f32 %v2949_v46, %v2350_v48  ;;  %v2362_v2 = vmul.f32 %v2950_v4, %v2361_v43  ;;  %v2383_v33 = vrot.slane %v2299_v37, %v2382_v22  ;;  %v2956_v37 = vld [vmem:[%s5940_s17 + $0x80] sm:$0xff]  ;;  %v2967_v4 = vld [vmem:[%s5940_s17 + $0xd8] sm:$0x3] }
 0xe77   :  { %v2331_v50 = vadd.f32 %v2329_v3, %v2320_v40  ;;  %v2332_v19 = vadd.f32 %v2330_v44, %v2321_v8  ;;  %v2363_v23 = vmul.f32 %v2951_v39, %v2361_v43  ;;  %v2373_v17 = vmul.f32 %v2952_v53, %v2372_v42  ;;  %v2963_v3 = vld [vmem:[%s5940_s17 + $0xb8] sm:$0x3] }
 0xe78   :  { %v2394_v10 = vrot.slane %v5824_v20, %v2305_v34  ;;  %v2374_v7 = vmul.f32 %v2953_v56, %v2372_v42  ;;  %v2384_v55 = vmul.f32 %v2954_v16, %v2383_v33  ;;  %v2405_v18 = vrot.slane %v5824_v20, %v2316_v15  ;;  %v2958_v34 = vld [vmem:[%s5940_s17 + $0x90] sm:$0xff]  ;;  %v2960_v15 = vld [vmem:[%s5940_s17 + $0xa0] sm:$0xff] }
 0xe79   :  { %v2342_v63 = vadd.f32 %v2340_v57, %v2331_v50  ;;  %v2343_v25 = vadd.f32 %v2341_v5, %v2332_v19  ;;  %v2385_v36 = vmul.f32 %v2955_v61, %v2383_v33  ;;  %v2416_v14 = vrot.slane %v5824_v20, %v2327_v27  ;;  %v2962_v27 = vld [vmem:[%s5940_s17 + $0xb0] sm:$0xff]  ;;  %v2965_v50 = vld [vmem:[%s5940_s17 + $0xc8] sm:$0x3] }
 0xe7a   :  { %v2395_v30 = vmul.f32 %v2956_v37, %v2394_v10  ;;  %v2396_v1 = vmul.f32 %v2957_v0, %v2394_v10  ;;  %v2406_v35 = vmul.f32 %v2958_v34, %v2405_v18  ;;  %v2427_v11 = vrot.slane %v5824_v20, %v2338_v9  ;;  %v2964_v9 = vld [vmem:[%s5940_s17 + $0xc0] sm:$0xff] }
 0xe7b   :  { %v2353_v21 = vadd.f32 %v2351_v45, %v2342_v63  ;;  %v2354_v62 = vadd.f32 %v2352_v60, %v2343_v25  ;;  %v2407_v6 = vmul.f32 %v2959_v52, %v2405_v18  ;;  %v2417_v40 = vmul.f32 %v2960_v15, %v2416_v14  ;;  %v2969_v60 = vld [vmem:[%s5940_s17 + $0xe8] sm:$0x3] }
 0xe7c   :  { %v2438_v59 = vrot.slane %v5824_v20, %v2349_v58  ;;  %v2418_v8 = vmul.f32 %v2961_v54, %v2416_v14  ;;  %v2428_v49 = vmul.f32 %v2962_v27, %v2427_v11  ;;  %v2449_v57 = vrot.slane %v5824_v20, %v2360_v31  ;;  %v2966_v58 = vld [vmem:[%s5940_s17 + $0xd0] sm:$0xff]  ;;  %v2968_v31 = vld [vmem:[%s5940_s17 + $0xe0] sm:$0xff] }
 0xe7d   :  { %v2364_v29 = vadd.f32 %v2362_v2, %v2353_v21  ;;  %v2365_v12 = vadd.f32 %v2363_v23, %v2354_v62  ;;  %v2429_v43 = vmul.f32 %v2963_v3, %v2427_v11  ;;  %v2460_v63 = vrot.slane %v5824_v20, %v2371_v28  ;;  %v2970_v28 = vld [vmem:[%s5940_s17 + $0xf0] sm:$0xff]  ;;  %v2971_v62 = vld [vmem:[%s5940_s17 + $0xf8] sm:$0x3] }
 0xe7e   :  { %v2439_v5 = vmul.f32 %v2964_v9, %v2438_v59  ;;  %v2440_v39 = vmul.f32 %v2965_v50, %v2438_v59  ;;  %v2450_v25 = vmul.f32 %v2966_v58, %v2449_v57  ;;  %v2471_v53 = vrot.slane %v5824_v20, %v2382_v22 }
 0xe7f   :  { %v2375_v47 = vadd.f32 %v2373_v17, %v2364_v29  ;;  %v2376_v38 = vadd.f32 %v2374_v7, %v2365_v12  ;;  %v2451_v2 = vmul.f32 %v2967_v4, %v2449_v57  ;;  %v2461_v33 = vmul.f32 %v2968_v31, %v2460_v63  ;;  %v2498_v12 = vpop.permute.xlu1 %2497 }
 0xe80   :  { %v2462_v16 = vmul.f32 %v2969_v60, %v2460_v63  ;;  %v2472_v17 = vmul.f32 %v2970_v28, %v2471_v53  ;;  %v2473_v51 = vmul.f32 %v2971_v62, %v2471_v53 }
 0xe81   :  { %v2386_v24 = vadd.f32 %v2384_v55, %v2375_v47  ;;  %v2387_v41 = vadd.f32 %v2385_v36, %v2376_v38  ;;  %v2503_v55 = vpop.permute.xlu0 %2502 }
 0xe83   :  { %v2397_v26 = vadd.f32 %v2395_v30, %v2386_v24  ;;  %v2398_v13 = vadd.f32 %v2396_v1, %v2387_v41 }
 0xe85   :  { %v2408_v32 = vadd.f32 %v2406_v35, %v2397_v26  ;;  %v2409_v48 = vadd.f32 %v2407_v6, %v2398_v13 }
 0xe87   :  { %v2419_v44 = vadd.f32 %v2417_v40, %v2408_v32  ;;  %v2420_v46 = vadd.f32 %v2418_v8, %v2409_v48 }
 0xe89   :  { %v2430_v19 = vadd.f32 %v2428_v49, %v2419_v44  ;;  %v2431_v45 = vadd.f32 %v2429_v43, %v2420_v46 }
 0xe8b   :  { %v2441_v42 = vadd.f32 %v2439_v5, %v2430_v19  ;;  %v2442_v21 = vadd.f32 %v2440_v39, %v2431_v45 }
 0xe8d   :  { %v2452_v56 = vadd.f32 %v2450_v25, %v2441_v42  ;;  %v2453_v23 = vadd.f32 %v2451_v2, %v2442_v21 }
 0xe8f   :  { %v2463_v29 = vadd.f32 %v2461_v33, %v2452_v56  ;;  %v2464_v61 = vadd.f32 %v2462_v16, %v2453_v23 }
 0xe91   :  { %v2474_v10 = vadd.f32 %v2472_v17, %v2463_v29  ;;  %v2475_v22 = vadd.f32 %v2473_v51, %v2464_v61 }
 0xe93   :  { %v2476_v20 = vpack.c.bf16 %v2475_v22, %v2474_v10 }
 0xe95   :  { %3050 = vmatmul.mubr.bf16.vlgmr.msra.gmra.mrb[16].mxu0 %v2476_v20 }
 0xf68   :  { %v2587_v7 = vpop.f32.mrb[16].mxu0 }
 0xf69   :  { %v2588_v37 = vadd.f32 %v2587_v7, %v2498_v12  ;;  %v3051_v47 = vpop.f32.mrb[17].mxu0 }
 0xf6a   :  { %v2590_v0 = vpop.f32.mrb[18].mxu0 }
 0xf6b   :  { %2595 = vst.msk [vmem:[%s5941_s20] sm:$0xff] %vm2594_vm4, %v2588_v37  ;;  %v2591_v18 = vadd.f32 %v2590_v0, %v2503_v55  ;;  %v3052_v38 = vpop.f32.mrb[19].mxu0 }
 0xf6d   :  { %2597 = vst.msk [vmem:[%s5941_s20 + $0x8] sm:$0x3] %vm2596_vm1, %v2591_v18 }

</bundles_post_ra>
